<compile_context>
chip_gen: v5e
topology: v5e:2x2
jax: 0.10.0
libtpu: 0.0.40
codegen_flags: <defaults>
</compile_context>

<pallas_src>
import functools

import numpy as np
import jax
import jax.numpy as jnp
from jax.experimental import pallas as pl
from jax.experimental.pallas import tpu as pltpu


# --------------------------------------------------------------------------
# helpers
# --------------------------------------------------------------------------
def _cdiv(a, b):
    return -(-a // b)


def _round_up(x, m):
    return ((x + m - 1) // m) * m


def _choose_tile(p, max_tile=1024, min_steps=2):
    """Balanced, sublane-aligned row tile; >=2 grid steps when P allows."""
    if p <= 8:
        return 8
    steps = max(min_steps, _cdiv(p, max_tile))
    return min(_round_up(_cdiv(p, steps), 8), _round_up(p, 8))


# --------------------------------------------------------------------------
# Pallas kernels
# --------------------------------------------------------------------------
def _mm_bias_kernel(x_ref, w_ref, b_ref, o_ref, *, apply_relu):
    """o = relu_opt((x @ w) + b). x cast in-kernel to the weight dtype."""
    x = x_ref[...].astype(w_ref.dtype)           # bf16 cast inside the kernel
    y = jnp.dot(x, w_ref[...], preferred_element_type=jnp.float32) + b_ref[...]
    if apply_relu:
        y = jnp.maximum(y, 0.0)
    o_ref[...] = y


def _tail_kernel(f5_ref, f4_ref, f3_ref, mh5_ref, mw5_ref, mh4_ref, mw4_ref,
                 wp_ref, bp_ref, pred_ref, f5u_ref, f4u_ref):
    """Fused: bilinear upsample (f5,f4) -> combine -> 1x1 predict conv.

    All intermediates live in VMEM / vregs; one grid step handles one
    (batch, H-strip) tile of the output.
    """
    C = f3_ref.shape[-1]

    def upsample(f_ref, mh_ref, mw_ref):
        h, w, _ = f_ref.shape
        hb, wo = mh_ref.shape[0], mw_ref.shape[0]
        # pass A (rows): (Hb, h) @ (h, w*C)   -- channels stay on lanes
        a = jnp.dot(mh_ref[...], f_ref[...].reshape(h, w * C),
                    preferred_element_type=jnp.float32).reshape(hb, w, C)
        # pass B (cols): batched over Hb rows, (W, w) @ (w, C) per row
        mwb = jnp.broadcast_to(mw_ref[...][None, :, :], (hb, wo, w))
        return jnp.einsum('hWw,hwc->hWc', mwb, a,
                          preferred_element_type=jnp.float32)

    o5 = upsample(f5_ref, mh5_ref, mw5_ref)
    o4 = upsample(f4_ref, mh4_ref, mw4_ref)
    o3 = f3_ref[...]
    o45 = o4 * o5
    o345 = o3 * o45

    f5u_ref[...] = o5
    f4u_ref[...] = o4

    wp = wp_ref[...]                               # (3, C), zero-padded past 64
    acc = o5 * wp[0] + o45 * wp[1] + o345 * wp[2]  # (Hb, W3, C)
    pred_ref[...] = jnp.sum(acc, axis=-1) + bp_ref[0]


# --------------------------------------------------------------------------
# Pallas wrappers
# --------------------------------------------------------------------------
def matmul_bias(x, w, bias, *, apply_relu=True, max_tile=1024):
    """x:(P,K) f32 @ w:(K,Cout) (bf16 or f32, BN pre-folded) + bias:(1,Cout)."""
    P, K = x.shape
    Cout = w.shape[1]
    tile = _choose_tile(P, max_tile)
    grid = _cdiv(P, tile)

    kernel = functools.partial(_mm_bias_kernel, apply_relu=apply_relu)
    return pl.pallas_call(
        kernel,
        out_shape=jax.ShapeDtypeStruct((P, Cout), jnp.float32),
        grid=(grid,),
        in_specs=[
            pl.BlockSpec((tile, K), lambda i: (i, 0)),
            pl.BlockSpec((K, Cout), lambda i: (0, 0)),
            pl.BlockSpec((1, Cout), lambda i: (0, 0)),
        ],
        out_specs=pl.BlockSpec((tile, Cout), lambda i: (i, 0)),
        compiler_params=pltpu.CompilerParams(dimension_semantics=("parallel",)),
    )(x, w, bias.reshape(1, Cout))


def interp_mat_1d(out_size, in_size):
    """align_corners=True bilinear weights as a dense (out, in) matrix."""
    if out_size == 1 or in_size == 1:
        pos = np.zeros((out_size,), dtype=np.float64)
    else:
        pos = np.arange(out_size, dtype=np.float64) * (in_size - 1) / (out_size - 1)
    lo = np.clip(np.floor(pos).astype(np.int64), 0, in_size - 1)
    hi = np.clip(lo + 1, 0, in_size - 1)
    frac = pos - lo
    m = np.zeros((out_size, in_size), dtype=np.float32)
    m[np.arange(out_size), lo] += (1.0 - frac)
    m[np.arange(out_size), hi] += frac
    return m


def fused_tail(f5, f4, f3, w_pred, b_pred):
    """Fused upsample(f5,f4 -> f3 size) + combine + 1x1 predict.

    f5:(N,h5,w5,C) f4:(N,h4,w4,C) f3:(N,H3,W3,C) with C=128 (channels 64..127
    are zero padding).  Returns pred:(N,H3,W3), f5u, f4u:(N,H3,W3,C).
    """
    N, h5, w5, C = f5.shape
    _, h4, w4, _ = f4.shape
    _, H3, W3, _ = f3.shape

    mh5 = jnp.asarray(interp_mat_1d(H3, h5))
    mw5 = jnp.asarray(interp_mat_1d(W3, w5))
    mh4 = jnp.asarray(interp_mat_1d(H3, h4))
    mw4 = jnp.asarray(interp_mat_1d(W3, w4))

    # Strip-block over H3 to bound the VMEM working set (v7x: 64 MiB/TC).
    Hb = H3 if H3 <= 64 else 64
    nH = _cdiv(H3, Hb)

    out_shapes = (
        jax.ShapeDtypeStruct((N, H3, W3), jnp.float32),
        jax.ShapeDtypeStruct((N, H3, W3, C), jnp.float32),
        jax.ShapeDtypeStruct((N, H3, W3, C), jnp.float32),
    )
    in_specs = [
        pl.BlockSpec((None, h5, w5, C), lambda n, t: (n, 0, 0, 0)),
        pl.BlockSpec((None, h4, w4, C), lambda n, t: (n, 0, 0, 0)),
        pl.BlockSpec((None, Hb, W3, C), lambda n, t: (n, t, 0, 0)),
        pl.BlockSpec((Hb, h5), lambda n, t: (t, 0)),
        pl.BlockSpec((W3, w5), lambda n, t: (0, 0)),
        pl.BlockSpec((Hb, h4), lambda n, t: (t, 0)),
        pl.BlockSpec((W3, w4), lambda n, t: (0, 0)),
        pl.BlockSpec((3, C), lambda n, t: (0, 0)),
        pl.BlockSpec(memory_space=pltpu.MemorySpace.SMEM),
    ]
    out_specs = (
        pl.BlockSpec((None, Hb, W3), lambda n, t: (n, t, 0)),
        pl.BlockSpec((None, Hb, W3, C), lambda n, t: (n, t, 0, 0)),
        pl.BlockSpec((None, Hb, W3, C), lambda n, t: (n, t, 0, 0)),
    )
    return pl.pallas_call(
        _tail_kernel,
        out_shape=out_shapes,
        grid=(N, nH),
        in_specs=in_specs,
        out_specs=out_specs,
        compiler_params=pltpu.CompilerParams(
            dimension_semantics=("parallel", "parallel")),
    )(f5, f4, f3, mh5, mw5, mh4, mw4, w_pred, b_pred)


# --------------------------------------------------------------------------
# backbone stub, forward, params
# --------------------------------------------------------------------------
def backbone_stub(x_nhwc, params):
    # TODO(synk): deterministic stand-in for the (unprovided) Res2Net50 backbone.
    N, H, W, Cin = x_nhwc.shape
    feats = {}
    for name, stride in (("out3", 8), ("out4", 16), ("out5", 32)):
        h, w = H // stride, W // stride
        pooled = x_nhwc.reshape(N, h, stride, w, stride, Cin).mean(axis=(2, 4))
        cout = params[name + "_w"].shape[1]
        y = matmul_bias(pooled.reshape(N * h * w, Cin),
                        params[name + "_w"], params[name + "_b"],
                        apply_relu=True)
        feats[name] = y.reshape(N, h, w, cout)
    return feats["out3"], feats["out4"], feats["out5"]


def sanet_forward(x, params):
    """x: (N, 3, H, W) NCHW. Returns (pred, out5, out4, out3) in NCHW."""
    N = x.shape[0]
    x_nhwc = jnp.transpose(x, (0, 2, 3, 1))   # single layout conversion at input

    out3, out4, out5 = backbone_stub(x_nhwc, params)

    def head(feat, pfx):
        # 1x1 conv + BatchNorm(eval, folded in prepare_params) + ReLU,
        # output padded to 128 lanes (channels 64..127 are zeros).
        n, h, w, cin = feat.shape
        y = matmul_bias(feat.reshape(n * h * w, cin),
                        params[pfx + "_w"], params[pfx + "_b"], apply_relu=True)
        return y.reshape(n, h, w, 128)

    f5 = head(out5, "layer5")
    f4 = head(out4, "layer4")
    f3 = head(out3, "layer3")

    pred, f5u, f4u = fused_tail(f5, f4, f3, params["pred_w"], params["pred_b"])

    H3, W3 = f3.shape[1], f3.shape[2]
    to_nchw64 = lambda t: jnp.transpose(t[..., :64], (0, 3, 1, 2))
    pred = pred.reshape(N, 1, H3, W3)
    return pred, to_nchw64(f5u), to_nchw64(f4u), to_nchw64(f3)


def init_params(key):
    """Raw (PyTorch-layout-equivalent) parameters."""
    ks = jax.random.split(key, 32)

    def nrm(k, shape, s=0.05):
        return jax.random.normal(k, shape, jnp.float32) * s

    p = {}
    # backbone stub projections (3 -> C)
    p["out3_w"], p["out3_b"] = nrm(ks[0], (3, 512)), nrm(ks[1], (512,))
    p["out4_w"], p["out4_b"] = nrm(ks[2], (3, 1024)), nrm(ks[3], (1024,))
    p["out5_w"], p["out5_b"] = nrm(ks[4], (3, 2048)), nrm(ks[5], (2048,))
    # head layers: 1x1 conv (Cin->64) + BatchNorm2d(64)
    for i, (pfx, cin) in enumerate((("layer5", 2048), ("layer4", 1024), ("layer3", 512))):
        base = 6 + 2 * i
        p[pfx + "_w"] = nrm(ks[base], (cin, 64))
        p[pfx + "_cb"] = nrm(ks[base + 1], (64,))
        p[pfx + "_gamma"] = jnp.ones((64,), jnp.float32)
        p[pfx + "_beta"] = jnp.zeros((64,), jnp.float32)
        p[pfx + "_mean"] = jnp.zeros((64,), jnp.float32)
        p[pfx + "_var"] = jnp.ones((64,), jnp.float32)
    # predict: 1x1 conv (192 -> 1) with bias; 192 = [out5 | out4*out5 | out3*out4*out5]
    p["pred_w"] = nrm(ks[20], (192, 1))
    p["pred_b"] = nrm(ks[21], (1,))
    return p


def prepare_params(p, use_bf16=True):
    """One-time (outside the per-forward path): fold BN into the 1x1 convs,
    zero-pad 64-wide outputs to 128 lanes, and cast weights to bf16."""
    wdt = jnp.bfloat16 if use_bf16 else jnp.float32
    q = {}
    for name in ("out3", "out4", "out5"):
        q[name + "_w"] = p[name + "_w"].astype(wdt)
        q[name + "_b"] = p[name + "_b"].reshape(1, -1).astype(jnp.float32)
    for pfx in ("layer3", "layer4", "layer5"):
        scale = p[pfx + "_gamma"] * jax.lax.rsqrt(p[pfx + "_var"] + 1e-5)
        bias = p[pfx + "_beta"] + (p[pfx + "_cb"] - p[pfx + "_mean"]) * scale
        w = p[pfx + "_w"] * scale[None, :]
        cin = w.shape[0]
        wpad = jnp.zeros((cin, 128), jnp.float32).at[:, :64].set(w)
        bpad = jnp.zeros((1, 128), jnp.float32).at[:, :64].set(bias)
        q[pfx + "_w"] = wpad.astype(wdt)
        q[pfx + "_b"] = bpad
    wp = p["pred_w"].reshape(3, 64)
    q["pred_w"] = jnp.zeros((3, 128), jnp.float32).at[:, :64].set(wp)
    q["pred_b"] = p["pred_b"].reshape(1).astype(jnp.float32)
    return q


if __name__ == "__main__":
    key = jax.random.PRNGKey(0)
    kx, kp = jax.random.split(key)
    # small but backbone-consistent shape: N=2, 3-channel RGB, 64x64 spatial
    x = jax.random.normal(kx, (2, 3, 64, 64), jnp.float32)
    params = prepare_params(init_params(kp), use_bf16=True)

    fwd = jax.jit(sanet_forward)
    pred, o5, o4, o3 = fwd(x, params)
    jax.block_until_ready((pred, o5, o4, o3))

    assert pred.shape == (2, 1, 8, 8)
    assert o5.shape == (2, 64, 8, 8)
    assert o4.shape == (2, 64, 8, 8)
    assert o3.shape == (2, 64, 8, 8)
    assert bool(jnp.all(jnp.isfinite(pred)))
    print("KERNEL_OK")
</pallas_src>

<mosaic_0001>
module attributes {stable_mosaic.version = 11 : i64} {
  func.func @_mm_bias_kernel(%arg0: i32, %arg1: memref<64x3xf32, #tpu.memory_space<vmem>>, %arg2: memref<3x512xbf16, #tpu.memory_space<vmem>>, %arg3: memref<1x512xf32, #tpu.memory_space<vmem>>, %arg4: memref<64x512xf32, #tpu.memory_space<vmem>>) attributes {dimension_semantics = [#tpu.dimension_semantics<parallel>], iteration_bounds = array<i64: 2>, scalar_prefetch = 0 : i64, scratch_operands = 0 : i64, tpu.core_type = #tpu.core_type<tc>, window_params = [{transform_indices = @transform_0, window_bounds = array<i64: 64, 3>}, {pipeline_mode = #tpu.pipeline_mode<synchronous>, transform_indices = @transform_1, window_bounds = array<i64: 3, 512>}, {pipeline_mode = #tpu.pipeline_mode<synchronous>, transform_indices = @transform_2, window_bounds = array<i64: 1, 512>}, {transform_indices = @transform_3, window_bounds = array<i64: 64, 512>}]} {
    %c0 = arith.constant 0 : index
    %c0_0 = arith.constant 0 : index
    %0 = vector.load %arg1[%c0, %c0_0] : memref<64x3xf32, #tpu.memory_space<vmem>>, vector<64x3xf32>
    %1 = arith.truncf %0 : vector<64x3xf32> to vector<64x3xbf16>
    %c0_1 = arith.constant 0 : index
    %c0_2 = arith.constant 0 : index
    %2 = vector.load %arg2[%c0_1, %c0_2] : memref<3x512xbf16, #tpu.memory_space<vmem>>, vector<3x512xbf16>
    %cst = arith.constant dense<0.000000e+00> : vector<64x512xf32>
    %3 = tpu.matmul %1, %2, %cst {dimension_numbers = #tpu.dot_dimension_numbers<[1], [0], [0], [1], [0, 0, 1, 1], [], []>} : vector<64x3xbf16>, vector<3x512xbf16>, vector<64x512xf32> -> vector<64x512xf32>
    %c0_3 = arith.constant 0 : index
    %c0_4 = arith.constant 0 : index
    %4 = vector.load %arg3[%c0_3, %c0_4] : memref<1x512xf32, #tpu.memory_space<vmem>>, vector<1x512xf32>
    %5 = vector.broadcast %4 : vector<1x512xf32> to vector<64x512xf32>
    %6 = arith.addf %3, %5 : vector<64x512xf32>
    %cst_5 = arith.constant 0.000000e+00 : f32
    %7 = vector.broadcast %cst_5 : f32 to vector<64x512xf32>
    %8 = arith.maximumf %6, %7 : vector<64x512xf32>
    %c0_6 = arith.constant 0 : index
    %c0_7 = arith.constant 0 : index
    %9 = vector.load %arg4[%c0_6, %c0_7] : memref<64x512xf32, #tpu.memory_space<vmem>>, vector<64x512xf32>
    tpu.vector_store %arg4[%c0_6, %c0_7], %8 {strides = array<i32>} : memref<64x512xf32, #tpu.memory_space<vmem>>, vector<64x512xf32>,
    return
  }
  func.func @transform_0(%arg0: i32) -> (i32, i32) {
    %c0_i32 = arith.constant 0 : i32
    %c0_i32_0 = arith.constant 0 : i32
    return %arg0, %c0_i32 : i32, i32
  }
  func.func @transform_1(%arg0: i32) -> (i32, i32) {
    %c0_i32 = arith.constant 0 : i32
    %c0_i32_0 = arith.constant 0 : i32
    %c0_i32_1 = arith.constant 0 : i32
    return %c0_i32, %c0_i32_0 : i32, i32
  }
  func.func @transform_2(%arg0: i32) -> (i32, i32) {
    %c0_i32 = arith.constant 0 : i32
    %c0_i32_0 = arith.constant 0 : i32
    %c0_i32_1 = arith.constant 0 : i32
    return %c0_i32, %c0_i32_0 : i32, i32
  }
  func.func @transform_3(%arg0: i32) -> (i32, i32) {
    %c0_i32 = arith.constant 0 : i32
    %c0_i32_0 = arith.constant 0 : i32
    return %arg0, %c0_i32 : i32, i32
  }
}

module attributes {stable_mosaic.version = 11 : i64} {
  func.func @_mm_bias_kernel(%arg0: i32, %arg1: memref<64x512xf32, #tpu.memory_space<vmem>>, %arg2: memref<512x128xbf16, #tpu.memory_space<vmem>>, %arg3: memref<1x128xf32, #tpu.memory_space<vmem>>, %arg4: memref<64x128xf32, #tpu.memory_space<vmem>>) attributes {dimension_semantics = [#tpu.dimension_semantics<parallel>], iteration_bounds = array<i64: 2>, scalar_prefetch = 0 : i64, scratch_operands = 0 : i64, tpu.core_type = #tpu.core_type<tc>, window_params = [{transform_indices = @transform_0, window_bounds = array<i64: 64, 512>}, {pipeline_mode = #tpu.pipeline_mode<synchronous>, transform_indices = @transform_1, window_bounds = array<i64: 512, 128>}, {pipeline_mode = #tpu.pipeline_mode<synchronous>, transform_indices = @transform_2, window_bounds = array<i64: 1, 128>}, {transform_indices = @transform_3, window_bounds = array<i64: 64, 128>}]} {
    %c0 = arith.constant 0 : index
    %c0_0 = arith.constant 0 : index
    %0 = vector.load %arg1[%c0, %c0_0] : memref<64x512xf32, #tpu.memory_space<vmem>>, vector<64x512xf32>
    %1 = arith.truncf %0 : vector<64x512xf32> to vector<64x512xbf16>
    %c0_1 = arith.constant 0 : index
    %c0_2 = arith.constant 0 : index
    %2 = vector.load %arg2[%c0_1, %c0_2] : memref<512x128xbf16, #tpu.memory_space<vmem>>, vector<512x128xbf16>
    %cst = arith.constant dense<0.000000e+00> : vector<64x128xf32>
    %3 = tpu.matmul %1, %2, %cst {dimension_numbers = #tpu.dot_dimension_numbers<[1], [0], [0], [1], [0, 0, 1, 1], [], []>} : vector<64x512xbf16>, vector<512x128xbf16>, vector<64x128xf32> -> vector<64x128xf32>
    %c0_3 = arith.constant 0 : index
    %c0_4 = arith.constant 0 : index
    %4 = vector.load %arg3[%c0_3, %c0_4] : memref<1x128xf32, #tpu.memory_space<vmem>>, vector<1x128xf32>
    %5 = vector.broadcast %4 : vector<1x128xf32> to vector<64x128xf32>
    %6 = arith.addf %3, %5 : vector<64x128xf32>
    %cst_5 = arith.constant 0.000000e+00 : f32
    %7 = vector.broadcast %cst_5 : f32 to vector<64x128xf32>
    %8 = arith.maximumf %6, %7 : vector<64x128xf32>
    %c0_6 = arith.constant 0 : index
    %c0_7 = arith.constant 0 : index
    %9 = vector.load %arg4[%c0_6, %c0_7] : memref<64x128xf32, #tpu.memory_space<vmem>>, vector<64x128xf32>
    tpu.vector_store %arg4[%c0_6, %c0_7], %8 {strides = array<i32>} : memref<64x128xf32, #tpu.memory_space<vmem>>, vector<64x128xf32>,
    return
  }
  func.func @transform_0(%arg0: i32) -> (i32, i32) {
    %c0_i32 = arith.constant 0 : i32
    %c0_i32_0 = arith.constant 0 : i32
    return %arg0, %c0_i32 : i32, i32
  }
  func.func @transform_1(%arg0: i32) -> (i32, i32) {
    %c0_i32 = arith.constant 0 : i32
    %c0_i32_0 = arith.constant 0 : i32
    %c0_i32_1 = arith.constant 0 : i32
    return %c0_i32, %c0_i32_0 : i32, i32
  }
  func.func @transform_2(%arg0: i32) -> (i32, i32) {
    %c0_i32 = arith.constant 0 : i32
    %c0_i32_0 = arith.constant 0 : i32
    %c0_i32_1 = arith.constant 0 : i32
    return %c0_i32, %c0_i32_0 : i32, i32
  }
  func.func @transform_3(%arg0: i32) -> (i32, i32) {
    %c0_i32 = arith.constant 0 : i32
    %c0_i32_0 = arith.constant 0 : i32
    return %arg0, %c0_i32 : i32, i32
  }
}

module attributes {stable_mosaic.version = 11 : i64} {
  func.func @_mm_bias_kernel(%arg0: i32, %arg1: memref<16x3xf32, #tpu.memory_space<vmem>>, %arg2: memref<3x1024xbf16, #tpu.memory_space<vmem>>, %arg3: memref<1x1024xf32, #tpu.memory_space<vmem>>, %arg4: memref<16x1024xf32, #tpu.memory_space<vmem>>) attributes {dimension_semantics = [#tpu.dimension_semantics<parallel>], iteration_bounds = array<i64: 2>, scalar_prefetch = 0 : i64, scratch_operands = 0 : i64, tpu.core_type = #tpu.core_type<tc>, window_params = [{transform_indices = @transform_0, window_bounds = array<i64: 16, 3>}, {pipeline_mode = #tpu.pipeline_mode<synchronous>, transform_indices = @transform_1, window_bounds = array<i64: 3, 1024>}, {pipeline_mode = #tpu.pipeline_mode<synchronous>, transform_indices = @transform_2, window_bounds = array<i64: 1, 1024>}, {transform_indices = @transform_3, window_bounds = array<i64: 16, 1024>}]} {
    %c0 = arith.constant 0 : index
    %c0_0 = arith.constant 0 : index
    %0 = vector.load %arg1[%c0, %c0_0] : memref<16x3xf32, #tpu.memory_space<vmem>>, vector<16x3xf32>
    %1 = arith.truncf %0 : vector<16x3xf32> to vector<16x3xbf16>
    %c0_1 = arith.constant 0 : index
    %c0_2 = arith.constant 0 : index
    %2 = vector.load %arg2[%c0_1, %c0_2] : memref<3x1024xbf16, #tpu.memory_space<vmem>>, vector<3x1024xbf16>
    %cst = arith.constant dense<0.000000e+00> : vector<16x1024xf32>
    %3 = tpu.matmul %1, %2, %cst {dimension_numbers = #tpu.dot_dimension_numbers<[1], [0], [0], [1], [0, 0, 1, 1], [], []>} : vector<16x3xbf16>, vector<3x1024xbf16>, vector<16x1024xf32> -> vector<16x1024xf32>
    %c0_3 = arith.constant 0 : index
    %c0_4 = arith.constant 0 : index
    %4 = vector.load %arg3[%c0_3, %c0_4] : memref<1x1024xf32, #tpu.memory_space<vmem>>, vector<1x1024xf32>
    %5 = vector.broadcast %4 : vector<1x1024xf32> to vector<16x1024xf32>
    %6 = arith.addf %3, %5 : vector<16x1024xf32>
    %cst_5 = arith.constant 0.000000e+00 : f32
    %7 = vector.broadcast %cst_5 : f32 to vector<16x1024xf32>
    %8 = arith.maximumf %6, %7 : vector<16x1024xf32>
    %c0_6 = arith.constant 0 : index
    %c0_7 = arith.constant 0 : index
    %9 = vector.load %arg4[%c0_6, %c0_7] : memref<16x1024xf32, #tpu.memory_space<vmem>>, vector<16x1024xf32>
    tpu.vector_store %arg4[%c0_6, %c0_7], %8 {strides = array<i32>} : memref<16x1024xf32, #tpu.memory_space<vmem>>, vector<16x1024xf32>,
    return
  }
  func.func @transform_0(%arg0: i32) -> (i32, i32) {
    %c0_i32 = arith.constant 0 : i32
    %c0_i32_0 = arith.constant 0 : i32
    return %arg0, %c0_i32 : i32, i32
  }
  func.func @transform_1(%arg0: i32) -> (i32, i32) {
    %c0_i32 = arith.constant 0 : i32
    %c0_i32_0 = arith.constant 0 : i32
    %c0_i32_1 = arith.constant 0 : i32
    return %c0_i32, %c0_i32_0 : i32, i32
  }
  func.func @transform_2(%arg0: i32) -> (i32, i32) {
    %c0_i32 = arith.constant 0 : i32
    %c0_i32_0 = arith.constant 0 : i32
    %c0_i32_1 = arith.constant 0 : i32
    return %c0_i32, %c0_i32_0 : i32, i32
  }
  func.func @transform_3(%arg0: i32) -> (i32, i32) {
    %c0_i32 = arith.constant 0 : i32
    %c0_i32_0 = arith.constant 0 : i32
    return %arg0, %c0_i32 : i32, i32
  }
}

module attributes {stable_mosaic.version = 11 : i64} {
  func.func @_mm_bias_kernel(%arg0: i32, %arg1: memref<16x1024xf32, #tpu.memory_space<vmem>>, %arg2: memref<1024x128xbf16, #tpu.memory_space<vmem>>, %arg3: memref<1x128xf32, #tpu.memory_space<vmem>>, %arg4: memref<16x128xf32, #tpu.memory_space<vmem>>) attributes {dimension_semantics = [#tpu.dimension_semantics<parallel>], iteration_bounds = array<i64: 2>, scalar_prefetch = 0 : i64, scratch_operands = 0 : i64, tpu.core_type = #tpu.core_type<tc>, window_params = [{transform_indices = @transform_0, window_bounds = array<i64: 16, 1024>}, {pipeline_mode = #tpu.pipeline_mode<synchronous>, transform_indices = @transform_1, window_bounds = array<i64: 1024, 128>}, {pipeline_mode = #tpu.pipeline_mode<synchronous>, transform_indices = @transform_2, window_bounds = array<i64: 1, 128>}, {transform_indices = @transform_3, window_bounds = array<i64: 16, 128>}]} {
    %c0 = arith.constant 0 : index
    %c0_0 = arith.constant 0 : index
    %0 = vector.load %arg1[%c0, %c0_0] : memref<16x1024xf32, #tpu.memory_space<vmem>>, vector<16x1024xf32>
    %1 = arith.truncf %0 : vector<16x1024xf32> to vector<16x1024xbf16>
    %c0_1 = arith.constant 0 : index
    %c0_2 = arith.constant 0 : index
    %2 = vector.load %arg2[%c0_1, %c0_2] : memref<1024x128xbf16, #tpu.memory_space<vmem>>, vector<1024x128xbf16>
    %cst = arith.constant dense<0.000000e+00> : vector<16x128xf32>
    %3 = tpu.matmul %1, %2, %cst {dimension_numbers = #tpu.dot_dimension_numbers<[1], [0], [0], [1], [0, 0, 1, 1], [], []>} : vector<16x1024xbf16>, vector<1024x128xbf16>, vector<16x128xf32> -> vector<16x128xf32>
    %c0_3 = arith.constant 0 : index
    %c0_4 = arith.constant 0 : index
    %4 = vector.load %arg3[%c0_3, %c0_4] : memref<1x128xf32, #tpu.memory_space<vmem>>, vector<1x128xf32>
    %5 = vector.broadcast %4 : vector<1x128xf32> to vector<16x128xf32>
    %6 = arith.addf %3, %5 : vector<16x128xf32>
    %cst_5 = arith.constant 0.000000e+00 : f32
    %7 = vector.broadcast %cst_5 : f32 to vector<16x128xf32>
    %8 = arith.maximumf %6, %7 : vector<16x128xf32>
    %c0_6 = arith.constant 0 : index
    %c0_7 = arith.constant 0 : index
    %9 = vector.load %arg4[%c0_6, %c0_7] : memref<16x128xf32, #tpu.memory_space<vmem>>, vector<16x128xf32>
    tpu.vector_store %arg4[%c0_6, %c0_7], %8 {strides = array<i32>} : memref<16x128xf32, #tpu.memory_space<vmem>>, vector<16x128xf32>,
    return
  }
  func.func @transform_0(%arg0: i32) -> (i32, i32) {
    %c0_i32 = arith.constant 0 : i32
    %c0_i32_0 = arith.constant 0 : i32
    return %arg0, %c0_i32 : i32, i32
  }
  func.func @transform_1(%arg0: i32) -> (i32, i32) {
    %c0_i32 = arith.constant 0 : i32
    %c0_i32_0 = arith.constant 0 : i32
    %c0_i32_1 = arith.constant 0 : i32
    return %c0_i32, %c0_i32_0 : i32, i32
  }
  func.func @transform_2(%arg0: i32) -> (i32, i32) {
    %c0_i32 = arith.constant 0 : i32
    %c0_i32_0 = arith.constant 0 : i32
    %c0_i32_1 = arith.constant 0 : i32
    return %c0_i32, %c0_i32_0 : i32, i32
  }
  func.func @transform_3(%arg0: i32) -> (i32, i32) {
    %c0_i32 = arith.constant 0 : i32
    %c0_i32_0 = arith.constant 0 : i32
    return %arg0, %c0_i32 : i32, i32
  }
}

module attributes {stable_mosaic.version = 11 : i64} {
  func.func @_mm_bias_kernel(%arg0: i32, %arg1: memref<8x3xf32, #tpu.memory_space<vmem>>, %arg2: memref<3x2048xbf16, #tpu.memory_space<vmem>>, %arg3: memref<1x2048xf32, #tpu.memory_space<vmem>>, %arg4: memref<8x2048xf32, #tpu.memory_space<vmem>>) attributes {dimension_semantics = [#tpu.dimension_semantics<parallel>], iteration_bounds = array<i64: 1>, scalar_prefetch = 0 : i64, scratch_operands = 0 : i64, tpu.core_type = #tpu.core_type<tc>, window_params = [{transform_indices = @transform_0, window_bounds = array<i64: 8, 3>}, {pipeline_mode = #tpu.pipeline_mode<synchronous>, transform_indices = @transform_1, window_bounds = array<i64: 3, 2048>}, {pipeline_mode = #tpu.pipeline_mode<synchronous>, transform_indices = @transform_2, window_bounds = array<i64: 1, 2048>}, {transform_indices = @transform_3, window_bounds = array<i64: 8, 2048>}]} {
    %c0 = arith.constant 0 : index
    %c0_0 = arith.constant 0 : index
    %0 = vector.load %arg1[%c0, %c0_0] : memref<8x3xf32, #tpu.memory_space<vmem>>, vector<8x3xf32>
    %1 = arith.truncf %0 : vector<8x3xf32> to vector<8x3xbf16>
    %c0_1 = arith.constant 0 : index
    %c0_2 = arith.constant 0 : index
    %2 = vector.load %arg2[%c0_1, %c0_2] : memref<3x2048xbf16, #tpu.memory_space<vmem>>, vector<3x2048xbf16>
    %cst = arith.constant dense<0.000000e+00> : vector<8x2048xf32>
    %3 = tpu.matmul %1, %2, %cst {dimension_numbers = #tpu.dot_dimension_numbers<[1], [0], [0], [1], [0, 0, 1, 1], [], []>} : vector<8x3xbf16>, vector<3x2048xbf16>, vector<8x2048xf32> -> vector<8x2048xf32>
    %c0_3 = arith.constant 0 : index
    %c0_4 = arith.constant 0 : index
    %4 = vector.load %arg3[%c0_3, %c0_4] : memref<1x2048xf32, #tpu.memory_space<vmem>>, vector<1x2048xf32>
    %5 = vector.broadcast %4 : vector<1x2048xf32> to vector<8x2048xf32>
    %6 = arith.addf %3, %5 : vector<8x2048xf32>
    %cst_5 = arith.constant 0.000000e+00 : f32
    %7 = vector.broadcast %cst_5 : f32 to vector<8x2048xf32>
    %8 = arith.maximumf %6, %7 : vector<8x2048xf32>
    %c0_6 = arith.constant 0 : index
    %c0_7 = arith.constant 0 : index
    %9 = vector.load %arg4[%c0_6, %c0_7] : memref<8x2048xf32, #tpu.memory_space<vmem>>, vector<8x2048xf32>
    tpu.vector_store %arg4[%c0_6, %c0_7], %8 {strides = array<i32>} : memref<8x2048xf32, #tpu.memory_space<vmem>>, vector<8x2048xf32>,
    return
  }
  func.func @transform_0(%arg0: i32) -> (i32, i32) {
    %c0_i32 = arith.constant 0 : i32
    %c0_i32_0 = arith.constant 0 : i32
    return %arg0, %c0_i32 : i32, i32
  }
  func.func @transform_1(%arg0: i32) -> (i32, i32) {
    %c0_i32 = arith.constant 0 : i32
    %c0_i32_0 = arith.constant 0 : i32
    %c0_i32_1 = arith.constant 0 : i32
    return %c0_i32, %c0_i32_0 : i32, i32
  }
  func.func @transform_2(%arg0: i32) -> (i32, i32) {
    %c0_i32 = arith.constant 0 : i32
    %c0_i32_0 = arith.constant 0 : i32
    %c0_i32_1 = arith.constant 0 : i32
    return %c0_i32, %c0_i32_0 : i32, i32
  }
  func.func @transform_3(%arg0: i32) -> (i32, i32) {
    %c0_i32 = arith.constant 0 : i32
    %c0_i32_0 = arith.constant 0 : i32
    return %arg0, %c0_i32 : i32, i32
  }
}

module attributes {stable_mosaic.version = 11 : i64} {
  func.func @_mm_bias_kernel(%arg0: i32, %arg1: memref<8x2048xf32, #tpu.memory_space<vmem>>, %arg2: memref<2048x128xbf16, #tpu.memory_space<vmem>>, %arg3: memref<1x128xf32, #tpu.memory_space<vmem>>, %arg4: memref<8x128xf32, #tpu.memory_space<vmem>>) attributes {dimension_semantics = [#tpu.dimension_semantics<parallel>], iteration_bounds = array<i64: 1>, scalar_prefetch = 0 : i64, scratch_operands = 0 : i64, tpu.core_type = #tpu.core_type<tc>, window_params = [{transform_indices = @transform_0, window_bounds = array<i64: 8, 2048>}, {pipeline_mode = #tpu.pipeline_mode<synchronous>, transform_indices = @transform_1, window_bounds = array<i64: 2048, 128>}, {pipeline_mode = #tpu.pipeline_mode<synchronous>, transform_indices = @transform_2, window_bounds = array<i64: 1, 128>}, {transform_indices = @transform_3, window_bounds = array<i64: 8, 128>}]} {
    %c0 = arith.constant 0 : index
    %c0_0 = arith.constant 0 : index
    %0 = vector.load %arg1[%c0, %c0_0] : memref<8x2048xf32, #tpu.memory_space<vmem>>, vector<8x2048xf32>
    %1 = arith.truncf %0 : vector<8x2048xf32> to vector<8x2048xbf16>
    %c0_1 = arith.constant 0 : index
    %c0_2 = arith.constant 0 : index
    %2 = vector.load %arg2[%c0_1, %c0_2] : memref<2048x128xbf16, #tpu.memory_space<vmem>>, vector<2048x128xbf16>
    %cst = arith.constant dense<0.000000e+00> : vector<8x128xf32>
    %3 = tpu.matmul %1, %2, %cst {dimension_numbers = #tpu.dot_dimension_numbers<[1], [0], [0], [1], [0, 0, 1, 1], [], []>} : vector<8x2048xbf16>, vector<2048x128xbf16>, vector<8x128xf32> -> vector<8x128xf32>
    %c0_3 = arith.constant 0 : index
    %c0_4 = arith.constant 0 : index
    %4 = vector.load %arg3[%c0_3, %c0_4] : memref<1x128xf32, #tpu.memory_space<vmem>>, vector<1x128xf32>
    %5 = vector.broadcast %4 : vector<1x128xf32> to vector<8x128xf32>
    %6 = arith.addf %3, %5 : vector<8x128xf32>
    %cst_5 = arith.constant 0.000000e+00 : f32
    %7 = vector.broadcast %cst_5 : f32 to vector<8x128xf32>
    %8 = arith.maximumf %6, %7 : vector<8x128xf32>
    %c0_6 = arith.constant 0 : index
    %c0_7 = arith.constant 0 : index
    %9 = vector.load %arg4[%c0_6, %c0_7] : memref<8x128xf32, #tpu.memory_space<vmem>>, vector<8x128xf32>
    tpu.vector_store %arg4[%c0_6, %c0_7], %8 {strides = array<i32>} : memref<8x128xf32, #tpu.memory_space<vmem>>, vector<8x128xf32>,
    return
  }
  func.func @transform_0(%arg0: i32) -> (i32, i32) {
    %c0_i32 = arith.constant 0 : i32
    %c0_i32_0 = arith.constant 0 : i32
    return %arg0, %c0_i32 : i32, i32
  }
  func.func @transform_1(%arg0: i32) -> (i32, i32) {
    %c0_i32 = arith.constant 0 : i32
    %c0_i32_0 = arith.constant 0 : i32
    %c0_i32_1 = arith.constant 0 : i32
    return %c0_i32, %c0_i32_0 : i32, i32
  }
  func.func @transform_2(%arg0: i32) -> (i32, i32) {
    %c0_i32 = arith.constant 0 : i32
    %c0_i32_0 = arith.constant 0 : i32
    %c0_i32_1 = arith.constant 0 : i32
    return %c0_i32, %c0_i32_0 : i32, i32
  }
  func.func @transform_3(%arg0: i32) -> (i32, i32) {
    %c0_i32 = arith.constant 0 : i32
    %c0_i32_0 = arith.constant 0 : i32
    return %arg0, %c0_i32 : i32, i32
  }
}

module attributes {stable_mosaic.version = 11 : i64} {
  func.func @_tail_kernel(%arg0: i32, %arg1: i32, %arg2: memref<1x2x2x128xf32, #tpu.memory_space<vmem>>, %arg3: memref<1x4x4x128xf32, #tpu.memory_space<vmem>>, %arg4: memref<1x8x8x128xf32, #tpu.memory_space<vmem>>, %arg5: memref<8x2xf32, #tpu.memory_space<vmem>>, %arg6: memref<8x2xf32, #tpu.memory_space<vmem>>, %arg7: memref<8x4xf32, #tpu.memory_space<vmem>>, %arg8: memref<8x4xf32, #tpu.memory_space<vmem>>, %arg9: memref<3x128xf32, #tpu.memory_space<vmem>>, %arg10: memref<1xf32, #tpu.memory_space<smem>>, %arg11: memref<1x8x8xf32, #tpu.memory_space<vmem>>, %arg12: memref<1x8x8x128xf32, #tpu.memory_space<vmem>>, %arg13: memref<1x8x8x128xf32, #tpu.memory_space<vmem>>) attributes {dimension_semantics = [#tpu.dimension_semantics<parallel>, #tpu.dimension_semantics<parallel>], iteration_bounds = array<i64: 2, 1>, scalar_prefetch = 0 : i64, scratch_operands = 0 : i64, tpu.core_type = #tpu.core_type<tc>, window_params = [{transform_indices = @transform_0, window_bounds = array<i64: 1, 2, 2, 128>}, {transform_indices = @transform_1, window_bounds = array<i64: 1, 4, 4, 128>}, {transform_indices = @transform_2, window_bounds = array<i64: 1, 8, 8, 128>}, {transform_indices = @transform_3, window_bounds = array<i64: 8, 2>}, {pipeline_mode = #tpu.pipeline_mode<synchronous>, transform_indices = @transform_4, window_bounds = array<i64: 8, 2>}, {transform_indices = @transform_5, window_bounds = array<i64: 8, 4>}, {pipeline_mode = #tpu.pipeline_mode<synchronous>, transform_indices = @transform_6, window_bounds = array<i64: 8, 4>}, {pipeline_mode = #tpu.pipeline_mode<synchronous>, transform_indices = @transform_7, window_bounds = array<i64: 3, 128>}, {transform_indices = @transform_8, window_bounds = array<i64: 1>}, {transform_indices = @transform_9, window_bounds = array<i64: 1, 8, 8>}, {transform_indices = @transform_10, window_bounds = array<i64: 1, 8, 8, 128>}, {transform_indices = @transform_11, window_bounds = array<i64: 1, 8, 8, 128>}]} {
    %c0 = arith.constant 0 : index
    %c0_0 = arith.constant 0 : index
    %0 = vector.load %arg5[%c0, %c0_0] : memref<8x2xf32, #tpu.memory_space<vmem>>, vector<8x2xf32>
    %c0_1 = arith.constant 0 : index
    %c0_2 = arith.constant 0 : index
    %c0_3 = arith.constant 0 : index
    %c0_4 = arith.constant 0 : index
    %1 = vector.load %arg2[%c0_1, %c0_2, %c0_3, %c0_4] : memref<1x2x2x128xf32, #tpu.memory_space<vmem>>, vector<1x2x2x128xf32>
    %2 = vector.shape_cast %1 : vector<1x2x2x128xf32> to vector<2x2x128xf32>
    %3 = vector.shape_cast %2 : vector<2x2x128xf32> to vector<2x256xf32>
    %cst = arith.constant dense<0.000000e+00> : vector<8x256xf32>
    %4 = tpu.matmul %0, %3, %cst {dimension_numbers = #tpu.dot_dimension_numbers<[1], [0], [0], [1], [0, 0, 1, 1], [], []>} : vector<8x2xf32>, vector<2x256xf32>, vector<8x256xf32> -> vector<8x256xf32>
    %5 = vector.shape_cast %4 : vector<8x256xf32> to vector<8x2x128xf32>
    %c0_5 = arith.constant 0 : index
    %c0_6 = arith.constant 0 : index
    %6 = vector.load %arg6[%c0_5, %c0_6] : memref<8x2xf32, #tpu.memory_space<vmem>>, vector<8x2xf32>
    %7 = vector.shape_cast %6 : vector<8x2xf32> to vector<1x8x2xf32>
    %8 = vector.shape_cast %7 : vector<1x8x2xf32> to vector<1x8x2xf32>
    %9 = vector.broadcast %8 : vector<1x8x2xf32> to vector<8x8x2xf32>
    "tpu.trace_start"() <{level = 10 : i32, message = "hWw,hwc->hWc"}> : () -> ()
    %cst_7 = arith.constant dense<0.000000e+00> : vector<8x8x128xf32>
    %10 = tpu.matmul %9, %5, %cst_7 {dimension_numbers = #tpu.dot_dimension_numbers<[2], [1], [1], [2], [0, 0, 0, 1, 1, 2], [0], [0]>} : vector<8x8x2xf32>, vector<8x2x128xf32>, vector<8x8x128xf32> -> vector<8x8x128xf32>
    "tpu.trace_stop"() : () -> ()
    %c0_8 = arith.constant 0 : index
    %c0_9 = arith.constant 0 : index
    %11 = vector.load %arg7[%c0_8, %c0_9] : memref<8x4xf32, #tpu.memory_space<vmem>>, vector<8x4xf32>
    %c0_10 = arith.constant 0 : index
    %c0_11 = arith.constant 0 : index
    %c0_12 = arith.constant 0 : index
    %c0_13 = arith.constant 0 : index
    %12 = vector.load %arg3[%c0_10, %c0_11, %c0_12, %c0_13] : memref<1x4x4x128xf32, #tpu.memory_space<vmem>>, vector<1x4x4x128xf32>
    %13 = vector.shape_cast %12 : vector<1x4x4x128xf32> to vector<4x4x128xf32>
    %14 = vector.shape_cast %13 : vector<4x4x128xf32> to vector<4x512xf32>
    %cst_14 = arith.constant dense<0.000000e+00> : vector<8x512xf32>
    %15 = tpu.matmul %11, %14, %cst_14 {dimension_numbers = #tpu.dot_dimension_numbers<[1], [0], [0], [1], [0, 0, 1, 1], [], []>} : vector<8x4xf32>, vector<4x512xf32>, vector<8x512xf32> -> vector<8x512xf32>
    %16 = vector.shape_cast %15 : vector<8x512xf32> to vector<8x4x128xf32>
    %c0_15 = arith.constant 0 : index
    %c0_16 = arith.constant 0 : index
    %17 = vector.load %arg8[%c0_15, %c0_16] : memref<8x4xf32, #tpu.memory_space<vmem>>, vector<8x4xf32>
    %18 = vector.shape_cast %17 : vector<8x4xf32> to vector<1x8x4xf32>
    %19 = vector.shape_cast %18 : vector<1x8x4xf32> to vector<1x8x4xf32>
    %20 = vector.broadcast %19 : vector<1x8x4xf32> to vector<8x8x4xf32>
    "tpu.trace_start"() <{level = 10 : i32, message = "hWw,hwc->hWc"}> : () -> ()
    %cst_17 = arith.constant dense<0.000000e+00> : vector<8x8x128xf32>
    %21 = tpu.matmul %20, %16, %cst_17 {dimension_numbers = #tpu.dot_dimension_numbers<[2], [1], [1], [2], [0, 0, 0, 1, 1, 2], [0], [0]>} : vector<8x8x4xf32>, vector<8x4x128xf32>, vector<8x8x128xf32> -> vector<8x8x128xf32>
    "tpu.trace_stop"() : () -> ()
    %c0_18 = arith.constant 0 : index
    %c0_19 = arith.constant 0 : index
    %c0_20 = arith.constant 0 : index
    %c0_21 = arith.constant 0 : index
    %22 = vector.load %arg4[%c0_18, %c0_19, %c0_20, %c0_21] : memref<1x8x8x128xf32, #tpu.memory_space<vmem>>, vector<1x8x8x128xf32>
    %23 = vector.shape_cast %22 : vector<1x8x8x128xf32> to vector<8x8x128xf32>
    %24 = arith.mulf %21, %10 : vector<8x8x128xf32>
    %25 = arith.mulf %23, %24 : vector<8x8x128xf32>
    %c0_22 = arith.constant 0 : index
    %c0_23 = arith.constant 0 : index
    %c0_24 = arith.constant 0 : index
    %c0_25 = arith.constant 0 : index
    %26 = vector.load %arg12[%c0_22, %c0_23, %c0_24, %c0_25] : memref<1x8x8x128xf32, #tpu.memory_space<vmem>>, vector<1x8x8x128xf32>
    %27 = vector.shape_cast %26 : vector<1x8x8x128xf32> to vector<8x8x128xf32>
    %28 = vector.shape_cast %10 : vector<8x8x128xf32> to vector<1x8x8x128xf32>
    tpu.vector_store %arg12[%c0_22, %c0_23, %c0_24, %c0_25], %28 {strides = array<i32>} : memref<1x8x8x128xf32, #tpu.memory_space<vmem>>, vector<1x8x8x128xf32>,
    %c0_26 = arith.constant 0 : index
    %c0_27 = arith.constant 0 : index
    %c0_28 = arith.constant 0 : index
    %c0_29 = arith.constant 0 : index
    %29 = vector.load %arg13[%c0_26, %c0_27, %c0_28, %c0_29] : memref<1x8x8x128xf32, #tpu.memory_space<vmem>>, vector<1x8x8x128xf32>
    %30 = vector.shape_cast %29 : vector<1x8x8x128xf32> to vector<8x8x128xf32>
    %31 = vector.shape_cast %21 : vector<8x8x128xf32> to vector<1x8x8x128xf32>
    tpu.vector_store %arg13[%c0_26, %c0_27, %c0_28, %c0_29], %31 {strides = array<i32>} : memref<1x8x8x128xf32, #tpu.memory_space<vmem>>, vector<1x8x8x128xf32>,
    %c0_30 = arith.constant 0 : index
    %c0_31 = arith.constant 0 : index
    %32 = vector.load %arg9[%c0_30, %c0_31] : memref<3x128xf32, #tpu.memory_space<vmem>>, vector<3x128xf32>
    %33 = vector.extract_strided_slice %32 {offsets = [0, 0], sizes = [1, 128], strides = [1, 1]} : vector<3x128xf32> to vector<1x128xf32>
    %34 = vector.shape_cast %33 : vector<1x128xf32> to vector<128xf32>
    %35 = vector.shape_cast %34 : vector<128xf32> to vector<1x1x128xf32>
    %36 = vector.broadcast %35 : vector<1x1x128xf32> to vector<8x8x128xf32>
    %37 = arith.mulf %10, %36 : vector<8x8x128xf32>
    %38 = vector.extract_strided_slice %32 {offsets = [1, 0], sizes = [1, 128], strides = [1, 1]} : vector<3x128xf32> to vector<1x128xf32>
    %39 = vector.shape_cast %38 : vector<1x128xf32> to vector<128xf32>
    %40 = vector.shape_cast %39 : vector<128xf32> to vector<1x1x128xf32>
    %41 = vector.broadcast %40 : vector<1x1x128xf32> to vector<8x8x128xf32>
    %42 = arith.mulf %24, %41 : vector<8x8x128xf32>
    %43 = arith.addf %37, %42 : vector<8x8x128xf32>
    %44 = vector.extract_strided_slice %32 {offsets = [2, 0], sizes = [1, 128], strides = [1, 1]} : vector<3x128xf32> to vector<1x128xf32>
    %45 = vector.shape_cast %44 : vector<1x128xf32> to vector<128xf32>
    %46 = vector.shape_cast %45 : vector<128xf32> to vector<1x1x128xf32>
    %47 = vector.broadcast %46 : vector<1x1x128xf32> to vector<8x8x128xf32>
    %48 = arith.mulf %25, %47 : vector<8x8x128xf32>
    %49 = arith.addf %43, %48 : vector<8x8x128xf32>
    %cst_32 = arith.constant dense<0.000000e+00> : vector<8x8xf32>
    %50 = vector.multi_reduction <add>, %49, %cst_32 [2] : vector<8x8x128xf32> to vector<8x8xf32>
    %c0_33 = arith.constant 0 : index
    %51 = memref.load %arg10[%c0_33] : memref<1xf32, #tpu.memory_space<smem>>
    %52 = vector.broadcast %51 : f32 to vector<8x8xf32>
    %53 = arith.addf %50, %52 : vector<8x8xf32>
    %c0_34 = arith.constant 0 : index
    %c0_35 = arith.constant 0 : index
    %c0_36 = arith.constant 0 : index
    %54 = vector.load %arg11[%c0_34, %c0_35, %c0_36] : memref<1x8x8xf32, #tpu.memory_space<vmem>>, vector<1x8x8xf32>
    %55 = vector.shape_cast %54 : vector<1x8x8xf32> to vector<8x8xf32>
    %56 = vector.shape_cast %53 : vector<8x8xf32> to vector<1x8x8xf32>
    tpu.vector_store %arg11[%c0_34, %c0_35, %c0_36], %56 {strides = array<i32>} : memref<1x8x8xf32, #tpu.memory_space<vmem>>, vector<1x8x8xf32>,
    return
  }
  func.func @transform_0(%arg0: i32, %arg1: i32) -> (i32, i32, i32, i32) {
    %c0_i32 = arith.constant 0 : i32
    %c0_i32_0 = arith.constant 0 : i32
    %c0_i32_1 = arith.constant 0 : i32
    %c0_i32_2 = arith.constant 0 : i32
    return %arg0, %c0_i32, %c0_i32_0, %c0_i32_1 : i32, i32, i32, i32
  }
  func.func @transform_1(%arg0: i32, %arg1: i32) -> (i32, i32, i32, i32) {
    %c0_i32 = arith.constant 0 : i32
    %c0_i32_0 = arith.constant 0 : i32
    %c0_i32_1 = arith.constant 0 : i32
    %c0_i32_2 = arith.constant 0 : i32
    return %arg0, %c0_i32, %c0_i32_0, %c0_i32_1 : i32, i32, i32, i32
  }
  func.func @transform_2(%arg0: i32, %arg1: i32) -> (i32, i32, i32, i32) {
    %c0_i32 = arith.constant 0 : i32
    %c0_i32_0 = arith.constant 0 : i32
    %c0_i32_1 = arith.constant 0 : i32
    return %arg0, %arg1, %c0_i32, %c0_i32_0 : i32, i32, i32, i32
  }
  func.func @transform_3(%arg0: i32, %arg1: i32) -> (i32, i32) {
    %c0_i32 = arith.constant 0 : i32
    %c0_i32_0 = arith.constant 0 : i32
    return %arg1, %c0_i32 : i32, i32
  }
  func.func @transform_4(%arg0: i32, %arg1: i32) -> (i32, i32) {
    %c0_i32 = arith.constant 0 : i32
    %c0_i32_0 = arith.constant 0 : i32
    %c0_i32_1 = arith.constant 0 : i32
    return %c0_i32, %c0_i32_0 : i32, i32
  }
  func.func @transform_5(%arg0: i32, %arg1: i32) -> (i32, i32) {
    %c0_i32 = arith.constant 0 : i32
    %c0_i32_0 = arith.constant 0 : i32
    return %arg1, %c0_i32 : i32, i32
  }
  func.func @transform_6(%arg0: i32, %arg1: i32) -> (i32, i32) {
    %c0_i32 = arith.constant 0 : i32
    %c0_i32_0 = arith.constant 0 : i32
    %c0_i32_1 = arith.constant 0 : i32
    return %c0_i32, %c0_i32_0 : i32, i32
  }
  func.func @transform_7(%arg0: i32, %arg1: i32) -> (i32, i32) {
    %c0_i32 = arith.constant 0 : i32
    %c0_i32_0 = arith.constant 0 : i32
    %c0_i32_1 = arith.constant 0 : i32
    return %c0_i32, %c0_i32_0 : i32, i32
  }
  func.func @transform_8(%arg0: i32, %arg1: i32) -> i32 {
    %c0_i32 = arith.constant 0 : i32
    %c0_i32_0 = arith.constant 0 : i32
    return %c0_i32 : i32
  }
  func.func @transform_9(%arg0: i32, %arg1: i32) -> (i32, i32, i32) {
    %c0_i32 = arith.constant 0 : i32
    %c0_i32_0 = arith.constant 0 : i32
    return %arg0, %arg1, %c0_i32 : i32, i32, i32
  }
  func.func @transform_10(%arg0: i32, %arg1: i32) -> (i32, i32, i32, i32) {
    %c0_i32 = arith.constant 0 : i32
    %c0_i32_0 = arith.constant 0 : i32
    %c0_i32_1 = arith.constant 0 : i32
    return %arg0, %arg1, %c0_i32, %c0_i32_0 : i32, i32, i32, i32
  }
  func.func @transform_11(%arg0: i32, %arg1: i32) -> (i32, i32, i32, i32) {
    %c0_i32 = arith.constant 0 : i32
    %c0_i32_0 = arith.constant 0 : i32
    %c0_i32_1 = arith.constant 0 : i32
    return %arg0, %arg1, %c0_i32, %c0_i32_0 : i32, i32, i32, i32
  }
}

</mosaic_0001>

<bundles_post_ra>
// kernel: sanet_forward.7
= control target key start
LH: loop header
LB: loop body
LE: loop exit
PB: predicated region body
PF: predicated region fallthrough
CT: control target
= control target key end

     0   :  { %s536_s12 = smov 0   ;;  %s663_s0 = inlined_call_operand.vmem [shape: f32[128,3], index: 0, kind: input, shape index: {}]   ;;  %s664_s1 = inlined_call_operand.vmem [shape: bf16[3,512], index: 1, kind: input, shape index: {}]   ;;  %s665_s2 = inlined_call_operand.vmem [shape: f32[1,512], index: 2, kind: input, shape index: {}]   ;;  %s666_s3 = inlined_call_operand.vmem [shape: f32[128,512], index: 3, kind: output, shape index: {}]  }
   0x1 LB: > { %s469_s13 = sadd.s32 4294967295, %s513_s12   ;;  %p473_p0 = scmp.ge.s32.totalorder %s513_s12, 1  ;;  %s513_s12 = sphi %s536_s12, %s13_s12  }
   0x2   : > { %p138_p1 = scmp.lt.s32.totalorder %s513_s12, 3 }
   0x4   : > { %p139_p2 = pnand %p473_p0, %p138_p1 }
   0x5   : > { %s474_s16 = sshll.u32 (!%p139_p2), %s469_s13, 3 }
   0x6   : > { %142 = sbr.rel (%p139_p2) target bundleno = 220 (0xdc), region = 32  ;;  %p164_p3 = scmp.lt.s32.totalorder (!%p139_p2), %s474_s16, 15 }
   0xb   : > { %v189_v0 = vld [vmem:[%s664_s1] sm:$0xff]  ;;  %vm219_vm0 = vcmask 1040384   ;;  %vm220_vm1 = vcmask 1041408   ;;  %v515_v1 = vmov 65535   ;;  %s668_s16 = smov (!%p164_p3, %s474_s16), 15  ;;  %vm206_vm2 = vcmask 23552  }
   0xc   : > { %201 = vst [vmem:[#allocation1] ss:$4 sm:$0xff] %v189_v0  ;;  %v221_v2 = vsel %vm219_vm0, 4294967295, %v515_v1  ;;  %s475_s17 = sshll.u32 %s668_s16, 3  ;;  %v190_v24 = vld [vmem:[%s665_s2] sm:$0xf] }
   0xd   : > { %v222_v3 = vsel %vm220_vm1, %v221_v2, 0  ;;  %s553_s20 = scalar_lea.vmem %s663_s0, %s475_s17  ;;  %v582_v25 = vperm.slane %v190_v24, 0  ;;  %v584_v26 = vperm.slane %v190_v24, 1  ;;  %s497_s23 = sshll.u32 %s668_s16, 5  ;;  %v594_v33 = vperm.slane %v190_v24, 2 }
   0xe   : > { %v177_v4 = vld [vmem:[%s553_s20] sm:$0xff]  ;;  %v178_v5 = vld [vmem:[%s553_s20 + $0x8] sm:$0xff]  ;;  %v179_v15 = vld [vmem:[%s553_s20 + $0x10] sm:$0xff]  ;;  %s592_s26 = scalar_lea.vmem %s666_s3, %s497_s23  ;;  %v596_v34 = vperm.slane %v190_v24, 3 }
   0xf   : > { %v185_v14 = vpack.c.bf16 %v178_v5, %v177_v4  ;;  %v180_v16 = vld [vmem:[%s553_s20 + $0x18] sm:$0xff]  ;;  %v181_v18 = vld [vmem:[%s553_s20 + $0x20] sm:$0xff]  ;;  %v182_v19 = vld [vmem:[%s553_s20 + $0x28] sm:$0xff] }
  0x10   : > { %v186_v17 = vpack.c.bf16 %v180_v16, %v179_v15  ;;  %v187_v20 = vpack.c.bf16 %v182_v19, %v181_v18  ;;  %v183_v21 = vld [vmem:[%s553_s20 + $0x30] sm:$0xff]  ;;  %v184_v22 = vld [vmem:[%s553_s20 + $0x38] sm:$0xff] }
  0x11   : > { %v188_v23 = vpack.c.bf16 %v184_v22, %v183_v21 }
  0x13   : > { %v202_v6 = vld.sshfl [vmem:[#allocation1] sm:$0xff pattern:$0x73625140]  ;;  %v203_v7 = vld.sshfl [vmem:[#allocation1 + $0x8] sm:$0xff pattern:$0x73625140] }
  0x14   : > { %v223_v8 = vand.u32 %v222_v3, %v202_v6  ;;  %v225_v9 = vand.u32 %v222_v3, %v203_v7  ;;  %v204_v10 = vld.sshfl [vmem:[#allocation1 + $0x10] sm:$0xff pattern:$0x73625140]  ;;  %v205_v11 = vld.sshfl [vmem:[#allocation1 + $0x18] sm:$0xff pattern:$0x73625140] }
  0x15   : > { %v227_v12 = vand.u32 %v222_v3, %v204_v10  ;;  %v229_v13 = vand.u32 %v222_v3, %v205_v11 }
  0x16   : > { %238 = vmatpush.bf16.msra.mxu0 %v223_v8  ;;  %267 = vmatpush.bf16.msra.mxu1 %v225_v9 }
  0x17   : > { %296 = vmatpush.bf16.msra.mxu2 %v227_v12  ;;  %325 = vmatpush.bf16.msra.mxu3 %v229_v13 }
  0x19   : > { %479 = vmatmul.msk.bf16.vlgmr.msra.gmra.mxu0 %vm206_vm2, %v185_v14  ;;  %483 = vmatmul.msk.bf16.vlgmr.msra.gmra.mxu1 %vm206_vm2, %v185_v14 }
  0x1a   : > { %487 = vmatmul.msk.bf16.vlgmr.msra.gmra.mxu2 %vm206_vm2, %v185_v14  ;;  %491 = vmatmul.msk.bf16.vlgmr.msra.gmra.mxu3 %vm206_vm2, %v185_v14 }
  0x29   : > { %480 = vmatmul.msk.bf16.gmra.mxu0 %vm206_vm2, %v186_v17  ;;  %484 = vmatmul.msk.bf16.gmra.mxu1 %vm206_vm2, %v186_v17 }
  0x2a   : > { %488 = vmatmul.msk.bf16.gmra.mxu2 %vm206_vm2, %v186_v17  ;;  %492 = vmatmul.msk.bf16.gmra.mxu3 %vm206_vm2, %v186_v17 }
  0x39   : > { %481 = vmatmul.msk.bf16.gmra.mxu0 %vm206_vm2, %v187_v20  ;;  %485 = vmatmul.msk.bf16.gmra.mxu1 %vm206_vm2, %v187_v20 }
  0x3a   : > { %489 = vmatmul.msk.bf16.gmra.mxu2 %vm206_vm2, %v187_v20  ;;  %493 = vmatmul.msk.bf16.gmra.mxu3 %vm206_vm2, %v187_v20 }
  0x49   : > { %482 = vmatmul.msk.bf16.gmra.mxu0 %vm206_vm2, %v188_v23  ;;  %486 = vmatmul.msk.bf16.gmra.mxu1 %vm206_vm2, %v188_v23 }
  0x4a   : > { %490 = vmatmul.msk.bf16.gmra.mxu2 %vm206_vm2, %v188_v23  ;;  %494 = vmatmul.msk.bf16.gmra.mxu3 %vm206_vm2, %v188_v23 }
  0x96   : > { %v240_v27 = vpop.f32.mrf.mxu0  ;;  %v269_v28 = vpop.f32.mrf.mxu1 }
  0x97   : > { %v241_v29 = vadd.f32 %v240_v27, %v582_v25  ;;  %v270_v30 = vadd.f32 %v269_v28, %v584_v26 }
  0x99   : > { %v347_v31 = vmax.f32 %v241_v29, 0.0  ;;  %v348_v32 = vmax.f32 %v270_v30, 0.0 }
  0x9b   : > { %379 = vst [vmem:[%s592_s26] sm:$0xff] %v347_v31 }
  0x9c   : > { %380 = vst [vmem:[%s592_s26 + $0x8] sm:$0xff] %v348_v32 }
  0x9d   : > { %v298_v35 = vpop.f32.mrf.mxu2  ;;  %v327_v36 = vpop.f32.mrf.mxu3 }
  0x9e   : > { %v299_v37 = vadd.f32 %v298_v35, %v594_v33  ;;  %v328_v38 = vadd.f32 %v327_v36, %v596_v34  ;;  %v242_v39 = vpop.f32.mrf.mxu0  ;;  %v271_v40 = vpop.f32.mrf.mxu1 }
  0x9f   : > { %v243_v41 = vadd.f32 %v242_v39, %v582_v25  ;;  %v272_v42 = vadd.f32 %v271_v40, %v584_v26 }
  0xa0   : > { %v349_v43 = vmax.f32 %v299_v37, 0.0  ;;  %v350_v44 = vmax.f32 %v328_v38, 0.0 }
  0xa1   : > { %v351_v45 = vmax.f32 %v243_v41, 0.0  ;;  %v352_v46 = vmax.f32 %v272_v42, 0.0 }
  0xa2   : > { %381 = vst [vmem:[%s592_s26 + $0x10] sm:$0xff] %v349_v43 }
  0xa3   : > { %382 = vst [vmem:[%s592_s26 + $0x18] sm:$0xff] %v350_v44 }
  0xa4   : > { %383 = vst [vmem:[%s592_s26 + $0x20] sm:$0xff] %v351_v45 }
  0xa5   : > { %384 = vst [vmem:[%s592_s26 + $0x28] sm:$0xff] %v352_v46  ;;  %v300_v47 = vpop.f32.mrf.mxu2  ;;  %v329_v48 = vpop.f32.mrf.mxu3 }
  0xa6   : > { %v301_v49 = vadd.f32 %v300_v47, %v594_v33  ;;  %v330_v50 = vadd.f32 %v329_v48, %v596_v34  ;;  %v245_v51 = vpop.f32.mrf.mxu0  ;;  %v274_v52 = vpop.f32.mrf.mxu1 }
  0xa7   : > { %v246_v53 = vadd.f32 %v245_v51, %v582_v25  ;;  %v275_v54 = vadd.f32 %v274_v52, %v584_v26 }
  0xa8   : > { %v353_v55 = vmax.f32 %v301_v49, 0.0  ;;  %v354_v56 = vmax.f32 %v330_v50, 0.0 }
  0xa9   : > { %v355_v57 = vmax.f32 %v246_v53, 0.0  ;;  %v356_v58 = vmax.f32 %v275_v54, 0.0 }
  0xaa   : > { %385 = vst [vmem:[%s592_s26 + $0x30] sm:$0xff] %v353_v55 }
  0xab   : > { %386 = vst [vmem:[%s592_s26 + $0x38] sm:$0xff] %v354_v56 }
  0xac   : > { %387 = vst [vmem:[%s592_s26 + $0x40] sm:$0xff] %v355_v57 }
  0xad   : > { %388 = vst [vmem:[%s592_s26 + $0x48] sm:$0xff] %v356_v58  ;;  %v303_v59 = vpop.f32.mrf.mxu2  ;;  %v332_v60 = vpop.f32.mrf.mxu3 }
  0xae   : > { %v304_v61 = vadd.f32 %v303_v59, %v594_v33  ;;  %v333_v62 = vadd.f32 %v332_v60, %v596_v34  ;;  %v247_v63 = vpop.f32.mrf.mxu0  ;;  %v276_v0 = vpop.f32.mrf.mxu1 }
  0xaf   : > { %v248_v1 = vadd.f32 %v247_v63, %v582_v25  ;;  %v277_v2 = vadd.f32 %v276_v0, %v584_v26 }
  0xb0   : > { %v357_v3 = vmax.f32 %v304_v61, 0.0  ;;  %v358_v4 = vmax.f32 %v333_v62, 0.0 }
  0xb1   : > { %v359_v5 = vmax.f32 %v248_v1, 0.0  ;;  %v360_v6 = vmax.f32 %v277_v2, 0.0 }
  0xb2   : > { %389 = vst [vmem:[%s592_s26 + $0x50] sm:$0xff] %v357_v3 }
  0xb3   : > { %390 = vst [vmem:[%s592_s26 + $0x58] sm:$0xff] %v358_v4 }
  0xb4   : > { %391 = vst [vmem:[%s592_s26 + $0x60] sm:$0xff] %v359_v5 }
  0xb5   : > { %392 = vst [vmem:[%s592_s26 + $0x68] sm:$0xff] %v360_v6  ;;  %v305_v7 = vpop.f32.mrf.mxu2  ;;  %v334_v8 = vpop.f32.mrf.mxu3 }
  0xb6   : > { %v306_v9 = vadd.f32 %v305_v7, %v594_v33  ;;  %v335_v10 = vadd.f32 %v334_v8, %v596_v34  ;;  %v250_v11 = vpop.f32.mrf.mxu0  ;;  %v279_v12 = vpop.f32.mrf.mxu1 }
  0xb7   : > { %v251_v13 = vadd.f32 %v250_v11, %v582_v25  ;;  %v280_v14 = vadd.f32 %v279_v12, %v584_v26 }
  0xb8   : > { %v361_v15 = vmax.f32 %v306_v9, 0.0  ;;  %v362_v16 = vmax.f32 %v335_v10, 0.0 }
  0xb9   : > { %v363_v17 = vmax.f32 %v251_v13, 0.0  ;;  %v364_v18 = vmax.f32 %v280_v14, 0.0 }
  0xba   : > { %393 = vst [vmem:[%s592_s26 + $0x70] sm:$0xff] %v361_v15 }
  0xbb   : > { %394 = vst [vmem:[%s592_s26 + $0x78] sm:$0xff] %v362_v16 }
  0xbc   : > { %395 = vst [vmem:[%s592_s26 + $0x80] sm:$0xff] %v363_v17 }
  0xbd   : > { %396 = vst [vmem:[%s592_s26 + $0x88] sm:$0xff] %v364_v18  ;;  %v308_v19 = vpop.f32.mrf.mxu2  ;;  %v337_v20 = vpop.f32.mrf.mxu3 }
  0xbe   : > { %v309_v21 = vadd.f32 %v308_v19, %v594_v33  ;;  %v338_v22 = vadd.f32 %v337_v20, %v596_v34  ;;  %v252_v23 = vpop.f32.mrf.mxu0  ;;  %v281_v24 = vpop.f32.mrf.mxu1 }
  0xbf   : > { %v253_v27 = vadd.f32 %v252_v23, %v582_v25  ;;  %v282_v28 = vadd.f32 %v281_v24, %v584_v26 }
  0xc0   : > { %v365_v29 = vmax.f32 %v309_v21, 0.0  ;;  %v366_v30 = vmax.f32 %v338_v22, 0.0 }
  0xc1   : > { %v367_v31 = vmax.f32 %v253_v27, 0.0  ;;  %v368_v32 = vmax.f32 %v282_v28, 0.0 }
  0xc2   : > { %397 = vst [vmem:[%s592_s26 + $0x90] sm:$0xff] %v365_v29 }
  0xc3   : > { %398 = vst [vmem:[%s592_s26 + $0x98] sm:$0xff] %v366_v30 }
  0xc4   : > { %399 = vst [vmem:[%s592_s26 + $0xa0] sm:$0xff] %v367_v31 }
  0xc5   : > { %400 = vst [vmem:[%s592_s26 + $0xa8] sm:$0xff] %v368_v32  ;;  %v310_v35 = vpop.f32.mrf.mxu2  ;;  %v339_v36 = vpop.f32.mrf.mxu3 }
  0xc6   : > { %v311_v37 = vadd.f32 %v310_v35, %v594_v33  ;;  %v340_v38 = vadd.f32 %v339_v36, %v596_v34  ;;  %v255_v39 = vpop.f32.mrf.mxu0  ;;  %v284_v40 = vpop.f32.mrf.mxu1 }
  0xc7   : > { %v256_v41 = vadd.f32 %v255_v39, %v582_v25  ;;  %v285_v42 = vadd.f32 %v284_v40, %v584_v26 }
  0xc8   : > { %v369_v43 = vmax.f32 %v311_v37, 0.0  ;;  %v370_v44 = vmax.f32 %v340_v38, 0.0 }
  0xc9   : > { %v371_v45 = vmax.f32 %v256_v41, 0.0  ;;  %v372_v46 = vmax.f32 %v285_v42, 0.0 }
  0xca   : > { %401 = vst [vmem:[%s592_s26 + $0xb0] sm:$0xff] %v369_v43 }
  0xcb   : > { %402 = vst [vmem:[%s592_s26 + $0xb8] sm:$0xff] %v370_v44 }
  0xcc   : > { %403 = vst [vmem:[%s592_s26 + $0xc0] sm:$0xff] %v371_v45 }
  0xcd   : > { %404 = vst [vmem:[%s592_s26 + $0xc8] sm:$0xff] %v372_v46  ;;  %v313_v47 = vpop.f32.mrf.mxu2  ;;  %v342_v48 = vpop.f32.mrf.mxu3 }
  0xce   : > { %v314_v49 = vadd.f32 %v313_v47, %v594_v33  ;;  %v343_v50 = vadd.f32 %v342_v48, %v596_v34  ;;  %v257_v51 = vpop.f32.mrf.mxu0  ;;  %v286_v52 = vpop.f32.mrf.mxu1 }
  0xcf   : > { %v258_v53 = vadd.f32 %v257_v51, %v582_v25  ;;  %v287_v54 = vadd.f32 %v286_v52, %v584_v26 }
  0xd0   : > { %v373_v55 = vmax.f32 %v314_v49, 0.0  ;;  %v374_v56 = vmax.f32 %v343_v50, 0.0 }
  0xd1   : > { %v375_v57 = vmax.f32 %v258_v53, 0.0  ;;  %v376_v58 = vmax.f32 %v287_v54, 0.0 }
  0xd2   : > { %405 = vst [vmem:[%s592_s26 + $0xd0] sm:$0xff] %v373_v55 }
  0xd3   : > { %406 = vst [vmem:[%s592_s26 + $0xd8] sm:$0xff] %v374_v56 }
  0xd4   : > { %407 = vst [vmem:[%s592_s26 + $0xe0] sm:$0xff] %v375_v57 }
  0xd5   : > { %408 = vst [vmem:[%s592_s26 + $0xe8] sm:$0xff] %v376_v58  ;;  %v315_v59 = vpop.f32.mrf.mxu2  ;;  %v344_v60 = vpop.f32.mrf.mxu3 }
  0xd6   : > { %v316_v61 = vadd.f32 %v315_v59, %v594_v33  ;;  %v345_v62 = vadd.f32 %v344_v60, %v596_v34 }
  0xd8   : > { %v377_v63 = vmax.f32 %v316_v61, 0.0  ;;  %v378_v25 = vmax.f32 %v345_v62, 0.0 }
  0xda   : > { %409 = vst [vmem:[%s592_s26 + $0xf0] sm:$0xff] %v377_v63 }
  0xdb   : > { %410 = vst [vmem:[%s592_s26 + $0xf8] sm:$0xff] %v378_v25 }
  0xdc PF: > { %s13_s12 = sadd.s32 1, %s513_s12  }
  0xdd   : > { %p10_p4 = scmp.ge.s32.totalorder %s13_s12, 4  }
  0xdf   :  { %12 = sbr.rel (!%p10_p4) target bundleno = 1 (0x1), region = 62 }

// kernel: sanet_forward.12
= control target key start
LH: loop header
LB: loop body
LE: loop exit
PB: predicated region body
PF: predicated region fallthrough
CT: control target
= control target key end

     0   :  { %s883_s12 = smov 0   ;;  %s1057_s0 = inlined_call_operand.vmem [shape: f32[128,512], index: 0, kind: input, shape index: {}]   ;;  %s1058_s1 = inlined_call_operand.vmem [shape: bf16[512,128], index: 1, kind: input, shape index: {}]   ;;  %s1059_s2 = inlined_call_operand.vmem [shape: f32[1,128], index: 2, kind: input, shape index: {}]   ;;  %s1060_s3 = inlined_call_operand.vmem [shape: f32[128,128], index: 3, kind: output, shape index: {}]  }
   0x1 LB: > { %s673_s13 = sadd.s32 4294967295, %s861_s12   ;;  %p677_p0 = scmp.ge.s32.totalorder %s861_s12, 1  ;;  %s861_s12 = sphi %s883_s12, %s13_s12  }
   0x2   : > { %p139_p1 = scmp.lt.s32.totalorder %s861_s12, 3 }
   0x4   : > { %p140_p2 = pnand %p677_p0, %p139_p1 }
   0x5   : > { %s678_s11 = sshll.u32 (!%p140_p2), %s673_s13, 3 }
   0x6   : > { %143 = sbr.rel (%p140_p2) target bundleno = 240 (0xf0), region = 32  ;;  %p165_p3 = scmp.lt.s32.totalorder (!%p140_p2), %s678_s11, 15 }
   0xb   : > { %v821_v0 = vld [vmem:[%s1058_s1 + $0x38] sm:$0xff]  ;;  %v820_v4 = vld [vmem:[%s1058_s1 + $0x30] sm:$0xff]  ;;  %v819_v8 = vld [vmem:[%s1058_s1 + $0x28] sm:$0xff]  ;;  %s1062_s11 = smov (!%p165_p3, %s678_s11), 15 }
   0xc   : > { %v829_v1 = vld [vmem:[%s1058_s1 + $0x78] sm:$0xff]  ;;  %485 = vmatpush.bf16.msra.mxu0 %v821_v0  ;;  %v828_v5 = vld [vmem:[%s1058_s1 + $0x70] sm:$0xff]  ;;  %v827_v9 = vld [vmem:[%s1058_s1 + $0x68] sm:$0xff]  ;;  %s813_s10 = sshll.u32 %s1062_s11, 5  ;;  %s682_s7 = sshll.u32 %s1062_s11, 3 }
   0xd   : > { %v837_v2 = vld [vmem:[%s1058_s1 + $0xb8] sm:$0xff]  ;;  %514 = vmatpush.bf16.msra.mxu1 %v829_v1  ;;  %v836_v6 = vld [vmem:[%s1058_s1 + $0xb0] sm:$0xff]  ;;  %v835_v10 = vld [vmem:[%s1058_s1 + $0xa8] sm:$0xff]  ;;  %s975_s20 = scalar_lea.vmem %s1057_s0, %s813_s10  ;;  %s1038_s10 = scalar_lea.vmem %s1060_s3, %s682_s7 }
   0xe   : > { %v845_v3 = vld [vmem:[%s1058_s1 + $0xf8] sm:$0xff]  ;;  %543 = vmatpush.bf16.msra.mxu2 %v837_v2  ;;  %v844_v7 = vld [vmem:[%s1058_s1 + $0xf0] sm:$0xff]  ;;  %v843_v11 = vld [vmem:[%s1058_s1 + $0xe8] sm:$0xff] }
   0xf   : > { %572 = vmatpush.bf16.msra.mxu3 %v845_v3  ;;  %v818_v12 = vld [vmem:[%s1058_s1 + $0x20] sm:$0xff]  ;;  %v817_v16 = vld [vmem:[%s1058_s1 + $0x18] sm:$0xff]  ;;  %v816_v20 = vld [vmem:[%s1058_s1 + $0x10] sm:$0xff] }
  0x10   : > { %486 = vmatpush.bf16.msra.mxu0 %v820_v4  ;;  %v826_v13 = vld [vmem:[%s1058_s1 + $0x60] sm:$0xff]  ;;  %v825_v17 = vld [vmem:[%s1058_s1 + $0x58] sm:$0xff]  ;;  %v824_v21 = vld [vmem:[%s1058_s1 + $0x50] sm:$0xff] }
  0x11   : > { %515 = vmatpush.bf16.msra.mxu1 %v828_v5  ;;  %v834_v14 = vld [vmem:[%s1058_s1 + $0xa0] sm:$0xff]  ;;  %v833_v18 = vld [vmem:[%s1058_s1 + $0x98] sm:$0xff]  ;;  %v832_v22 = vld [vmem:[%s1058_s1 + $0x90] sm:$0xff] }
  0x12   : > { %544 = vmatpush.bf16.msra.mxu2 %v836_v6  ;;  %v842_v15 = vld [vmem:[%s1058_s1 + $0xe0] sm:$0xff]  ;;  %v841_v19 = vld [vmem:[%s1058_s1 + $0xd8] sm:$0xff]  ;;  %v840_v23 = vld [vmem:[%s1058_s1 + $0xd0] sm:$0xff] }
  0x13   : > { %573 = vmatpush.bf16.msra.mxu3 %v844_v7  ;;  %v815_v24 = vld [vmem:[%s1058_s1 + $0x8] sm:$0xff]  ;;  %v814_v28 = vld [vmem:[%s1058_s1] sm:$0xff]  ;;  %v179_v36 = vld [vmem:[%s975_s20 + $0x10] sm:$0xff] }
  0x14   : > { %487 = vmatpush.bf16.msra.mxu0 %v819_v8  ;;  %v823_v25 = vld [vmem:[%s1058_s1 + $0x48] sm:$0xff]  ;;  %v822_v29 = vld [vmem:[%s1058_s1 + $0x40] sm:$0xff]  ;;  %v183_v37 = vld [vmem:[%s975_s20 + $0x30] sm:$0xff] }
  0x15   : > { %516 = vmatpush.bf16.msra.mxu1 %v827_v9  ;;  %v831_v26 = vld [vmem:[%s1058_s1 + $0x88] sm:$0xff]  ;;  %v830_v30 = vld [vmem:[%s1058_s1 + $0x80] sm:$0xff]  ;;  %v180_v38 = vld [vmem:[%s975_s20 + $0x18] sm:$0xff]  ;;  %v211_v42 = vpack.c.bf16 %v183_v37, %v179_v36 }
  0x16   : > { %545 = vmatpush.bf16.msra.mxu2 %v835_v10  ;;  %v839_v27 = vld [vmem:[%s1058_s1 + $0xc8] sm:$0xff]  ;;  %v838_v31 = vld [vmem:[%s1058_s1 + $0xc0] sm:$0xff]  ;;  %v184_v39 = vld [vmem:[%s975_s20 + $0x38] sm:$0xff] }
  0x17   : > { %574 = vmatpush.bf16.msra.mxu3 %v843_v11  ;;  %v177_v32 = vld [vmem:[%s975_s20] sm:$0xff]  ;;  %v178_v34 = vld [vmem:[%s975_s20 + $0x8] sm:$0xff]  ;;  %v212_v43 = vpack.c.bf16 %v184_v39, %v180_v38  ;;  %v187_v48 = vld [vmem:[%s975_s20 + $0x50] sm:$0xff] }
  0x18   : > { %488 = vmatpush.bf16.msra.mxu0 %v818_v12  ;;  %v181_v33 = vld [vmem:[%s975_s20 + $0x20] sm:$0xff]  ;;  %v182_v35 = vld [vmem:[%s975_s20 + $0x28] sm:$0xff]  ;;  %v191_v49 = vld [vmem:[%s975_s20 + $0x70] sm:$0xff] }
  0x19   : > { %517 = vmatpush.bf16.msra.mxu1 %v826_v13  ;;  %v209_v40 = vpack.c.bf16 %v181_v33, %v177_v32  ;;  %v210_v41 = vpack.c.bf16 %v182_v35, %v178_v34  ;;  %v185_v44 = vld [vmem:[%s975_s20 + $0x40] sm:$0xff]  ;;  %v186_v46 = vld [vmem:[%s975_s20 + $0x48] sm:$0xff]  ;;  %v188_v50 = vld [vmem:[%s975_s20 + $0x58] sm:$0xff]  ;;  %v215_v54 = vpack.c.bf16 %v191_v49, %v187_v48 }
  0x1a   : > { %546 = vmatpush.bf16.msra.mxu2 %v834_v14  ;;  %v189_v45 = vld [vmem:[%s975_s20 + $0x60] sm:$0xff]  ;;  %v190_v47 = vld [vmem:[%s975_s20 + $0x68] sm:$0xff]  ;;  %v192_v51 = vld [vmem:[%s975_s20 + $0x78] sm:$0xff] }
  0x1b   : > { %575 = vmatpush.bf16.msra.mxu3 %v842_v15  ;;  %v213_v52 = vpack.c.bf16 %v189_v45, %v185_v44  ;;  %v214_v53 = vpack.c.bf16 %v190_v47, %v186_v46  ;;  %v216_v55 = vpack.c.bf16 %v192_v51, %v188_v50  ;;  %v193_v56 = vld [vmem:[%s975_s20 + $0x80] sm:$0xff]  ;;  %v194_v58 = vld [vmem:[%s975_s20 + $0x88] sm:$0xff]  ;;  %v195_v60 = vld [vmem:[%s975_s20 + $0x90] sm:$0xff] }
  0x1c   : > { %489 = vmatpush.bf16.msra.mxu0 %v817_v16  ;;  %v197_v57 = vld [vmem:[%s975_s20 + $0xa0] sm:$0xff]  ;;  %v198_v59 = vld [vmem:[%s975_s20 + $0xa8] sm:$0xff]  ;;  %v199_v61 = vld [vmem:[%s975_s20 + $0xb0] sm:$0xff] }
  0x1d   : > { %518 = vmatpush.bf16.msra.mxu1 %v825_v17  ;;  %v196_v62 = vld [vmem:[%s975_s20 + $0x98] sm:$0xff]  ;;  %v217_v0 = vpack.c.bf16 %v197_v57, %v193_v56  ;;  %v218_v1 = vpack.c.bf16 %v198_v59, %v194_v58  ;;  %v219_v2 = vpack.c.bf16 %v199_v61, %v195_v60  ;;  %v201_v4 = vld [vmem:[%s975_s20 + $0xc0] sm:$0xff]  ;;  %v202_v6 = vld [vmem:[%s975_s20 + $0xc8] sm:$0xff] }
  0x1e   : > { %547 = vmatpush.bf16.msra.mxu2 %v833_v18  ;;  %v200_v63 = vld [vmem:[%s975_s20 + $0xb8] sm:$0xff]  ;;  %v205_v5 = vld [vmem:[%s975_s20 + $0xe0] sm:$0xff]  ;;  %v206_v7 = vld [vmem:[%s975_s20 + $0xe8] sm:$0xff] }
  0x1f   : > { %576 = vmatpush.bf16.msra.mxu3 %v841_v19  ;;  %v220_v3 = vpack.c.bf16 %v200_v63, %v196_v62  ;;  %v203_v8 = vld [vmem:[%s975_s20 + $0xd0] sm:$0xff]  ;;  %v204_v10 = vld [vmem:[%s975_s20 + $0xd8] sm:$0xff]  ;;  %v221_v12 = vpack.c.bf16 %v205_v5, %v201_v4  ;;  %v222_v13 = vpack.c.bf16 %v206_v7, %v202_v6  ;;  %v1030_v16 = vld [vmem:[%s1059_s2] ss:$0 sm:$0xff] }
  0x20   : > { %490 = vmatpush.bf16.msra.mxu0 %v816_v20  ;;  %v207_v9 = vld [vmem:[%s975_s20 + $0xf0] sm:$0xff]  ;;  %v208_v11 = vld [vmem:[%s975_s20 + $0xf8] sm:$0xff] }
  0x21   : > { %519 = vmatpush.bf16.msra.mxu1 %v824_v21  ;;  %v223_v14 = vpack.c.bf16 %v207_v9, %v203_v8  ;;  %v224_v15 = vpack.c.bf16 %v208_v11, %v204_v10 }
  0x22   : > { %548 = vmatpush.bf16.msra.mxu2 %v832_v22 }
  0x23   : > { %577 = vmatpush.bf16.msra.mxu3 %v840_v23 }
  0x24   : > { %491 = vmatpush.bf16.msra.mxu0 %v815_v24 }
  0x25   : > { %520 = vmatpush.bf16.msra.mxu1 %v823_v25 }
  0x26   : > { %549 = vmatpush.bf16.msra.mxu2 %v831_v26 }
  0x27   : > { %578 = vmatpush.bf16.msra.mxu3 %v839_v27 }
  0x28   : > { %492 = vmatpush.bf16.msra.mxu0 %v814_v28 }
  0x29   : > { %521 = vmatpush.bf16.msra.mxu1 %v822_v29 }
  0x2a   : > { %550 = vmatpush.bf16.msra.mxu2 %v830_v30 }
  0x2b   : > { %579 = vmatpush.bf16.msra.mxu3 %v838_v31  ;;  %493 = vmatmul.bf16.vlgmr.msra.gmra.mxu0 %v209_v40 }
  0x2c   : > { %522 = vmatmul.bf16.vlgmr.msra.gmra.mxu1 %v210_v41 }
  0x2d   : > { %551 = vmatmul.bf16.vlgmr.msra.gmra.mxu2 %v211_v42 }
  0x2e   : > { %580 = vmatmul.bf16.vlgmr.msra.gmra.mxu3 %v212_v43 }
  0x3b   : > { %498 = vmatmul.bf16.gmra.mxu0 %v213_v52 }
  0x3c   : > { %527 = vmatmul.bf16.gmra.mxu1 %v214_v53 }
  0x3d   : > { %556 = vmatmul.bf16.gmra.mxu2 %v215_v54 }
  0x3e   : > { %585 = vmatmul.bf16.gmra.mxu3 %v216_v55 }
  0x4b   : > { %503 = vmatmul.bf16.gmra.mxu0 %v217_v0 }
  0x4c   : > { %532 = vmatmul.bf16.gmra.mxu1 %v218_v1 }
  0x4d   : > { %561 = vmatmul.bf16.gmra.mxu2 %v219_v2 }
  0x4e   : > { %590 = vmatmul.bf16.gmra.mxu3 %v220_v3 }
  0x5b   : > { %508 = vmatmul.bf16.gmra.mxu0 %v221_v12 }
  0x5c   : > { %537 = vmatmul.bf16.gmra.mxu1 %v222_v13 }
  0x5d   : > { %566 = vmatmul.bf16.gmra.mxu2 %v223_v14 }
  0x5e   : > { %595 = vmatmul.bf16.gmra.mxu3 %v224_v15 }
  0xa8   : > { %v494_v17 = vpop.f32.mrf.mxu0 }
  0xa9   : > { %v523_v18 = vpop.f32.mrf.mxu1  ;;  %v495_v19 = vadd.f32 %v1030_v16, %v494_v17 }
  0xab   : > { %v524_v20 = vadd.f32 %v523_v18, %v495_v19 }
  0xb0   : > { %v552_v21 = vpop.f32.mrf.mxu2  ;;  %v496_v24 = vpop.f32.mrf.mxu0 }
  0xb1   : > { %v581_v22 = vpop.f32.mrf.mxu3  ;;  %v553_v23 = vadd.f32 %v552_v21, %v524_v20  ;;  %v525_v25 = vpop.f32.mrf.mxu1  ;;  %v497_v27 = vadd.f32 %v1030_v16, %v496_v24 }
  0xb3   : > { %v582_v26 = vadd.f32 %v581_v22, %v553_v23  ;;  %v526_v29 = vadd.f32 %v525_v25, %v497_v27 }
  0xb5   : > { %v601_v28 = vmax.f32 %v582_v26, 0.0 }
  0xb7   : > { %609 = vst [vmem:[%s1038_s10] sm:$0xff] %v601_v28 }
  0xb8   : > { %v554_v30 = vpop.f32.mrf.mxu2  ;;  %v499_v33 = vpop.f32.mrf.mxu0 }
  0xb9   : > { %v583_v31 = vpop.f32.mrf.mxu3  ;;  %v555_v32 = vadd.f32 %v554_v30, %v526_v29  ;;  %v528_v34 = vpop.f32.mrf.mxu1  ;;  %v500_v35 = vadd.f32 %v1030_v16, %v499_v33 }
  0xbb   : > { %v584_v36 = vadd.f32 %v583_v31, %v555_v32  ;;  %v529_v38 = vadd.f32 %v528_v34, %v500_v35 }
  0xbd   : > { %v602_v37 = vmax.f32 %v584_v36, 0.0 }
  0xbf   : > { %610 = vst [vmem:[%s1038_s10 + $0x8] sm:$0xff] %v602_v37 }
  0xc0   : > { %v557_v39 = vpop.f32.mrf.mxu2  ;;  %v501_v42 = vpop.f32.mrf.mxu0 }
  0xc1   : > { %v586_v40 = vpop.f32.mrf.mxu3  ;;  %v558_v41 = vadd.f32 %v557_v39, %v529_v38  ;;  %v530_v43 = vpop.f32.mrf.mxu1  ;;  %v502_v45 = vadd.f32 %v1030_v16, %v501_v42 }
  0xc3   : > { %v587_v44 = vadd.f32 %v586_v40, %v558_v41  ;;  %v531_v47 = vadd.f32 %v530_v43, %v502_v45 }
  0xc5   : > { %v603_v46 = vmax.f32 %v587_v44, 0.0 }
  0xc7   : > { %611 = vst [vmem:[%s1038_s10 + $0x10] sm:$0xff] %v603_v46 }
  0xc8   : > { %v559_v48 = vpop.f32.mrf.mxu2  ;;  %v504_v51 = vpop.f32.mrf.mxu0 }
  0xc9   : > { %v588_v49 = vpop.f32.mrf.mxu3  ;;  %v560_v50 = vadd.f32 %v559_v48, %v531_v47  ;;  %v533_v52 = vpop.f32.mrf.mxu1  ;;  %v505_v53 = vadd.f32 %v1030_v16, %v504_v51 }
  0xcb   : > { %v589_v54 = vadd.f32 %v588_v49, %v560_v50  ;;  %v534_v56 = vadd.f32 %v533_v52, %v505_v53 }
  0xcd   : > { %v604_v55 = vmax.f32 %v589_v54, 0.0 }
  0xcf   : > { %612 = vst [vmem:[%s1038_s10 + $0x18] sm:$0xff] %v604_v55 }
  0xd0   : > { %v562_v57 = vpop.f32.mrf.mxu2  ;;  %v506_v60 = vpop.f32.mrf.mxu0 }
  0xd1   : > { %v591_v58 = vpop.f32.mrf.mxu3  ;;  %v563_v59 = vadd.f32 %v562_v57, %v534_v56  ;;  %v535_v61 = vpop.f32.mrf.mxu1  ;;  %v507_v63 = vadd.f32 %v1030_v16, %v506_v60 }
  0xd3   : > { %v592_v62 = vadd.f32 %v591_v58, %v563_v59  ;;  %v536_v1 = vadd.f32 %v535_v61, %v507_v63 }
  0xd5   : > { %v605_v0 = vmax.f32 %v592_v62, 0.0 }
  0xd7   : > { %613 = vst [vmem:[%s1038_s10 + $0x20] sm:$0xff] %v605_v0 }
  0xd8   : > { %v564_v2 = vpop.f32.mrf.mxu2  ;;  %v509_v5 = vpop.f32.mrf.mxu0 }
  0xd9   : > { %v593_v3 = vpop.f32.mrf.mxu3  ;;  %v565_v4 = vadd.f32 %v564_v2, %v536_v1  ;;  %v510_v6 = vadd.f32 %v1030_v16, %v509_v5  ;;  %v538_v8 = vpop.f32.mrf.mxu1 }
  0xdb   : > { %v594_v7 = vadd.f32 %v593_v3, %v565_v4  ;;  %v539_v10 = vadd.f32 %v538_v8, %v510_v6 }
  0xdd   : > { %v606_v9 = vmax.f32 %v594_v7, 0.0 }
  0xdf   : > { %614 = vst [vmem:[%s1038_s10 + $0x28] sm:$0xff] %v606_v9 }
  0xe0   : > { %v567_v11 = vpop.f32.mrf.mxu2  ;;  %v511_v14 = vpop.f32.mrf.mxu0 }
  0xe1   : > { %v596_v12 = vpop.f32.mrf.mxu3  ;;  %v568_v13 = vadd.f32 %v567_v11, %v539_v10  ;;  %v512_v17 = vadd.f32 %v1030_v16, %v511_v14  ;;  %v540_v19 = vpop.f32.mrf.mxu1 }
  0xe3   : > { %v597_v15 = vadd.f32 %v596_v12, %v568_v13  ;;  %v541_v20 = vadd.f32 %v540_v19, %v512_v17 }
  0xe5   : > { %v607_v18 = vmax.f32 %v597_v15, 0.0 }
  0xe7   : > { %615 = vst [vmem:[%s1038_s10 + $0x30] sm:$0xff] %v607_v18 }
  0xe8   : > { %v569_v21 = vpop.f32.mrf.mxu2 }
  0xe9   : > { %v570_v22 = vadd.f32 %v569_v21, %v541_v20  ;;  %v598_v23 = vpop.f32.mrf.mxu3 }
  0xeb   : > { %v599_v24 = vadd.f32 %v598_v23, %v570_v22 }
  0xed   : > { %v608_v25 = vmax.f32 %v599_v24, 0.0 }
  0xef   : > { %616 = vst [vmem:[%s1038_s10 + $0x38] sm:$0xff] %v608_v25 }
  0xf0 PF: > { %s13_s12 = sadd.s32 1, %s861_s12  }
  0xf1   : > { %p10_p4 = scmp.ge.s32.totalorder %s13_s12, 4  }
  0xf3   :  { %12 = sbr.rel (!%p10_p4) target bundleno = 1 (0x1), region = 62 }

// kernel: sanet_forward.8
= control target key start
LH: loop header
LB: loop body
LE: loop exit
PB: predicated region body
PF: predicated region fallthrough
CT: control target
= control target key end

     0   :  { %s498_s12 = smov 0   ;;  %s564_s0 = inlined_call_operand.vmem [shape: f32[32,3], index: 0, kind: input, shape index: {}]   ;;  %s565_s1 = inlined_call_operand.vmem [shape: bf16[3,1024], index: 1, kind: input, shape index: {}]   ;;  %s566_s2 = inlined_call_operand.vmem [shape: f32[1,1024], index: 2, kind: input, shape index: {}]   ;;  %s567_s3 = inlined_call_operand.vmem [shape: f32[32,1024], index: 3, kind: output, shape index: {}]  }
   0x1 LB: > { %s439_s13 = sadd.s32 4294967295, %s475_s12   ;;  %p443_p0 = scmp.ge.s32.totalorder %s475_s12, 1  ;;  %s475_s12 = sphi %s498_s12, %s13_s12  }
   0x2   : > { %p138_p1 = scmp.lt.s32.totalorder %s475_s12, 3 }
   0x4   : > { %p139_p2 = pnand %p443_p0, %p138_p1 }
   0x5   : > { %s444_s16 = sshll.u32 (!%p139_p2), %s439_s13, 1 }
   0x6   : > { %142 = sbr.rel (%p139_p2) target bundleno = 188 (0xbc), region = 32  ;;  %p164_p3 = scmp.lt.s32.totalorder (!%p139_p2), %s444_s16, 3 }
   0xb   : > { %v180_v0 = vld [vmem:[%s565_s1] sm:$0xff]  ;;  %vm217_vm0 = vcmask 1040384   ;;  %v181_v1 = vld [vmem:[%s565_s1 + $0x8] sm:$0xff]  ;;  %vm218_vm1 = vcmask 1041408   ;;  %v477_v2 = vmov 65535   ;;  %s569_s16 = smov (!%p164_p3, %s444_s16), 3 }
   0xc   : > { %201 = vst [vmem:[#allocation1] ss:$4 sm:$0xff] %v180_v0  ;;  %v219_v3 = vsel %vm217_vm0, 4294967295, %v477_v2  ;;  %s445_s19 = sshll.u32 %s569_s16, 3  ;;  %vm213_vm2 = vcmask 23552   ;;  %v529_v24 = vld [vmem:[%s566_s2] sm:$0xff] }
   0xd   : > { %204 = vst [vmem:[#allocation1 + $0x20] ss:$4 sm:$0xff] %v181_v1  ;;  %v220_v4 = vsel %vm218_vm1, %v219_v3, 0  ;;  %s167_s22 = scalar_lea.vmem %s564_s0, %s445_s19  ;;  %v184_v25 = vperm.slane %v529_v24, 0  ;;  %v185_v26 = vperm.slane %v529_v24, 1  ;;  %s459_s25 = sshll.u32 %s569_s16, 6 }
   0xe   : > { %v177_v5 = vld [vmem:[%s167_s22] sm:$0xff]  ;;  %v178_v6 = vld [vmem:[%s167_s22 + $0x8] sm:$0xff]  ;;  %s537_s28 = scalar_lea.vmem %s567_s3, %s459_s25  ;;  %v186_v33 = vperm.slane %v529_v24, 2  ;;  %v187_v34 = vperm.slane %v529_v24, 3  ;;  %v188_v47 = vperm.slane %v529_v24, 4  ;;  %v189_v48 = vperm.slane %v529_v24, 5 }
   0xf   : > { %v179_v15 = vpack.c.bf16 %v178_v6, %v177_v5  ;;  %v190_v61 = vperm.slane %v529_v24, 6  ;;  %v191_v62 = vperm.slane %v529_v24, 7 }
  0x13   : > { %v205_v7 = vld.sshfl [vmem:[#allocation1] sm:$0xff pattern:$0x73625140]  ;;  %v206_v8 = vld.sshfl [vmem:[#allocation1 + $0x8] sm:$0xff pattern:$0x73625140] }
  0x14   : > { %v221_v9 = vand.u32 %v220_v4, %v205_v7  ;;  %v223_v10 = vand.u32 %v220_v4, %v206_v8  ;;  %v207_v11 = vld.sshfl [vmem:[#allocation1 + $0x10] sm:$0xff pattern:$0x73625140]  ;;  %v208_v12 = vld.sshfl [vmem:[#allocation1 + $0x18] sm:$0xff pattern:$0x73625140] }
  0x15   : > { %v225_v13 = vand.u32 %v220_v4, %v207_v11  ;;  %v227_v14 = vand.u32 %v220_v4, %v208_v12  ;;  %v211_v16 = vld.sshfl [vmem:[#allocation1 + $0x30] sm:$0xff pattern:$0x73625140]  ;;  %v212_v17 = vld.sshfl [vmem:[#allocation1 + $0x38] sm:$0xff pattern:$0x73625140] }
  0x16   : > { %244 = vmatpush.bf16.msra.mxu0 %v221_v9  ;;  %258 = vmatpush.bf16.msra.mxu1 %v223_v10  ;;  %v233_v18 = vand.u32 %v220_v4, %v211_v16  ;;  %v235_v19 = vand.u32 %v220_v4, %v212_v17  ;;  %v209_v20 = vld.sshfl [vmem:[#allocation1 + $0x20] sm:$0xff pattern:$0x73625140]  ;;  %v210_v21 = vld.sshfl [vmem:[#allocation1 + $0x28] sm:$0xff pattern:$0x73625140] }
  0x17   : > { %272 = vmatpush.bf16.msra.mxu2 %v225_v13  ;;  %286 = vmatpush.bf16.msra.mxu3 %v227_v14  ;;  %v229_v22 = vand.u32 %v220_v4, %v209_v20  ;;  %v231_v23 = vand.u32 %v220_v4, %v210_v21 }
  0x19   : > { %449 = vmatmul.msk.bf16.vlgmr.msra.gmra.mxu0 %vm213_vm2, %v179_v15  ;;  %450 = vmatmul.msk.bf16.vlgmr.msra.gmra.mxu1 %vm213_vm2, %v179_v15 }
  0x1a   : > { %451 = vmatmul.msk.bf16.vlgmr.msra.gmra.mxu2 %vm213_vm2, %v179_v15  ;;  %452 = vmatmul.msk.bf16.vlgmr.msra.gmra.mxu3 %vm213_vm2, %v179_v15 }
  0x1b   : > { %328 = vmatpush.bf16.msrb.mxu2 %v233_v18  ;;  %342 = vmatpush.bf16.msrb.mxu3 %v235_v19 }
  0x1c   : > { %300 = vmatpush.bf16.msrb.mxu0 %v229_v22  ;;  %314 = vmatpush.bf16.msrb.mxu1 %v231_v23 }
  0x29   : > { %453 = vmatmul.msk.bf16.vlgmr.msrb.gmra.mxu0 %vm213_vm2, %v179_v15  ;;  %454 = vmatmul.msk.bf16.vlgmr.msrb.gmra.mxu1 %vm213_vm2, %v179_v15 }
  0x2a   : > { %455 = vmatmul.msk.bf16.vlgmr.msrb.gmra.mxu2 %vm213_vm2, %v179_v15  ;;  %456 = vmatmul.msk.bf16.vlgmr.msrb.gmra.mxu3 %vm213_vm2, %v179_v15 }
  0x96   : > { %v246_v27 = vpop.f32.mrf.mxu0  ;;  %v260_v28 = vpop.f32.mrf.mxu1 }
  0x97   : > { %v247_v29 = vadd.f32 %v246_v27, %v184_v25  ;;  %v261_v30 = vadd.f32 %v260_v28, %v185_v26 }
  0x99   : > { %v349_v31 = vmax.f32 %v247_v29, 0.0  ;;  %v350_v32 = vmax.f32 %v261_v30, 0.0 }
  0x9b   : > { %365 = vst [vmem:[%s537_s28] sm:$0xff] %v349_v31 }
  0x9c   : > { %366 = vst [vmem:[%s537_s28 + $0x8] sm:$0xff] %v350_v32 }
  0x9d   : > { %v274_v35 = vpop.f32.mrf.mxu2  ;;  %v288_v36 = vpop.f32.mrf.mxu3 }
  0x9e   : > { %v275_v37 = vadd.f32 %v274_v35, %v186_v33  ;;  %v289_v38 = vadd.f32 %v288_v36, %v187_v34  ;;  %v248_v39 = vpop.f32.mrf.mxu0  ;;  %v262_v40 = vpop.f32.mrf.mxu1 }
  0x9f   : > { %v249_v41 = vadd.f32 %v248_v39, %v184_v25  ;;  %v263_v42 = vadd.f32 %v262_v40, %v185_v26 }
  0xa0   : > { %v351_v43 = vmax.f32 %v275_v37, 0.0  ;;  %v352_v44 = vmax.f32 %v289_v38, 0.0 }
  0xa1   : > { %v357_v45 = vmax.f32 %v249_v41, 0.0  ;;  %v358_v46 = vmax.f32 %v263_v42, 0.0 }
  0xa2   : > { %367 = vst [vmem:[%s537_s28 + $0x10] sm:$0xff] %v351_v43 }
  0xa3   : > { %368 = vst [vmem:[%s537_s28 + $0x18] sm:$0xff] %v352_v44 }
  0xa4   : > { %373 = vst [vmem:[%s537_s28 + $0x40] sm:$0xff] %v357_v45 }
  0xa5   : > { %374 = vst [vmem:[%s537_s28 + $0x48] sm:$0xff] %v358_v46  ;;  %v276_v49 = vpop.f32.mrf.mxu2  ;;  %v290_v50 = vpop.f32.mrf.mxu3 }
  0xa6   : > { %v277_v51 = vadd.f32 %v276_v49, %v186_v33  ;;  %v291_v52 = vadd.f32 %v290_v50, %v187_v34  ;;  %v302_v53 = vpop.f32.mrf.mxu0  ;;  %v316_v54 = vpop.f32.mrf.mxu1 }
  0xa7   : > { %v303_v55 = vadd.f32 %v302_v53, %v188_v47  ;;  %v317_v56 = vadd.f32 %v316_v54, %v189_v48 }
  0xa8   : > { %v359_v57 = vmax.f32 %v277_v51, 0.0  ;;  %v360_v58 = vmax.f32 %v291_v52, 0.0 }
  0xa9   : > { %v353_v59 = vmax.f32 %v303_v55, 0.0  ;;  %v354_v60 = vmax.f32 %v317_v56, 0.0 }
  0xaa   : > { %375 = vst [vmem:[%s537_s28 + $0x50] sm:$0xff] %v359_v57 }
  0xab   : > { %376 = vst [vmem:[%s537_s28 + $0x58] sm:$0xff] %v360_v58 }
  0xac   : > { %369 = vst [vmem:[%s537_s28 + $0x20] sm:$0xff] %v353_v59 }
  0xad   : > { %370 = vst [vmem:[%s537_s28 + $0x28] sm:$0xff] %v354_v60  ;;  %v330_v63 = vpop.f32.mrf.mxu2  ;;  %v344_v0 = vpop.f32.mrf.mxu3 }
  0xae   : > { %v331_v1 = vadd.f32 %v330_v63, %v190_v61  ;;  %v345_v2 = vadd.f32 %v344_v0, %v191_v62  ;;  %v304_v3 = vpop.f32.mrf.mxu0  ;;  %v318_v4 = vpop.f32.mrf.mxu1 }
  0xaf   : > { %v305_v5 = vadd.f32 %v304_v3, %v188_v47  ;;  %v319_v6 = vadd.f32 %v318_v4, %v189_v48 }
  0xb0   : > { %v355_v7 = vmax.f32 %v331_v1, 0.0  ;;  %v356_v8 = vmax.f32 %v345_v2, 0.0 }
  0xb1   : > { %v361_v9 = vmax.f32 %v305_v5, 0.0  ;;  %v362_v10 = vmax.f32 %v319_v6, 0.0 }
  0xb2   : > { %371 = vst [vmem:[%s537_s28 + $0x30] sm:$0xff] %v355_v7 }
  0xb3   : > { %372 = vst [vmem:[%s537_s28 + $0x38] sm:$0xff] %v356_v8 }
  0xb4   : > { %377 = vst [vmem:[%s537_s28 + $0x60] sm:$0xff] %v361_v9 }
  0xb5   : > { %378 = vst [vmem:[%s537_s28 + $0x68] sm:$0xff] %v362_v10  ;;  %v332_v11 = vpop.f32.mrf.mxu2  ;;  %v346_v12 = vpop.f32.mrf.mxu3 }
  0xb6   : > { %v333_v13 = vadd.f32 %v332_v11, %v190_v61  ;;  %v347_v14 = vadd.f32 %v346_v12, %v191_v62 }
  0xb8   : > { %v363_v15 = vmax.f32 %v333_v13, 0.0  ;;  %v364_v16 = vmax.f32 %v347_v14, 0.0 }
  0xba   : > { %379 = vst [vmem:[%s537_s28 + $0x70] sm:$0xff] %v363_v15 }
  0xbb   : > { %380 = vst [vmem:[%s537_s28 + $0x78] sm:$0xff] %v364_v16 }
  0xbc PF: > { %s13_s12 = sadd.s32 1, %s475_s12  }
  0xbd   : > { %p10_p4 = scmp.ge.s32.totalorder %s13_s12, 4  }
  0xbf   :  { %12 = sbr.rel (!%p10_p4) target bundleno = 1 (0x1), region = 63 }

// kernel: sanet_forward.11
= control target key start
LH: loop header
LB: loop body
LE: loop exit
PB: predicated region body
PF: predicated region fallthrough
CT: control target
= control target key end

     0   :  { %s1259_s12 = smov 0   ;;  %s1493_s0 = inlined_call_operand.vmem [shape: f32[32,1024], index: 0, kind: input, shape index: {}]   ;;  %s1494_s1 = inlined_call_operand.vmem [shape: bf16[1024,128], index: 1, kind: input, shape index: {}]   ;;  %s1495_s2 = inlined_call_operand.vmem [shape: f32[1,128], index: 2, kind: input, shape index: {}]   ;;  %s1496_s3 = inlined_call_operand.vmem [shape: f32[32,128], index: 3, kind: output, shape index: {}]  }
   0x1 LB: > { %s889_s13 = sadd.s32 4294967295, %s1237_s12   ;;  %p893_p0 = scmp.ge.s32.totalorder %s1237_s12, 1  ;;  %s1237_s12 = sphi %s1259_s12, %s13_s12  }
   0x2   : > { %p139_p1 = scmp.lt.s32.totalorder %s1237_s12, 3 }
   0x4   : > { %p140_p2 = pnand %p893_p0, %p139_p1 }
   0x5   : > { %s894_s11 = sshll.u32 (!%p140_p2), %s889_s13, 1 }
   0x6   : > { %143 = sbr.rel (%p140_p2) target bundleno = 224 (0xe0), region = 32  ;;  %p165_p3 = scmp.lt.s32.totalorder (!%p140_p2), %s894_s11, 3 }
   0xb   : > { %v1165_v0 = vld [vmem:[%s1494_s1 + $0x38] sm:$0xff]  ;;  %v1164_v4 = vld [vmem:[%s1494_s1 + $0x30] sm:$0xff]  ;;  %v1163_v8 = vld [vmem:[%s1494_s1 + $0x28] sm:$0xff]  ;;  %s1498_s11 = smov (!%p165_p3, %s894_s11), 3 }
   0xc   : > { %v1173_v1 = vld [vmem:[%s1494_s1 + $0x78] sm:$0xff]  ;;  %717 = vmatpush.bf16.msra.mxu0 %v1165_v0  ;;  %v1172_v5 = vld [vmem:[%s1494_s1 + $0x70] sm:$0xff]  ;;  %v1171_v9 = vld [vmem:[%s1494_s1 + $0x68] sm:$0xff]  ;;  %s1157_s10 = sshll.u32 %s1498_s11, 6 }
   0xd   : > { %v1181_v2 = vld [vmem:[%s1494_s1 + $0xb8] sm:$0xff]  ;;  %731 = vmatpush.bf16.msra.mxu1 %v1173_v1  ;;  %v1180_v6 = vld [vmem:[%s1494_s1 + $0xb0] sm:$0xff]  ;;  %v1179_v10 = vld [vmem:[%s1494_s1 + $0xa8] sm:$0xff]  ;;  %s1357_s23 = scalar_lea.vmem %s1493_s0, %s1157_s10 }
   0xe   : > { %v1189_v3 = vld [vmem:[%s1494_s1 + $0xf8] sm:$0xff]  ;;  %745 = vmatpush.bf16.msra.mxu2 %v1181_v2  ;;  %v1188_v7 = vld [vmem:[%s1494_s1 + $0xf0] sm:$0xff]  ;;  %v1187_v11 = vld [vmem:[%s1494_s1 + $0xe8] sm:$0xff] }
   0xf   : > { %759 = vmatpush.bf16.msra.mxu3 %v1189_v3  ;;  %v1162_v12 = vld [vmem:[%s1494_s1 + $0x20] sm:$0xff]  ;;  %v1161_v16 = vld [vmem:[%s1494_s1 + $0x18] sm:$0xff]  ;;  %v1160_v20 = vld [vmem:[%s1494_s1 + $0x10] sm:$0xff] }
  0x10   : > { %718 = vmatpush.bf16.msra.mxu0 %v1164_v4  ;;  %v1170_v13 = vld [vmem:[%s1494_s1 + $0x60] sm:$0xff]  ;;  %v1169_v17 = vld [vmem:[%s1494_s1 + $0x58] sm:$0xff]  ;;  %v1168_v21 = vld [vmem:[%s1494_s1 + $0x50] sm:$0xff] }
  0x11   : > { %732 = vmatpush.bf16.msra.mxu1 %v1172_v5  ;;  %v1178_v14 = vld [vmem:[%s1494_s1 + $0xa0] sm:$0xff]  ;;  %v1177_v18 = vld [vmem:[%s1494_s1 + $0x98] sm:$0xff]  ;;  %v1176_v22 = vld [vmem:[%s1494_s1 + $0x90] sm:$0xff] }
  0x12   : > { %746 = vmatpush.bf16.msra.mxu2 %v1180_v6  ;;  %v1186_v15 = vld [vmem:[%s1494_s1 + $0xe0] sm:$0xff]  ;;  %v1185_v19 = vld [vmem:[%s1494_s1 + $0xd8] sm:$0xff]  ;;  %v1184_v23 = vld [vmem:[%s1494_s1 + $0xd0] sm:$0xff] }
  0x13   : > { %760 = vmatpush.bf16.msra.mxu3 %v1188_v7  ;;  %v1159_v24 = vld [vmem:[%s1494_s1 + $0x8] sm:$0xff]  ;;  %v1158_v28 = vld [vmem:[%s1494_s1] sm:$0xff]  ;;  %v1197_v32 = vld [vmem:[%s1494_s1 + $0x138] sm:$0xff] }
  0x14   : > { %719 = vmatpush.bf16.msra.mxu0 %v1163_v8  ;;  %v1167_v25 = vld [vmem:[%s1494_s1 + $0x48] sm:$0xff]  ;;  %v1166_v29 = vld [vmem:[%s1494_s1 + $0x40] sm:$0xff]  ;;  %v1205_v33 = vld [vmem:[%s1494_s1 + $0x178] sm:$0xff] }
  0x15   : > { %733 = vmatpush.bf16.msra.mxu1 %v1171_v9  ;;  %v1175_v26 = vld [vmem:[%s1494_s1 + $0x88] sm:$0xff]  ;;  %v1174_v30 = vld [vmem:[%s1494_s1 + $0x80] sm:$0xff]  ;;  %v179_v34 = vld [vmem:[%s1357_s23 + $0x10] sm:$0xff] }
  0x16   : > { %747 = vmatpush.bf16.msra.mxu2 %v1179_v10  ;;  %v1183_v27 = vld [vmem:[%s1494_s1 + $0xc8] sm:$0xff]  ;;  %v1182_v31 = vld [vmem:[%s1494_s1 + $0xc0] sm:$0xff]  ;;  %v187_v35 = vld [vmem:[%s1357_s23 + $0x50] sm:$0xff] }
  0x17   : > { %761 = vmatpush.bf16.msra.mxu3 %v1187_v11  ;;  %v177_v36 = vld [vmem:[%s1357_s23] sm:$0xff]  ;;  %v180_v38 = vld [vmem:[%s1357_s23 + $0x18] sm:$0xff]  ;;  %v178_v40 = vld [vmem:[%s1357_s23 + $0x8] sm:$0xff]  ;;  %v195_v44 = vpack.c.bf16 %v187_v35, %v179_v34 }
  0x18   : > { %720 = vmatpush.bf16.msra.mxu0 %v1162_v12  ;;  %v185_v37 = vld [vmem:[%s1357_s23 + $0x40] sm:$0xff]  ;;  %v188_v39 = vld [vmem:[%s1357_s23 + $0x58] sm:$0xff]  ;;  %v186_v41 = vld [vmem:[%s1357_s23 + $0x48] sm:$0xff] }
  0x19   : > { %734 = vmatpush.bf16.msra.mxu1 %v1170_v13  ;;  %v1213_v42 = vld [vmem:[%s1494_s1 + $0x1b8] sm:$0xff]  ;;  %v193_v45 = vpack.c.bf16 %v185_v37, %v177_v36  ;;  %v196_v46 = vpack.c.bf16 %v188_v39, %v180_v38  ;;  %v194_v47 = vpack.c.bf16 %v186_v41, %v178_v40  ;;  %v1196_v48 = vld [vmem:[%s1494_s1 + $0x130] sm:$0xff]  ;;  %v1195_v52 = vld [vmem:[%s1494_s1 + $0x128] sm:$0xff] }
  0x1a   : > { %748 = vmatpush.bf16.msra.mxu2 %v1178_v14  ;;  %v1221_v43 = vld [vmem:[%s1494_s1 + $0x1f8] sm:$0xff]  ;;  %v1204_v49 = vld [vmem:[%s1494_s1 + $0x170] sm:$0xff]  ;;  %v1203_v53 = vld [vmem:[%s1494_s1 + $0x168] sm:$0xff] }
  0x1b   : > { %762 = vmatpush.bf16.msra.mxu3 %v1186_v15  ;;  %v1212_v50 = vld [vmem:[%s1494_s1 + $0x1b0] sm:$0xff]  ;;  %v1211_v54 = vld [vmem:[%s1494_s1 + $0x1a8] sm:$0xff]  ;;  %v1194_v56 = vld [vmem:[%s1494_s1 + $0x120] sm:$0xff] }
  0x1c   : > { %721 = vmatpush.bf16.msra.mxu0 %v1161_v16  ;;  %v1220_v51 = vld [vmem:[%s1494_s1 + $0x1f0] sm:$0xff]  ;;  %v1219_v55 = vld [vmem:[%s1494_s1 + $0x1e8] sm:$0xff]  ;;  %v1202_v57 = vld [vmem:[%s1494_s1 + $0x160] sm:$0xff] }
  0x1d   : > { %735 = vmatpush.bf16.msra.mxu1 %v1169_v17  ;;  %v1210_v58 = vld [vmem:[%s1494_s1 + $0x1a0] sm:$0xff]  ;;  %v1193_v60 = vld [vmem:[%s1494_s1 + $0x118] sm:$0xff]  ;;  %v1192_v0 = vld [vmem:[%s1494_s1 + $0x110] sm:$0xff] }
  0x1e   : > { %749 = vmatpush.bf16.msra.mxu2 %v1177_v18  ;;  %v1218_v59 = vld [vmem:[%s1494_s1 + $0x1e0] sm:$0xff]  ;;  %v1201_v61 = vld [vmem:[%s1494_s1 + $0x158] sm:$0xff]  ;;  %v1200_v1 = vld [vmem:[%s1494_s1 + $0x150] sm:$0xff] }
  0x1f   : > { %763 = vmatpush.bf16.msra.mxu3 %v1185_v19  ;;  %v1209_v62 = vld [vmem:[%s1494_s1 + $0x198] sm:$0xff]  ;;  %v1208_v2 = vld [vmem:[%s1494_s1 + $0x190] sm:$0xff]  ;;  %v1191_v4 = vld [vmem:[%s1494_s1 + $0x108] sm:$0xff] }
  0x20   : > { %722 = vmatpush.bf16.msra.mxu0 %v1160_v20  ;;  %v1217_v63 = vld [vmem:[%s1494_s1 + $0x1d8] sm:$0xff]  ;;  %v1216_v3 = vld [vmem:[%s1494_s1 + $0x1d0] sm:$0xff]  ;;  %v1199_v5 = vld [vmem:[%s1494_s1 + $0x148] sm:$0xff] }
  0x21   : > { %736 = vmatpush.bf16.msra.mxu1 %v1168_v21  ;;  %v1207_v6 = vld [vmem:[%s1494_s1 + $0x188] sm:$0xff]  ;;  %v1190_v8 = vld [vmem:[%s1494_s1 + $0x100] sm:$0xff]  ;;  %v183_v16 = vld [vmem:[%s1357_s23 + $0x30] sm:$0xff] }
  0x22   : > { %750 = vmatpush.bf16.msra.mxu2 %v1176_v22  ;;  %v1215_v7 = vld [vmem:[%s1494_s1 + $0x1c8] sm:$0xff]  ;;  %v1198_v9 = vld [vmem:[%s1494_s1 + $0x140] sm:$0xff]  ;;  %v191_v17 = vld [vmem:[%s1357_s23 + $0x70] sm:$0xff] }
  0x23   : > { %764 = vmatpush.bf16.msra.mxu3 %v1184_v23  ;;  %v1206_v10 = vld [vmem:[%s1494_s1 + $0x180] sm:$0xff]  ;;  %v182_v14 = vld [vmem:[%s1357_s23 + $0x28] sm:$0xff]  ;;  %v184_v18 = vld [vmem:[%s1357_s23 + $0x38] sm:$0xff]  ;;  %v199_v22 = vpack.c.bf16 %v191_v17, %v183_v16 }
  0x24   : > { %723 = vmatpush.bf16.msra.mxu0 %v1159_v24  ;;  %v1214_v11 = vld [vmem:[%s1494_s1 + $0x1c0] sm:$0xff]  ;;  %v190_v15 = vld [vmem:[%s1357_s23 + $0x68] sm:$0xff]  ;;  %v192_v19 = vld [vmem:[%s1357_s23 + $0x78] sm:$0xff] }
  0x25   : > { %737 = vmatpush.bf16.msra.mxu1 %v1167_v25  ;;  %v181_v12 = vld [vmem:[%s1357_s23 + $0x20] sm:$0xff]  ;;  %v198_v21 = vpack.c.bf16 %v190_v15, %v182_v14  ;;  %v200_v23 = vpack.c.bf16 %v192_v19, %v184_v18 }
  0x26   : > { %751 = vmatpush.bf16.msra.mxu2 %v1175_v26  ;;  %v189_v13 = vld [vmem:[%s1357_s23 + $0x60] sm:$0xff]  ;;  %s898_s23 = sshll.u32 %s1498_s11, 3 }
  0x27   : > { %765 = vmatpush.bf16.msra.mxu3 %v1183_v27  ;;  %v197_v20 = vpack.c.bf16 %v189_v13, %v181_v12  ;;  %v1230_v25 = vld [vmem:[%s1495_s2] ss:$0 sm:$0xff]  ;;  %s175_s28 = scalar_lea.vmem %s1496_s3, %s898_s23 }
  0x28   : > { %724 = vmatpush.bf16.msra.mxu0 %v1158_v28 }
  0x29   : > { %738 = vmatpush.bf16.msra.mxu1 %v1166_v29 }
  0x2a   : > { %752 = vmatpush.bf16.msra.mxu2 %v1174_v30 }
  0x2b   : > { %766 = vmatpush.bf16.msra.mxu3 %v1182_v31  ;;  %725 = vmatmul.bf16.vlgmr.msra.gmra.mxu0 %v193_v45 }
  0x2c   : > { %773 = vmatpush.bf16.msrb.mxu0 %v1197_v32  ;;  %739 = vmatmul.bf16.vlgmr.msra.gmra.mxu1 %v194_v47 }
  0x2d   : > { %787 = vmatpush.bf16.msrb.mxu1 %v1205_v33  ;;  %753 = vmatmul.bf16.vlgmr.msra.gmra.mxu2 %v195_v44 }
  0x2e   : > { %801 = vmatpush.bf16.msrb.mxu2 %v1213_v42  ;;  %767 = vmatmul.bf16.vlgmr.msra.gmra.mxu3 %v196_v46 }
  0x2f   : > { %815 = vmatpush.bf16.msrb.mxu3 %v1221_v43 }
  0x30   : > { %774 = vmatpush.bf16.msrb.mxu0 %v1196_v48 }
  0x31   : > { %788 = vmatpush.bf16.msrb.mxu1 %v1204_v49 }
  0x32   : > { %802 = vmatpush.bf16.msrb.mxu2 %v1212_v50 }
  0x33   : > { %816 = vmatpush.bf16.msrb.mxu3 %v1220_v51 }
  0x34   : > { %775 = vmatpush.bf16.msrb.mxu0 %v1195_v52 }
  0x35   : > { %789 = vmatpush.bf16.msrb.mxu1 %v1203_v53 }
  0x36   : > { %803 = vmatpush.bf16.msrb.mxu2 %v1211_v54 }
  0x37   : > { %817 = vmatpush.bf16.msrb.mxu3 %v1219_v55 }
  0x38   : > { %776 = vmatpush.bf16.msrb.mxu0 %v1194_v56 }
  0x39   : > { %790 = vmatpush.bf16.msrb.mxu1 %v1202_v57 }
  0x3a   : > { %804 = vmatpush.bf16.msrb.mxu2 %v1210_v58 }
  0x3b   : > { %818 = vmatpush.bf16.msrb.mxu3 %v1218_v59 }
  0x3c   : > { %777 = vmatpush.bf16.msrb.mxu0 %v1193_v60 }
  0x3d   : > { %791 = vmatpush.bf16.msrb.mxu1 %v1201_v61 }
  0x3e   : > { %805 = vmatpush.bf16.msrb.mxu2 %v1209_v62 }
  0x3f   : > { %819 = vmatpush.bf16.msrb.mxu3 %v1217_v63 }
  0x40   : > { %778 = vmatpush.bf16.msrb.mxu0 %v1192_v0 }
  0x41   : > { %792 = vmatpush.bf16.msrb.mxu1 %v1200_v1 }
  0x42   : > { %806 = vmatpush.bf16.msrb.mxu2 %v1208_v2 }
  0x43   : > { %820 = vmatpush.bf16.msrb.mxu3 %v1216_v3 }
  0x44   : > { %779 = vmatpush.bf16.msrb.mxu0 %v1191_v4 }
  0x45   : > { %793 = vmatpush.bf16.msrb.mxu1 %v1199_v5 }
  0x46   : > { %807 = vmatpush.bf16.msrb.mxu2 %v1207_v6 }
  0x47   : > { %821 = vmatpush.bf16.msrb.mxu3 %v1215_v7 }
  0x48   : > { %780 = vmatpush.bf16.msrb.mxu0 %v1190_v8 }
  0x49   : > { %794 = vmatpush.bf16.msrb.mxu1 %v1198_v9 }
  0x4a   : > { %808 = vmatpush.bf16.msrb.mxu2 %v1206_v10 }
  0x4b   : > { %822 = vmatpush.bf16.msrb.mxu3 %v1214_v11  ;;  %781 = vmatmul.bf16.vlgmr.msrb.gmra.mxu0 %v197_v20 }
  0x4c   : > { %795 = vmatmul.bf16.vlgmr.msrb.gmra.mxu1 %v198_v21 }
  0x4d   : > { %809 = vmatmul.bf16.vlgmr.msrb.gmra.mxu2 %v199_v22 }
  0x4e   : > { %823 = vmatmul.bf16.vlgmr.msrb.gmra.mxu3 %v200_v23 }
  0xa8   : > { %v726_v24 = vpop.f32.mrf.mxu0 }
  0xa9   : > { %v740_v26 = vpop.f32.mrf.mxu1  ;;  %v727_v27 = vadd.f32 %v1230_v25, %v726_v24 }
  0xab   : > { %v741_v30 = vadd.f32 %v740_v26, %v727_v27 }
  0xb0   : > { %v754_v28 = vpop.f32.mrf.mxu2  ;;  %v728_v31 = vpop.f32.mrf.mxu0 }
  0xb1   : > { %v768_v29 = vpop.f32.mrf.mxu3  ;;  %v742_v32 = vpop.f32.mrf.mxu1  ;;  %v755_v33 = vadd.f32 %v754_v28, %v741_v30  ;;  %v729_v34 = vadd.f32 %v1230_v25, %v728_v31 }
  0xb3   : > { %v769_v37 = vadd.f32 %v768_v29, %v755_v33  ;;  %v743_v38 = vadd.f32 %v742_v32, %v729_v34 }
  0xb8   : > { %v756_v35 = vpop.f32.mrf.mxu2 }
  0xb9   : > { %v770_v36 = vpop.f32.mrf.mxu3  ;;  %v757_v42 = vadd.f32 %v756_v35, %v743_v38 }
  0xbb   : > { %v771_v46 = vadd.f32 %v770_v36, %v757_v42 }
  0xc8   : > { %v782_v39 = vpop.f32.mrf.mxu0 }
  0xc9   : > { %v783_v40 = vadd.f32 %v782_v39, %v769_v37  ;;  %v796_v41 = vpop.f32.mrf.mxu1 }
  0xcb   : > { %v797_v43 = vadd.f32 %v796_v41, %v783_v40 }
  0xd0   : > { %v810_v44 = vpop.f32.mrf.mxu2  ;;  %v784_v48 = vpop.f32.mrf.mxu0 }
  0xd1   : > { %v824_v45 = vpop.f32.mrf.mxu3  ;;  %v811_v47 = vadd.f32 %v810_v44, %v797_v43  ;;  %v785_v50 = vadd.f32 %v784_v48, %v771_v46  ;;  %v798_v52 = vpop.f32.mrf.mxu1 }
  0xd3   : > { %v825_v49 = vadd.f32 %v824_v45, %v811_v47  ;;  %v799_v53 = vadd.f32 %v798_v52, %v785_v50 }
  0xd5   : > { %v829_v51 = vmax.f32 %v825_v49, 0.0 }
  0xd7   : > { %831 = vst [vmem:[%s175_s28] sm:$0xff] %v829_v51 }
  0xd8   : > { %v812_v54 = vpop.f32.mrf.mxu2 }
  0xd9   : > { %v813_v55 = vadd.f32 %v812_v54, %v799_v53  ;;  %v826_v56 = vpop.f32.mrf.mxu3 }
  0xdb   : > { %v827_v57 = vadd.f32 %v826_v56, %v813_v55 }
  0xdd   : > { %v830_v58 = vmax.f32 %v827_v57, 0.0 }
  0xdf   : > { %832 = vst [vmem:[%s175_s28 + $0x8] sm:$0xff] %v830_v58 }
  0xe0 PF: > { %s13_s12 = sadd.s32 1, %s1237_s12  }
  0xe1   : > { %p10_p4 = scmp.ge.s32.totalorder %s13_s12, 4  }
  0xe3   :  { %12 = sbr.rel (!%p10_p4) target bundleno = 1 (0x1), region = 62 }

// kernel: sanet_forward.9
= control target key start
LH: loop header
LB: loop body
LE: loop exit
PB: predicated region body
PF: predicated region fallthrough
CT: control target
= control target key end

     0   :  { %vm86_vm0 = vcmask 1040384   ;;  %vm87_vm1 = vcmask 1041408   ;;  %v383_v2 = vmov 65535   ;;  %vm82_vm2 = vcmask 23552   ;;  %s507_s1 = inlined_call_operand.vmem [shape: bf16[3,2048], index: 1, kind: input, shape index: {}]   ;;  %s508_s0 = inlined_call_operand.vmem [shape: f32[8,3], index: 0, kind: input, shape index: {}]   ;;  %s509_s2 = inlined_call_operand.vmem [shape: f32[1,2048], index: 2, kind: input, shape index: {}]   ;;  %s510_s3 = inlined_call_operand.vmem [shape: f32[8,2048], index: 3, kind: output, shape index: {}]  }
   0x1   :  { %v17_v0 = vld [vmem:[%s507_s1] sm:$0xff]  ;;  %v18_v1 = vld [vmem:[%s507_s1 + $0x8] sm:$0xff]  ;;  %v88_v3 = vsel %vm86_vm0, 4294967295, %v383_v2  ;;  %v19_v5 = vld [vmem:[%s507_s1 + $0x10] sm:$0xff] }
   0x2   :  { %58 = vst [vmem:[#allocation1] ss:$4 sm:$0xff] %v17_v0  ;;  %v410_v4 = vsel %vm87_vm1, %v88_v3, 0  ;;  %v15_v6 = vld [vmem:[%s508_s0] sm:$0xff]  ;;  %v20_v17 = vld [vmem:[%s507_s1 + $0x18] sm:$0xff] }
   0x3   :  { %61 = vst [vmem:[#allocation1 + $0x20] ss:$4 sm:$0xff] %v18_v1  ;;  %v16_v15 = vpack.c.bf16 %v15_v6, %v15_v6  ;;  %v21_v41 = vld [vmem:[%s509_s2] sm:$0xff] }
   0x4   :  { %v25_v42 = vperm.slane %v21_v41, 0  ;;  %v26_v43 = vperm.slane %v21_v41, 1  ;;  %v27_v50 = vperm.slane %v21_v41, 2  ;;  %v28_v51 = vperm.slane %v21_v41, 3 }
   0x5   :  { %v29_v60 = vperm.slane %v21_v41, 4  ;;  %v30_v61 = vperm.slane %v21_v41, 5  ;;  %v31_v6 = vperm.slane %v21_v41, 6 }
   0x9   :  { %v62_v7 = vld.sshfl [vmem:[#allocation1] sm:$0xff pattern:$0x73625140]  ;;  %v63_v8 = vld.sshfl [vmem:[#allocation1 + $0x8] sm:$0xff pattern:$0x73625140] }
   0xa   :  { %v90_v9 = vand.u32 %v410_v4, %v62_v7  ;;  %v92_v10 = vand.u32 %v410_v4, %v63_v8  ;;  %v64_v11 = vld.sshfl [vmem:[#allocation1 + $0x10] sm:$0xff pattern:$0x73625140]  ;;  %v65_v12 = vld.sshfl [vmem:[#allocation1 + $0x18] sm:$0xff pattern:$0x73625140] }
   0xb   :  { %v94_v13 = vand.u32 %v410_v4, %v64_v11  ;;  %71 = vst [vmem:[#allocation1] ss:$4 sm:$0xff] %v19_v5  ;;  %v96_v14 = vand.u32 %v410_v4, %v65_v12  ;;  %v68_v16 = vld.sshfl [vmem:[#allocation1 + $0x30] sm:$0xff pattern:$0x73625140]  ;;  %v32_v7 = vperm.slane %v21_v41, 7 }
   0xc   :  { %129 = vmatpush.bf16.msra.mxu0 %v90_v9  ;;  %142 = vmatpush.bf16.msra.mxu1 %v92_v10  ;;  %v102_v18 = vand.u32 %v410_v4, %v68_v16  ;;  %v69_v19 = vld.sshfl [vmem:[#allocation1 + $0x38] sm:$0xff pattern:$0x73625140]  ;;  %v66_v20 = vld.sshfl [vmem:[#allocation1 + $0x20] sm:$0xff pattern:$0x73625140] }
   0xd   :  { %155 = vmatpush.bf16.msra.mxu2 %v94_v13  ;;  %168 = vmatpush.bf16.msra.mxu3 %v96_v14  ;;  %v104_v21 = vand.u32 %v410_v4, %v69_v19  ;;  %v98_v22 = vand.u32 %v410_v4, %v66_v20  ;;  %v67_v23 = vld.sshfl [vmem:[#allocation1 + $0x28] sm:$0xff pattern:$0x73625140] }
   0xe   :  { %73 = vst [vmem:[#allocation1 + $0x20] ss:$4 sm:$0xff] %v20_v17  ;;  %v100_v24 = vand.u32 %v410_v4, %v67_v23  ;;  %v22_v16 = vld [vmem:[%s509_s2 + $0x8] sm:$0xff] }
   0xf   :  { %366 = vmatmul.msk.bf16.vlgmr.msra.gmra.mxu0 %vm82_vm2, %v16_v15  ;;  %367 = vmatmul.msk.bf16.vlgmr.msra.gmra.mxu1 %vm82_vm2, %v16_v15  ;;  %v33_v17 = vperm.slane %v22_v16, 0 }
  0x10   :  { %368 = vmatmul.msk.bf16.vlgmr.msra.gmra.mxu2 %vm82_vm2, %v16_v15  ;;  %369 = vmatmul.msk.bf16.vlgmr.msra.gmra.mxu3 %vm82_vm2, %v16_v15 }
  0x11   :  { %207 = vmatpush.bf16.msrb.mxu2 %v102_v18  ;;  %220 = vmatpush.bf16.msrb.mxu3 %v104_v21  ;;  %v34_v18 = vperm.slane %v22_v16, 1 }
  0x12   :  { %181 = vmatpush.bf16.msrb.mxu0 %v98_v22  ;;  %194 = vmatpush.bf16.msrb.mxu1 %v100_v24  ;;  %v76_v25 = vld.sshfl [vmem:[#allocation1 + $0x10] sm:$0xff pattern:$0x73625140]  ;;  %v77_v26 = vld.sshfl [vmem:[#allocation1 + $0x18] sm:$0xff pattern:$0x73625140] }
  0x13   :  { %v110_v27 = vand.u32 %v410_v4, %v76_v25  ;;  %v112_v28 = vand.u32 %v410_v4, %v77_v26  ;;  %v74_v29 = vld.sshfl [vmem:[#allocation1] sm:$0xff pattern:$0x73625140]  ;;  %v75_v30 = vld.sshfl [vmem:[#allocation1 + $0x8] sm:$0xff pattern:$0x73625140] }
  0x14   :  { %v106_v31 = vand.u32 %v410_v4, %v74_v29  ;;  %v108_v32 = vand.u32 %v410_v4, %v75_v30 }
  0x15   :  { %259 = vmatpush.bf16.msra.mxu2 %v110_v27  ;;  %272 = vmatpush.bf16.msra.mxu3 %v112_v28  ;;  %v80_v33 = vld.sshfl [vmem:[#allocation1 + $0x30] sm:$0xff pattern:$0x73625140]  ;;  %v81_v34 = vld.sshfl [vmem:[#allocation1 + $0x38] sm:$0xff pattern:$0x73625140] }
  0x16   :  { %233 = vmatpush.bf16.msra.mxu0 %v106_v31  ;;  %246 = vmatpush.bf16.msra.mxu1 %v108_v32  ;;  %v78_v35 = vld.sshfl [vmem:[#allocation1 + $0x20] sm:$0xff pattern:$0x73625140]  ;;  %v79_v36 = vld.sshfl [vmem:[#allocation1 + $0x28] sm:$0xff pattern:$0x73625140]  ;;  %v118_v37 = vand.u32 %v410_v4, %v80_v33  ;;  %v120_v38 = vand.u32 %v410_v4, %v81_v34 }
  0x17   :  { %v114_v39 = vand.u32 %v410_v4, %v78_v35  ;;  %v116_v40 = vand.u32 %v410_v4, %v79_v36  ;;  %v35_v27 = vperm.slane %v22_v16, 2  ;;  %v36_v28 = vperm.slane %v22_v16, 3 }
  0x1f   :  { %370 = vmatmul.msk.bf16.vlgmr.msrb.gmra.mxu0 %vm82_vm2, %v16_v15  ;;  %371 = vmatmul.msk.bf16.vlgmr.msrb.gmra.mxu1 %vm82_vm2, %v16_v15 }
  0x20   :  { %372 = vmatmul.msk.bf16.vlgmr.msrb.gmra.mxu2 %vm82_vm2, %v16_v15  ;;  %373 = vmatmul.msk.bf16.vlgmr.msrb.gmra.mxu3 %vm82_vm2, %v16_v15 }
  0x21   :  { %311 = vmatpush.bf16.msrb.mxu2 %v118_v37  ;;  %324 = vmatpush.bf16.msrb.mxu3 %v120_v38  ;;  %v37_v37 = vperm.slane %v22_v16, 4  ;;  %v38_v38 = vperm.slane %v22_v16, 5 }
  0x22   :  { %285 = vmatpush.bf16.msrb.mxu0 %v114_v39  ;;  %298 = vmatpush.bf16.msrb.mxu1 %v116_v40 }
  0x2f   :  { %374 = vmatmul.msk.bf16.vlgmr.msra.gmra.mxu0 %vm82_vm2, %v16_v15  ;;  %375 = vmatmul.msk.bf16.vlgmr.msra.gmra.mxu1 %vm82_vm2, %v16_v15 }
  0x30   :  { %376 = vmatmul.msk.bf16.vlgmr.msra.gmra.mxu2 %vm82_vm2, %v16_v15  ;;  %377 = vmatmul.msk.bf16.vlgmr.msra.gmra.mxu3 %vm82_vm2, %v16_v15 }
  0x3f   :  { %378 = vmatmul.msk.bf16.vlgmr.msrb.gmra.mxu0 %vm82_vm2, %v16_v15  ;;  %379 = vmatmul.msk.bf16.vlgmr.msrb.gmra.mxu1 %vm82_vm2, %v16_v15 }
  0x40   :  { %380 = vmatmul.msk.bf16.vlgmr.msrb.gmra.mxu2 %vm82_vm2, %v16_v15  ;;  %381 = vmatmul.msk.bf16.vlgmr.msrb.gmra.mxu3 %vm82_vm2, %v16_v15 }
  0x8c   :  { %v131_v44 = vpop.f32.mrf.mxu0  ;;  %v144_v45 = vpop.f32.mrf.mxu1 }
  0x8d   :  { %v132_v46 = vadd.f32 %v131_v44, %v25_v42  ;;  %v145_v47 = vadd.f32 %v144_v45, %v26_v43 }
  0x8f   :  { %v330_v48 = vmax.f32 %v132_v46, 0.0  ;;  %v331_v49 = vmax.f32 %v145_v47, 0.0  ;;  %v39_v47 = vperm.slane %v22_v16, 6 }
  0x91   :  { %346 = vst [vmem:[%s510_s3] sm:$0xff] %v330_v48  ;;  %v40_v48 = vperm.slane %v22_v16, 7 }
  0x92   :  { %347 = vst [vmem:[%s510_s3 + $0x8] sm:$0xff] %v331_v49 }
  0x93   :  { %v157_v52 = vpop.f32.mrf.mxu2  ;;  %v170_v53 = vpop.f32.mrf.mxu3 }
  0x94   :  { %v158_v54 = vadd.f32 %v157_v52, %v27_v50  ;;  %v171_v55 = vadd.f32 %v170_v53, %v28_v51  ;;  %v133_v56 = vpop.f32.mrf.mxu0  ;;  %v146_v57 = vpop.f32.mrf.mxu1 }
  0x96   :  { %v332_v58 = vmax.f32 %v158_v54, 0.0  ;;  %v333_v59 = vmax.f32 %v171_v55, 0.0 }
  0x98   :  { %348 = vst [vmem:[%s510_s3 + $0x10] sm:$0xff] %v332_v58 }
  0x99   :  { %349 = vst [vmem:[%s510_s3 + $0x18] sm:$0xff] %v333_v59 }
  0x9b   :  { %v159_v62 = vpop.f32.mrf.mxu2  ;;  %v172_v63 = vpop.f32.mrf.mxu3 }
  0x9c   :  { %v183_v0 = vpop.f32.mrf.mxu0  ;;  %v196_v1 = vpop.f32.mrf.mxu1 }
  0x9d   :  { %v184_v2 = vadd.f32 %v183_v0, %v29_v60  ;;  %v197_v3 = vadd.f32 %v196_v1, %v30_v61 }
  0x9f   :  { %v334_v4 = vmax.f32 %v184_v2, 0.0  ;;  %v335_v5 = vmax.f32 %v197_v3, 0.0 }
  0xa1   :  { %350 = vst [vmem:[%s510_s3 + $0x20] sm:$0xff] %v334_v4 }
  0xa2   :  { %351 = vst [vmem:[%s510_s3 + $0x28] sm:$0xff] %v335_v5 }
  0xa3   :  { %v209_v8 = vpop.f32.mrf.mxu2  ;;  %v222_v9 = vpop.f32.mrf.mxu3 }
  0xa4   :  { %v210_v10 = vadd.f32 %v209_v8, %v31_v6  ;;  %v223_v11 = vadd.f32 %v222_v9, %v32_v7  ;;  %v185_v12 = vpop.f32.mrf.mxu0  ;;  %v198_v13 = vpop.f32.mrf.mxu1 }
  0xa6   :  { %v336_v14 = vmax.f32 %v210_v10, 0.0  ;;  %v337_v15 = vmax.f32 %v223_v11, 0.0 }
  0xa8   :  { %352 = vst [vmem:[%s510_s3 + $0x30] sm:$0xff] %v336_v14 }
  0xa9   :  { %353 = vst [vmem:[%s510_s3 + $0x38] sm:$0xff] %v337_v15 }
  0xab   :  { %v211_v19 = vpop.f32.mrf.mxu2  ;;  %v224_v20 = vpop.f32.mrf.mxu3 }
  0xac   :  { %v235_v21 = vpop.f32.mrf.mxu0  ;;  %v248_v22 = vpop.f32.mrf.mxu1 }
  0xad   :  { %v236_v23 = vadd.f32 %v235_v21, %v33_v17  ;;  %v249_v24 = vadd.f32 %v248_v22, %v34_v18 }
  0xaf   :  { %v338_v25 = vmax.f32 %v236_v23, 0.0  ;;  %v339_v26 = vmax.f32 %v249_v24, 0.0 }
  0xb1   :  { %354 = vst [vmem:[%s510_s3 + $0x40] sm:$0xff] %v338_v25 }
  0xb2   :  { %355 = vst [vmem:[%s510_s3 + $0x48] sm:$0xff] %v339_v26 }
  0xb3   :  { %v261_v29 = vpop.f32.mrf.mxu2  ;;  %v274_v30 = vpop.f32.mrf.mxu3 }
  0xb4   :  { %v262_v31 = vadd.f32 %v261_v29, %v35_v27  ;;  %v275_v32 = vadd.f32 %v274_v30, %v36_v28  ;;  %v237_v33 = vpop.f32.mrf.mxu0  ;;  %v250_v34 = vpop.f32.mrf.mxu1 }
  0xb6   :  { %v340_v35 = vmax.f32 %v262_v31, 0.0  ;;  %v341_v36 = vmax.f32 %v275_v32, 0.0 }
  0xb8   :  { %356 = vst [vmem:[%s510_s3 + $0x50] sm:$0xff] %v340_v35 }
  0xb9   :  { %357 = vst [vmem:[%s510_s3 + $0x58] sm:$0xff] %v341_v36 }
  0xbb   :  { %v263_v39 = vpop.f32.mrf.mxu2  ;;  %v276_v40 = vpop.f32.mrf.mxu3 }
  0xbc   :  { %v287_v41 = vpop.f32.mrf.mxu0  ;;  %v300_v42 = vpop.f32.mrf.mxu1 }
  0xbd   :  { %v288_v43 = vadd.f32 %v287_v41, %v37_v37  ;;  %v301_v44 = vadd.f32 %v300_v42, %v38_v38 }
  0xbf   :  { %v342_v45 = vmax.f32 %v288_v43, 0.0  ;;  %v343_v46 = vmax.f32 %v301_v44, 0.0 }
  0xc1   :  { %358 = vst [vmem:[%s510_s3 + $0x60] sm:$0xff] %v342_v45 }
  0xc2   :  { %359 = vst [vmem:[%s510_s3 + $0x68] sm:$0xff] %v343_v46 }
  0xc3   :  { %v313_v49 = vpop.f32.mrf.mxu2  ;;  %v326_v50 = vpop.f32.mrf.mxu3 }
  0xc4   :  { %v314_v51 = vadd.f32 %v313_v49, %v39_v47  ;;  %v327_v52 = vadd.f32 %v326_v50, %v40_v48  ;;  %v289_v53 = vpop.f32.mrf.mxu0  ;;  %v302_v54 = vpop.f32.mrf.mxu1 }
  0xc6   :  { %v344_v55 = vmax.f32 %v314_v51, 0.0  ;;  %v345_v56 = vmax.f32 %v327_v52, 0.0 }
  0xc8   :  { %360 = vst [vmem:[%s510_s3 + $0x70] sm:$0xff] %v344_v55 }
  0xc9   :  { %361 = vst [vmem:[%s510_s3 + $0x78] sm:$0xff] %v345_v56 }
  0xcb   :  { %v315_v57 = vpop.f32.mrf.mxu2  ;;  %v328_v58 = vpop.f32.mrf.mxu3 }

// kernel: sanet_forward.10
= control target key start
LH: loop header
LB: loop body
LE: loop exit
PB: predicated region body
PF: predicated region fallthrough
CT: control target
= control target key end

     0   :  { %s2387_s1 = inlined_call_operand.vmem [shape: bf16[2048,128], index: 1, kind: input, shape index: {}]   ;;  %s2388_s2 = inlined_call_operand.vmem [shape: f32[1,128], index: 2, kind: input, shape index: {}]   ;;  %s2389_s0 = inlined_call_operand.vmem [shape: f32[8,2048], index: 0, kind: input, shape index: {}]   ;;  %s2390_s3 = inlined_call_operand.vmem [shape: f32[8,128], index: 3, kind: output, shape index: {}]  }
   0x1   :  { %v1807_v0 = vld [vmem:[%s2387_s1 + $0x38] sm:$0xff]  ;;  %v1806_v4 = vld [vmem:[%s2387_s1 + $0x30] sm:$0xff]  ;;  %v1805_v8 = vld [vmem:[%s2387_s1 + $0x28] sm:$0xff] }
   0x2   :  { %v1815_v1 = vld [vmem:[%s2387_s1 + $0x78] sm:$0xff]  ;;  %1074 = vmatpush.bf16.msra.mxu0 %v1807_v0  ;;  %v1814_v5 = vld [vmem:[%s2387_s1 + $0x70] sm:$0xff]  ;;  %v1813_v9 = vld [vmem:[%s2387_s1 + $0x68] sm:$0xff] }
   0x3   :  { %v1823_v2 = vld [vmem:[%s2387_s1 + $0xb8] sm:$0xff]  ;;  %1087 = vmatpush.bf16.msra.mxu1 %v1815_v1  ;;  %v1822_v6 = vld [vmem:[%s2387_s1 + $0xb0] sm:$0xff]  ;;  %v1821_v10 = vld [vmem:[%s2387_s1 + $0xa8] sm:$0xff] }
   0x4   :  { %v1831_v3 = vld [vmem:[%s2387_s1 + $0xf8] sm:$0xff]  ;;  %1100 = vmatpush.bf16.msra.mxu2 %v1823_v2  ;;  %v1830_v7 = vld [vmem:[%s2387_s1 + $0xf0] sm:$0xff]  ;;  %v1829_v11 = vld [vmem:[%s2387_s1 + $0xe8] sm:$0xff] }
   0x5   :  { %1113 = vmatpush.bf16.msra.mxu3 %v1831_v3  ;;  %v1804_v12 = vld [vmem:[%s2387_s1 + $0x20] sm:$0xff]  ;;  %v1803_v16 = vld [vmem:[%s2387_s1 + $0x18] sm:$0xff]  ;;  %v1802_v20 = vld [vmem:[%s2387_s1 + $0x10] sm:$0xff] }
   0x6   :  { %1075 = vmatpush.bf16.msra.mxu0 %v1806_v4  ;;  %v1812_v13 = vld [vmem:[%s2387_s1 + $0x60] sm:$0xff]  ;;  %v1811_v17 = vld [vmem:[%s2387_s1 + $0x58] sm:$0xff]  ;;  %v1810_v21 = vld [vmem:[%s2387_s1 + $0x50] sm:$0xff] }
   0x7   :  { %1088 = vmatpush.bf16.msra.mxu1 %v1814_v5  ;;  %v1820_v14 = vld [vmem:[%s2387_s1 + $0xa0] sm:$0xff]  ;;  %v1819_v18 = vld [vmem:[%s2387_s1 + $0x98] sm:$0xff]  ;;  %v1818_v22 = vld [vmem:[%s2387_s1 + $0x90] sm:$0xff] }
   0x8   :  { %1101 = vmatpush.bf16.msra.mxu2 %v1822_v6  ;;  %v1828_v15 = vld [vmem:[%s2387_s1 + $0xe0] sm:$0xff]  ;;  %v1827_v19 = vld [vmem:[%s2387_s1 + $0xd8] sm:$0xff]  ;;  %v1826_v23 = vld [vmem:[%s2387_s1 + $0xd0] sm:$0xff] }
   0x9   :  { %1114 = vmatpush.bf16.msra.mxu3 %v1830_v7  ;;  %v1801_v24 = vld [vmem:[%s2387_s1 + $0x8] sm:$0xff]  ;;  %v1800_v28 = vld [vmem:[%s2387_s1] sm:$0xff]  ;;  %v1839_v32 = vld [vmem:[%s2387_s1 + $0x138] sm:$0xff] }
   0xa   :  { %1076 = vmatpush.bf16.msra.mxu0 %v1805_v8  ;;  %v1809_v25 = vld [vmem:[%s2387_s1 + $0x48] sm:$0xff]  ;;  %v1808_v29 = vld [vmem:[%s2387_s1 + $0x40] sm:$0xff]  ;;  %v16_v33 = vld [vmem:[%s2389_s0 + $0x10] sm:$0xff] }
   0xb   :  { %1089 = vmatpush.bf16.msra.mxu1 %v1813_v9  ;;  %v1817_v26 = vld [vmem:[%s2387_s1 + $0x88] sm:$0xff]  ;;  %v1816_v30 = vld [vmem:[%s2387_s1 + $0x80] sm:$0xff]  ;;  %v1847_v35 = vld [vmem:[%s2387_s1 + $0x178] sm:$0xff]  ;;  %v32_v40 = vpack.c.bf16 %v16_v33, %v16_v33 }
   0xc   :  { %1102 = vmatpush.bf16.msra.mxu2 %v1821_v10  ;;  %v1825_v27 = vld [vmem:[%s2387_s1 + $0xc8] sm:$0xff]  ;;  %v1824_v31 = vld [vmem:[%s2387_s1 + $0xc0] sm:$0xff]  ;;  %v17_v36 = vld [vmem:[%s2389_s0 + $0x18] sm:$0xff] }
   0xd   :  { %1115 = vmatpush.bf16.msra.mxu3 %v1829_v11  ;;  %v14_v34 = vld [vmem:[%s2389_s0] sm:$0xff]  ;;  %v15_v37 = vld [vmem:[%s2389_s0 + $0x8] sm:$0xff]  ;;  %v1855_v38 = vld [vmem:[%s2387_s1 + $0x1b8] sm:$0xff]  ;;  %v33_v42 = vpack.c.bf16 %v17_v36, %v17_v36 }
   0xe   :  { %1077 = vmatpush.bf16.msra.mxu0 %v1804_v12  ;;  %v1863_v39 = vld [vmem:[%s2387_s1 + $0x1f8] sm:$0xff]  ;;  %v30_v41 = vpack.c.bf16 %v14_v34, %v14_v34  ;;  %v31_v43 = vpack.c.bf16 %v15_v37, %v15_v37  ;;  %v1838_v44 = vld [vmem:[%s2387_s1 + $0x130] sm:$0xff]  ;;  %v1837_v48 = vld [vmem:[%s2387_s1 + $0x128] sm:$0xff] }
   0xf   :  { %1090 = vmatpush.bf16.msra.mxu1 %v1812_v13  ;;  %v1846_v45 = vld [vmem:[%s2387_s1 + $0x170] sm:$0xff]  ;;  %v1845_v49 = vld [vmem:[%s2387_s1 + $0x168] sm:$0xff]  ;;  %v1836_v52 = vld [vmem:[%s2387_s1 + $0x120] sm:$0xff] }
  0x10   :  { %1103 = vmatpush.bf16.msra.mxu2 %v1820_v14  ;;  %v1854_v46 = vld [vmem:[%s2387_s1 + $0x1b0] sm:$0xff]  ;;  %v1853_v50 = vld [vmem:[%s2387_s1 + $0x1a8] sm:$0xff]  ;;  %v1844_v53 = vld [vmem:[%s2387_s1 + $0x160] sm:$0xff] }
  0x11   :  { %1116 = vmatpush.bf16.msra.mxu3 %v1828_v15  ;;  %v1862_v47 = vld [vmem:[%s2387_s1 + $0x1f0] sm:$0xff]  ;;  %v1861_v51 = vld [vmem:[%s2387_s1 + $0x1e8] sm:$0xff]  ;;  %v1852_v54 = vld [vmem:[%s2387_s1 + $0x1a0] sm:$0xff] }
  0x12   :  { %1078 = vmatpush.bf16.msra.mxu0 %v1803_v16  ;;  %v1860_v55 = vld [vmem:[%s2387_s1 + $0x1e0] sm:$0xff]  ;;  %v1835_v56 = vld [vmem:[%s2387_s1 + $0x118] sm:$0xff]  ;;  %v1834_v60 = vld [vmem:[%s2387_s1 + $0x110] sm:$0xff] }
  0x13   :  { %1091 = vmatpush.bf16.msra.mxu1 %v1811_v17  ;;  %v1843_v57 = vld [vmem:[%s2387_s1 + $0x158] sm:$0xff]  ;;  %v1842_v61 = vld [vmem:[%s2387_s1 + $0x150] sm:$0xff]  ;;  %v1833_v0 = vld [vmem:[%s2387_s1 + $0x108] sm:$0xff] }
  0x14   :  { %1104 = vmatpush.bf16.msra.mxu2 %v1819_v18  ;;  %v1851_v58 = vld [vmem:[%s2387_s1 + $0x198] sm:$0xff]  ;;  %v1850_v62 = vld [vmem:[%s2387_s1 + $0x190] sm:$0xff]  ;;  %v1841_v1 = vld [vmem:[%s2387_s1 + $0x148] sm:$0xff] }
  0x15   :  { %1117 = vmatpush.bf16.msra.mxu3 %v1827_v19  ;;  %v1859_v59 = vld [vmem:[%s2387_s1 + $0x1d8] sm:$0xff]  ;;  %v1858_v63 = vld [vmem:[%s2387_s1 + $0x1d0] sm:$0xff]  ;;  %v1849_v2 = vld [vmem:[%s2387_s1 + $0x188] sm:$0xff] }
  0x16   :  { %1079 = vmatpush.bf16.msra.mxu0 %v1802_v20  ;;  %v1857_v3 = vld [vmem:[%s2387_s1 + $0x1c8] sm:$0xff]  ;;  %v1832_v4 = vld [vmem:[%s2387_s1 + $0x100] sm:$0xff]  ;;  %v1871_v8 = vld [vmem:[%s2387_s1 + $0x238] sm:$0xff] }
  0x17   :  { %1092 = vmatpush.bf16.msra.mxu1 %v1810_v21  ;;  %v1840_v5 = vld [vmem:[%s2387_s1 + $0x140] sm:$0xff]  ;;  %v20_v9 = vld [vmem:[%s2389_s0 + $0x30] sm:$0xff]  ;;  %v1879_v11 = vld [vmem:[%s2387_s1 + $0x278] sm:$0xff] }
  0x18   :  { %1105 = vmatpush.bf16.msra.mxu2 %v1818_v22  ;;  %v1848_v6 = vld [vmem:[%s2387_s1 + $0x180] sm:$0xff]  ;;  %v21_v12 = vld [vmem:[%s2389_s0 + $0x38] sm:$0xff]  ;;  %v19_v13 = vld [vmem:[%s2389_s0 + $0x28] sm:$0xff]  ;;  %v36_v16 = vpack.c.bf16 %v20_v9, %v20_v9 }
  0x19   :  { %1118 = vmatpush.bf16.msra.mxu3 %v1826_v23  ;;  %v1856_v7 = vld [vmem:[%s2387_s1 + $0x1c0] sm:$0xff]  ;;  %v1887_v14 = vld [vmem:[%s2387_s1 + $0x2b8] sm:$0xff]  ;;  %v37_v18 = vpack.c.bf16 %v21_v12, %v21_v12  ;;  %v35_v19 = vpack.c.bf16 %v19_v13, %v19_v13  ;;  %v1870_v20 = vld [vmem:[%s2387_s1 + $0x230] sm:$0xff] }
  0x1a   :  { %1080 = vmatpush.bf16.msra.mxu0 %v1801_v24  ;;  %v18_v10 = vld [vmem:[%s2389_s0 + $0x20] sm:$0xff]  ;;  %v1895_v15 = vld [vmem:[%s2387_s1 + $0x2f8] sm:$0xff]  ;;  %v1878_v21 = vld [vmem:[%s2387_s1 + $0x270] sm:$0xff] }
  0x1b   :  { %1093 = vmatpush.bf16.msra.mxu1 %v1809_v25  ;;  %v34_v17 = vpack.c.bf16 %v18_v10, %v18_v10  ;;  %v1886_v22 = vld [vmem:[%s2387_s1 + $0x2b0] sm:$0xff]  ;;  %v1869_v24 = vld [vmem:[%s2387_s1 + $0x228] sm:$0xff]  ;;  %v1875_v33 = vld [vmem:[%s2387_s1 + $0x258] sm:$0xff] }
  0x1c   :  { %1106 = vmatpush.bf16.msra.mxu2 %v1817_v26  ;;  %v1894_v23 = vld [vmem:[%s2387_s1 + $0x2f0] sm:$0xff]  ;;  %v1877_v25 = vld [vmem:[%s2387_s1 + $0x268] sm:$0xff]  ;;  %v1883_v34 = vld [vmem:[%s2387_s1 + $0x298] sm:$0xff] }
  0x1d   :  { %1119 = vmatpush.bf16.msra.mxu3 %v1825_v27  ;;  %v1885_v26 = vld [vmem:[%s2387_s1 + $0x2a8] sm:$0xff]  ;;  %v1866_v36 = vld [vmem:[%s2387_s1 + $0x210] sm:$0xff]  ;;  %v1907_v9 = vld [vmem:[%s2387_s1 + $0x358] sm:$0xff] }
  0x1e   :  { %1081 = vmatpush.bf16.msra.mxu0 %v1800_v28  ;;  %v1893_v27 = vld [vmem:[%s2387_s1 + $0x2e8] sm:$0xff]  ;;  %v1868_v28 = vld [vmem:[%s2387_s1 + $0x220] sm:$0xff]  ;;  %v1874_v37 = vld [vmem:[%s2387_s1 + $0x250] sm:$0xff] }
  0x1f   :  { %1094 = vmatpush.bf16.msra.mxu1 %v1808_v29  ;;  %v1876_v29 = vld [vmem:[%s2387_s1 + $0x260] sm:$0xff]  ;;  %v1915_v10 = vld [vmem:[%s2387_s1 + $0x398] sm:$0xff]  ;;  %v1898_v12 = vld [vmem:[%s2387_s1 + $0x310] sm:$0xff] }
  0x20   :  { %1107 = vmatpush.bf16.msra.mxu2 %v1816_v30  ;;  %v1884_v30 = vld [vmem:[%s2387_s1 + $0x2a0] sm:$0xff]  ;;  %v1906_v13 = vld [vmem:[%s2387_s1 + $0x350] sm:$0xff] }
  0x21   :  { %1120 = vmatpush.bf16.msra.mxu3 %v1824_v31  ;;  %1082 = vmatmul.bf16.vlgmr.msra.gmra.mxu0 %v30_v41  ;;  %v1892_v31 = vld [vmem:[%s2387_s1 + $0x2e0] sm:$0xff]  ;;  %v1873_v41 = vld [vmem:[%s2387_s1 + $0x248] sm:$0xff] }
  0x22   :  { %1126 = vmatpush.bf16.msrb.mxu0 %v1839_v32  ;;  %1095 = vmatmul.bf16.vlgmr.msra.gmra.mxu1 %v31_v43  ;;  %v1867_v32 = vld [vmem:[%s2387_s1 + $0x218] sm:$0xff]  ;;  %v1889_v43 = vld [vmem:[%s2387_s1 + $0x2c8] sm:$0xff] }
  0x23   :  { %1139 = vmatpush.bf16.msrb.mxu1 %v1847_v35  ;;  %1108 = vmatmul.bf16.vlgmr.msra.gmra.mxu2 %v32_v40  ;;  %v1891_v35 = vld [vmem:[%s2387_s1 + $0x2d8] sm:$0xff]  ;;  %v1865_v40 = vld [vmem:[%s2387_s1 + $0x208] sm:$0xff] }
  0x24   :  { %1152 = vmatpush.bf16.msrb.mxu2 %v1855_v38  ;;  %1121 = vmatmul.bf16.vlgmr.msra.gmra.mxu3 %v33_v42  ;;  %v1882_v38 = vld [vmem:[%s2387_s1 + $0x290] sm:$0xff]  ;;  %v1881_v42 = vld [vmem:[%s2387_s1 + $0x288] sm:$0xff] }
  0x25   :  { %1165 = vmatpush.bf16.msrb.mxu3 %v1863_v39  ;;  %v1890_v39 = vld [vmem:[%s2387_s1 + $0x2d0] sm:$0xff] }
  0x26   :  { %1127 = vmatpush.bf16.msrb.mxu0 %v1838_v44  ;;  %v1864_v44 = vld [vmem:[%s2387_s1 + $0x200] sm:$0xff] }
  0x27   :  { %1140 = vmatpush.bf16.msrb.mxu1 %v1846_v45  ;;  %v1872_v45 = vld [vmem:[%s2387_s1 + $0x240] sm:$0xff] }
  0x28   :  { %1153 = vmatpush.bf16.msrb.mxu2 %v1854_v46  ;;  %v1880_v46 = vld [vmem:[%s2387_s1 + $0x280] sm:$0xff] }
  0x29   :  { %1166 = vmatpush.bf16.msrb.mxu3 %v1862_v47  ;;  %v1888_v47 = vld [vmem:[%s2387_s1 + $0x2c0] sm:$0xff] }
  0x2a   :  { %1128 = vmatpush.bf16.msrb.mxu0 %v1837_v48  ;;  %v1903_v48 = vld [vmem:[%s2387_s1 + $0x338] sm:$0xff] }
  0x2b   :  { %1141 = vmatpush.bf16.msrb.mxu1 %v1845_v49  ;;  %v22_v49 = vld [vmem:[%s2389_s0 + $0x40] sm:$0xff] }
  0x2c   :  { %1154 = vmatpush.bf16.msrb.mxu2 %v1853_v50  ;;  %v24_v50 = vld [vmem:[%s2389_s0 + $0x50] sm:$0xff] }
  0x2d   :  { %1167 = vmatpush.bf16.msrb.mxu3 %v1861_v51  ;;  %v1911_v51 = vld [vmem:[%s2387_s1 + $0x378] sm:$0xff] }
  0x2e   :  { %1129 = vmatpush.bf16.msrb.mxu0 %v1836_v52  ;;  %v23_v52 = vld [vmem:[%s2389_s0 + $0x48] sm:$0xff] }
  0x2f   :  { %1142 = vmatpush.bf16.msrb.mxu1 %v1844_v53  ;;  %v25_v53 = vld [vmem:[%s2389_s0 + $0x58] sm:$0xff] }
  0x30   :  { %1155 = vmatpush.bf16.msrb.mxu2 %v1852_v54  ;;  %v1919_v54 = vld [vmem:[%s2387_s1 + $0x3b8] sm:$0xff] }
  0x31   :  { %1168 = vmatpush.bf16.msrb.mxu3 %v1860_v55  ;;  %v1927_v55 = vld [vmem:[%s2387_s1 + $0x3f8] sm:$0xff] }
  0x32   :  { %1130 = vmatpush.bf16.msrb.mxu0 %v1835_v56  ;;  %v38_v56 = vpack.c.bf16 %v22_v49, %v22_v49 }
  0x33   :  { %1143 = vmatpush.bf16.msrb.mxu1 %v1843_v57  ;;  %v40_v57 = vpack.c.bf16 %v24_v50, %v24_v50 }
  0x34   :  { %1156 = vmatpush.bf16.msrb.mxu2 %v1851_v58  ;;  %v39_v58 = vpack.c.bf16 %v23_v52, %v23_v52 }
  0x35   :  { %1169 = vmatpush.bf16.msrb.mxu3 %v1859_v59  ;;  %v41_v59 = vpack.c.bf16 %v25_v53, %v25_v53 }
  0x36   :  { %1131 = vmatpush.bf16.msrb.mxu0 %v1834_v60  ;;  %v1902_v60 = vld [vmem:[%s2387_s1 + $0x330] sm:$0xff] }
  0x37   :  { %1144 = vmatpush.bf16.msrb.mxu1 %v1842_v61  ;;  %v1910_v61 = vld [vmem:[%s2387_s1 + $0x370] sm:$0xff] }
  0x38   :  { %1157 = vmatpush.bf16.msrb.mxu2 %v1850_v62  ;;  %v1918_v62 = vld [vmem:[%s2387_s1 + $0x3b0] sm:$0xff] }
  0x39   :  { %1170 = vmatpush.bf16.msrb.mxu3 %v1858_v63  ;;  %v1926_v63 = vld [vmem:[%s2387_s1 + $0x3f0] sm:$0xff] }
  0x3a   :  { %1132 = vmatpush.bf16.msrb.mxu0 %v1833_v0  ;;  %v1901_v0 = vld [vmem:[%s2387_s1 + $0x328] sm:$0xff] }
  0x3b   :  { %1145 = vmatpush.bf16.msrb.mxu1 %v1841_v1  ;;  %v1909_v1 = vld [vmem:[%s2387_s1 + $0x368] sm:$0xff] }
  0x3c   :  { %1158 = vmatpush.bf16.msrb.mxu2 %v1849_v2  ;;  %v1917_v2 = vld [vmem:[%s2387_s1 + $0x3a8] sm:$0xff] }
  0x3d   :  { %1171 = vmatpush.bf16.msrb.mxu3 %v1857_v3  ;;  %v1925_v3 = vld [vmem:[%s2387_s1 + $0x3e8] sm:$0xff] }
  0x3e   :  { %1133 = vmatpush.bf16.msrb.mxu0 %v1832_v4  ;;  %v1900_v4 = vld [vmem:[%s2387_s1 + $0x320] sm:$0xff] }
  0x3f   :  { %1146 = vmatpush.bf16.msrb.mxu1 %v1840_v5  ;;  %v1908_v5 = vld [vmem:[%s2387_s1 + $0x360] sm:$0xff] }
  0x40   :  { %1159 = vmatpush.bf16.msrb.mxu2 %v1848_v6  ;;  %v1916_v6 = vld [vmem:[%s2387_s1 + $0x3a0] sm:$0xff] }
  0x41   :  { %1172 = vmatpush.bf16.msrb.mxu3 %v1856_v7  ;;  %1134 = vmatmul.bf16.vlgmr.msrb.gmra.mxu0 %v34_v17  ;;  %v1924_v7 = vld [vmem:[%s2387_s1 + $0x3e0] sm:$0xff]  ;;  %v1905_v17 = vld [vmem:[%s2387_s1 + $0x348] sm:$0xff] }
  0x42   :  { %1178 = vmatpush.bf16.msra.mxu0 %v1871_v8  ;;  %1147 = vmatmul.bf16.vlgmr.msrb.gmra.mxu1 %v35_v19  ;;  %v1899_v8 = vld [vmem:[%s2387_s1 + $0x318] sm:$0xff]  ;;  %v1921_v19 = vld [vmem:[%s2387_s1 + $0x3c8] sm:$0xff] }
  0x43   :  { %1191 = vmatpush.bf16.msra.mxu1 %v1879_v11  ;;  %1160 = vmatmul.bf16.vlgmr.msrb.gmra.mxu2 %v36_v16  ;;  %v1923_v11 = vld [vmem:[%s2387_s1 + $0x3d8] sm:$0xff]  ;;  %v1897_v16 = vld [vmem:[%s2387_s1 + $0x308] sm:$0xff] }
  0x44   :  { %1204 = vmatpush.bf16.msra.mxu2 %v1887_v14  ;;  %1173 = vmatmul.bf16.vlgmr.msrb.gmra.mxu3 %v37_v18  ;;  %v1914_v14 = vld [vmem:[%s2387_s1 + $0x390] sm:$0xff]  ;;  %v1913_v18 = vld [vmem:[%s2387_s1 + $0x388] sm:$0xff] }
  0x45   :  { %1217 = vmatpush.bf16.msra.mxu3 %v1895_v15  ;;  %v1922_v15 = vld [vmem:[%s2387_s1 + $0x3d0] sm:$0xff] }
  0x46   :  { %1179 = vmatpush.bf16.msra.mxu0 %v1870_v20  ;;  %v1896_v20 = vld [vmem:[%s2387_s1 + $0x300] sm:$0xff] }
  0x47   :  { %1192 = vmatpush.bf16.msra.mxu1 %v1878_v21  ;;  %v1904_v21 = vld [vmem:[%s2387_s1 + $0x340] sm:$0xff] }
  0x48   :  { %1205 = vmatpush.bf16.msra.mxu2 %v1886_v22  ;;  %v1912_v22 = vld [vmem:[%s2387_s1 + $0x380] sm:$0xff] }
  0x49   :  { %1218 = vmatpush.bf16.msra.mxu3 %v1894_v23  ;;  %v26_v23 = vld [vmem:[%s2389_s0 + $0x60] sm:$0xff] }
  0x4a   :  { %1180 = vmatpush.bf16.msra.mxu0 %v1869_v24  ;;  %v27_v24 = vld [vmem:[%s2389_s0 + $0x68] sm:$0xff] }
  0x4b   :  { %1193 = vmatpush.bf16.msra.mxu1 %v1877_v25  ;;  %v1920_v25 = vld [vmem:[%s2387_s1 + $0x3c0] sm:$0xff] }
  0x4c   :  { %1206 = vmatpush.bf16.msra.mxu2 %v1885_v26  ;;  %v28_v26 = vld [vmem:[%s2389_s0 + $0x70] sm:$0xff] }
  0x4d   :  { %1219 = vmatpush.bf16.msra.mxu3 %v1893_v27  ;;  %v29_v27 = vld [vmem:[%s2389_s0 + $0x78] sm:$0xff] }
  0x4e   :  { %1181 = vmatpush.bf16.msra.mxu0 %v1868_v28  ;;  %v42_v28 = vpack.c.bf16 %v26_v23, %v26_v23 }
  0x4f   :  { %1194 = vmatpush.bf16.msra.mxu1 %v1876_v29  ;;  %v43_v29 = vpack.c.bf16 %v27_v24, %v27_v24 }
  0x50   :  { %1207 = vmatpush.bf16.msra.mxu2 %v1884_v30  ;;  %v44_v30 = vpack.c.bf16 %v28_v26, %v28_v26 }
  0x51   :  { %1220 = vmatpush.bf16.msra.mxu3 %v1892_v31  ;;  %v45_v31 = vpack.c.bf16 %v29_v27, %v29_v27 }
  0x52   :  { %1182 = vmatpush.bf16.msra.mxu0 %v1867_v32  ;;  %v1928_v32 = vld [vmem:[%s2388_s2] ss:$0 sm:$0xff] }
  0x53   :  { %1195 = vmatpush.bf16.msra.mxu1 %v1875_v33 }
  0x54   :  { %1208 = vmatpush.bf16.msra.mxu2 %v1883_v34 }
  0x55   :  { %1221 = vmatpush.bf16.msra.mxu3 %v1891_v35 }
  0x56   :  { %1183 = vmatpush.bf16.msra.mxu0 %v1866_v36 }
  0x57   :  { %1196 = vmatpush.bf16.msra.mxu1 %v1874_v37 }
  0x58   :  { %1209 = vmatpush.bf16.msra.mxu2 %v1882_v38 }
  0x59   :  { %1222 = vmatpush.bf16.msra.mxu3 %v1890_v39 }
  0x5a   :  { %1184 = vmatpush.bf16.msra.mxu0 %v1865_v40 }
  0x5b   :  { %1197 = vmatpush.bf16.msra.mxu1 %v1873_v41 }
  0x5c   :  { %1210 = vmatpush.bf16.msra.mxu2 %v1881_v42 }
  0x5d   :  { %1223 = vmatpush.bf16.msra.mxu3 %v1889_v43 }
  0x5e   :  { %1185 = vmatpush.bf16.msra.mxu0 %v1864_v44 }
  0x5f   :  { %1198 = vmatpush.bf16.msra.mxu1 %v1872_v45 }
  0x60   :  { %1211 = vmatpush.bf16.msra.mxu2 %v1880_v46 }
  0x61   :  { %1224 = vmatpush.bf16.msra.mxu3 %v1888_v47  ;;  %1186 = vmatmul.bf16.vlgmr.msra.gmra.mxu0 %v38_v56 }
  0x62   :  { %1230 = vmatpush.bf16.msrb.mxu0 %v1903_v48  ;;  %1199 = vmatmul.bf16.vlgmr.msra.gmra.mxu1 %v39_v58 }
  0x63   :  { %1243 = vmatpush.bf16.msrb.mxu1 %v1911_v51  ;;  %1212 = vmatmul.bf16.vlgmr.msra.gmra.mxu2 %v40_v57 }
  0x64   :  { %1256 = vmatpush.bf16.msrb.mxu2 %v1919_v54  ;;  %1225 = vmatmul.bf16.vlgmr.msra.gmra.mxu3 %v41_v59 }
  0x65   :  { %1269 = vmatpush.bf16.msrb.mxu3 %v1927_v55 }
  0x66   :  { %1231 = vmatpush.bf16.msrb.mxu0 %v1902_v60 }
  0x67   :  { %1244 = vmatpush.bf16.msrb.mxu1 %v1910_v61 }
  0x68   :  { %1257 = vmatpush.bf16.msrb.mxu2 %v1918_v62 }
  0x69   :  { %1270 = vmatpush.bf16.msrb.mxu3 %v1926_v63 }
  0x6a   :  { %1232 = vmatpush.bf16.msrb.mxu0 %v1901_v0 }
  0x6b   :  { %1245 = vmatpush.bf16.msrb.mxu1 %v1909_v1 }
  0x6c   :  { %1258 = vmatpush.bf16.msrb.mxu2 %v1917_v2 }
  0x6d   :  { %1271 = vmatpush.bf16.msrb.mxu3 %v1925_v3 }
  0x6e   :  { %1233 = vmatpush.bf16.msrb.mxu0 %v1900_v4 }
  0x6f   :  { %1246 = vmatpush.bf16.msrb.mxu1 %v1908_v5 }
  0x70   :  { %1259 = vmatpush.bf16.msrb.mxu2 %v1916_v6 }
  0x71   :  { %1272 = vmatpush.bf16.msrb.mxu3 %v1924_v7 }
  0x72   :  { %1234 = vmatpush.bf16.msrb.mxu0 %v1899_v8 }
  0x73   :  { %1247 = vmatpush.bf16.msrb.mxu1 %v1907_v9 }
  0x74   :  { %1260 = vmatpush.bf16.msrb.mxu2 %v1915_v10 }
  0x75   :  { %1273 = vmatpush.bf16.msrb.mxu3 %v1923_v11 }
  0x76   :  { %1235 = vmatpush.bf16.msrb.mxu0 %v1898_v12 }
  0x77   :  { %1248 = vmatpush.bf16.msrb.mxu1 %v1906_v13 }
  0x78   :  { %1261 = vmatpush.bf16.msrb.mxu2 %v1914_v14 }
  0x79   :  { %1274 = vmatpush.bf16.msrb.mxu3 %v1922_v15 }
  0x7a   :  { %1236 = vmatpush.bf16.msrb.mxu0 %v1897_v16 }
  0x7b   :  { %1249 = vmatpush.bf16.msrb.mxu1 %v1905_v17 }
  0x7c   :  { %1262 = vmatpush.bf16.msrb.mxu2 %v1913_v18 }
  0x7d   :  { %1275 = vmatpush.bf16.msrb.mxu3 %v1921_v19 }
  0x7e   :  { %1237 = vmatpush.bf16.msrb.mxu0 %v1896_v20 }
  0x7f   :  { %1250 = vmatpush.bf16.msrb.mxu1 %v1904_v21 }
  0x80   :  { %1263 = vmatpush.bf16.msrb.mxu2 %v1912_v22 }
  0x81   :  { %1276 = vmatpush.bf16.msrb.mxu3 %v1920_v25  ;;  %1238 = vmatmul.bf16.vlgmr.msrb.gmra.mxu0 %v42_v28 }
  0x82   :  { %1251 = vmatmul.bf16.vlgmr.msrb.gmra.mxu1 %v43_v29 }
  0x83   :  { %1264 = vmatmul.bf16.vlgmr.msrb.gmra.mxu2 %v44_v30 }
  0x84   :  { %1277 = vmatmul.bf16.vlgmr.msrb.gmra.mxu3 %v45_v31 }
  0x9e   :  { %v1083_v33 = vpop.f32.mrf.mxu0 }
  0x9f   :  { %v1084_v34 = vadd.f32 %v1928_v32, %v1083_v33  ;;  %v1096_v35 = vpop.f32.mrf.mxu1 }
  0xa1   :  { %v1097_v36 = vadd.f32 %v1096_v35, %v1084_v34 }
  0xa6   :  { %v1109_v37 = vpop.f32.mrf.mxu2  ;;  %v1085_v40 = vpop.f32.mrf.mxu0 }
  0xa7   :  { %v1110_v38 = vadd.f32 %v1109_v37, %v1097_v36  ;;  %v1122_v39 = vpop.f32.mrf.mxu3  ;;  %v1098_v42 = vpop.f32.mrf.mxu1 }
  0xa9   :  { %v1123_v41 = vadd.f32 %v1122_v39, %v1110_v38 }
  0xae   :  { %v1111_v43 = vpop.f32.mrf.mxu2 }
  0xaf   :  { %v1124_v44 = vpop.f32.mrf.mxu3 }
  0xbe   :  { %v1135_v45 = vpop.f32.mrf.mxu0 }
  0xbf   :  { %v1148_v46 = vpop.f32.mrf.mxu1  ;;  %v1136_v55 = vadd.f32 %v1135_v45, %v1123_v41 }
  0xc1   :  { %v1149_v59 = vadd.f32 %v1148_v46, %v1136_v55 }
  0xc6   :  { %v1161_v47 = vpop.f32.mrf.mxu2  ;;  %v1137_v49 = vpop.f32.mrf.mxu0 }
  0xc7   :  { %v1174_v48 = vpop.f32.mrf.mxu3  ;;  %v1150_v50 = vpop.f32.mrf.mxu1  ;;  %v1162_v61 = vadd.f32 %v1161_v47, %v1149_v59 }
  0xc9   :  { %v1175_v0 = vadd.f32 %v1174_v48, %v1162_v61 }
  0xce   :  { %v1163_v51 = vpop.f32.mrf.mxu2 }
  0xcf   :  { %v1176_v52 = vpop.f32.mrf.mxu3 }
  0xde   :  { %v1187_v53 = vpop.f32.mrf.mxu0 }
  0xdf   :  { %v1200_v54 = vpop.f32.mrf.mxu1  ;;  %v1188_v1 = vadd.f32 %v1187_v53, %v1175_v0 }
  0xe1   :  { %v1201_v2 = vadd.f32 %v1200_v54, %v1188_v1 }
  0xe6   :  { %v1213_v56 = vpop.f32.mrf.mxu2  ;;  %v1189_v58 = vpop.f32.mrf.mxu0 }
  0xe7   :  { %v1226_v57 = vpop.f32.mrf.mxu3  ;;  %v1202_v60 = vpop.f32.mrf.mxu1  ;;  %v1214_v3 = vadd.f32 %v1213_v56, %v1201_v2 }
  0xe9   :  { %v1227_v4 = vadd.f32 %v1226_v57, %v1214_v3 }
  0xee   :  { %v1215_v62 = vpop.f32.mrf.mxu2 }
  0xef   :  { %v1228_v63 = vpop.f32.mrf.mxu3 }
  0xfe   :  { %v1239_v5 = vpop.f32.mrf.mxu0 }
  0xff   :  { %v1252_v6 = vpop.f32.mrf.mxu1  ;;  %v1240_v7 = vadd.f32 %v1239_v5, %v1227_v4 }
 0x101   :  { %v1253_v8 = vadd.f32 %v1252_v6, %v1240_v7 }
 0x106   :  { %v1265_v9 = vpop.f32.mrf.mxu2  ;;  %v1241_v12 = vpop.f32.mrf.mxu0 }
 0x107   :  { %v1278_v10 = vpop.f32.mrf.mxu3  ;;  %v1266_v11 = vadd.f32 %v1265_v9, %v1253_v8  ;;  %v1254_v13 = vpop.f32.mrf.mxu1 }
 0x109   :  { %v1279_v14 = vadd.f32 %v1278_v10, %v1266_v11 }
 0x10b   :  { %v1282_v15 = vmax.f32 %v1279_v14, 0.0 }
 0x10d   :  { %1283 = vst [vmem:[%s2390_s3] sm:$0xff] %v1282_v15 }
 0x10e   :  { %v1267_v16 = vpop.f32.mrf.mxu2 }
 0x10f   :  { %v1280_v17 = vpop.f32.mrf.mxu3 }

// kernel: sanet_forward.13
= control target key start
LH: loop header
LB: loop body
LE: loop exit
PB: predicated region body
PF: predicated region fallthrough
CT: control target
= control target key end

     0   :  { %s2172_s0 = inlined_call_operand.vmem [shape: f32[2,2,2,128], index: 0, kind: input, shape index: {}]   ;;  %s2173_s1 = inlined_call_operand.vmem [shape: f32[2,4,4,128], index: 1, kind: input, shape index: {}]   ;;  %s2174_s2 = inlined_call_operand.vmem [shape: f32[2,8,8,128], index: 2, kind: input, shape index: {}]   ;;  %s2175_s3 = inlined_call_operand.vmem [shape: f32[8,2], index: 3, kind: input, shape index: {}, may-alias: {3,4}]   ;;  %s2176_s4 = inlined_call_operand.vmem [shape: f32[8,2], index: 4, kind: input, shape index: {}, may-alias: {3,4}]   ;;  %s2177_s5 = inlined_call_operand.vmem [shape: f32[8,4], index: 5, kind: input, shape index: {}, may-alias: {5,6}]   ;;  %s2178_s6 = inlined_call_operand.vmem [shape: f32[8,4], index: 6, kind: input, shape index: {}, may-alias: {5,6}]   ;;  %s2179_s7 = inlined_call_operand.vmem [shape: f32[3,128], index: 7, kind: input, shape index: {}]   ;;  %s2180_s8 = inlined_call_operand.<no memory space> [shape: f32[1], index: 8, kind: input, shape index: {}]   ;;  %s2181_s9 = inlined_call_operand.hbm [shape: f32[2,8,8], index: 9, kind: output, shape index: {0}]   ;;  %s2182_s10 = inlined_call_operand.vmem [shape: f32[2,8,8,128], index: 10, kind: output, shape index: {1}]   ;;  %s2183_s11 = inlined_call_operand.vmem [shape: f32[2,8,8,128], index: 11, kind: output, shape index: {2}]  }
   0x1   :  { %2184 = sst [smem:[#allocation6_spill]] %s2172_s0 }
   0x2   :  { %17 = sst [smem:[#allocation2]] %s2180_s8 }
   0x3   :  { %18 = vsyncpa [#allocation4], 0 }
   0x4   :  { %20 = vsyncpa [#allocation4 + $0x1], 0  ;;  %s1855_s19 = smov 0   ;;  %s1857_s20 = smov 0  }
   0x5   :  { %s1859_s21 = smov 0   ;;  %s1861_s22 = smov 0  }
   0x6   :  { %s1863_s23 = smov 0   ;;  %s1865_s24 = smov 0  }
   0x7 LB: > { %s1578_s8 = sadd.s32 4294967295, %s1788_s24   ;;  %s1579_s25 = sadd.s32 4294967294, %s1788_s24   ;;  %s1788_s24 = sphi %s1865_s24, %s26_s24   ;;  %s1784_s23 = sphi %s1863_s23, %s2192_s23   ;;  %s1780_s22 = sphi %s1861_s22, %s2191_s22   ;;  %s1776_s21 = sphi %s1859_s21, %s2190_s21   ;;  %s1772_s20 = sphi %s1857_s20, %s2189_s20   ;;  %s1768_s19 = sphi %s1855_s19, %s2188_s19  }
   0x8   : > { %s38_s26 = sadd.s32 1, %s1784_s23  ;;  %s263_s27 = sadd.s32 1, %s1776_s21 }
   0x9   : > { %p40_p0 = scmp.ge.s32.totalorder %s38_s26, 2  ;;  %p273_p1 = scmp.ne.s32.totalorder %s1776_s21, %s1772_s20 }
   0xa   : > { %p274_p2 = scmp.eq.s32.totalorder %s1578_s8, 1  ;;  %p279_p3 = scmp.ne.s32.totalorder %s1772_s20, %s1768_s19 }
   0xb   : > { %s2194_s26 = smov (%p40_p0, %s38_s26), 0  ;;  %p280_p5 = scmp.eq.s32.totalorder %s1579_s25, 1 }
   0xc   : > { %p1895_p4 = por %p274_p2, %p273_p1  ;;  %s258_s29 = ssub.s32 %s1784_s23, %s2194_s26 }
   0xd   : > { %p1584_p6 = scmp.ge.s32.totalorder %s1788_s24, 1  ;;  %p261_p7 = scmp.eq.s32.totalorder %s258_s29, 0 }
   0xe   : > { %p1902_p8 = por %p280_p5, %p279_p3  ;;  %p409_p9 = scmp.lt.s32.totalorder %s1788_s24, 3 }
   0xf   : > { %s1908_s12 = scalar_select %p261_p7, %s1776_s21, %s263_s27  }
  0x10   : > { %p410_p10 = pnand %p1584_p6, %p409_p9 }
  0x11   : > { %p489_p11 = scmp.lt.s32.totalorder (!%p410_p10), %s1780_s22, 1  ;;  %s2187_s0 = sld [smem:[#allocation6_spill]] (!%p410_p10) }
  0x12   : > { %413 = sbr.rel (%p410_p10) target bundleno = 606 (0x25e), region = 56  ;;  %s1730_s18 = scalar_lea.hbm (!%p410_p10), %s2181_s9, 16 }
  0x17   : > { %s1912_s13 = scalar_select %p489_p11, %s1780_s22, 1  ;;  %vm547_vm0 = vcmask 1041408   ;;  %v537_v0 = vld [vmem:[%s2175_s3] sm:$0xff]  ;;  %vm543_vm1 = vcmask 15360   ;;  %v1790_v3 = vmov 1983009808  }
  0x18   : > { %v598_v4 = vunpack.c.l.s4 %v1790_v3  ;;  %v1791_v6 = vmov 1934713408   ;;  %vm595_vm2 = vcmask 1047556   ;;  %v647_v27 = vld [vmem:[%s2176_s4] sm:$0xff]  ;;  %vm851_vm3 = vcmask 1043456  }
  0x19   : > { %s1648_s14 = sshll.u32 %s1912_s13, 2  ;;  %v620_v7 = vunpack.c.l.s4 %v1791_v6  ;;  %s1649_s25 = sshll.u32 %s1912_s13, 4  ;;  %v835_v44 = vld [vmem:[%s2177_s5] sm:$0xff]  ;;  %vm847_vm4 = vcmask 31744   ;;  %vm1316_vm5 = vcmask 1041409   ;;  %vm1318_vm6 = vcmask 1042434  }
  0x1a   : > { %s493_s17 = scalar_lea.vmem %s2187_s0, %s1648_s14  ;;  %v1925_v5 = vunpack.c.0.s8 %v598_v4  ;;  %s498_s16 = scalar_lea.vmem %s2173_s1, %s1649_s25  ;;  %vm1320_vm7 = vcmask 1043459   ;;  %vm1322_vm8 = vcmask 1044484   ;;  %vm1324_vm9 = vcmask 1045509  }
  0x1b   : > { %v538_v1 = vld [vmem:[%s493_s17] ss:$2 sm:$0x3]  ;;  %v1596_v2 = vld [vmem:[%s493_s17 + $0x1] ss:$2 sm:$0x3]  ;;  %v1929_v14 = vunpack.c.0.s8 %v620_v7 }
  0x1c   : > { %1597 = vmatpush.msk.msra.mxu0 %vm547_vm0, %v538_v1  ;;  %1599 = vmatpush.msk.msra.mxu1 %vm547_vm0, %v1596_v2  ;;  %v836_v38 = vld [vmem:[%s498_s16] ss:$4 sm:$0xf]  ;;  %v1617_v39 = vld [vmem:[%s498_s16 + $0x1] ss:$4 sm:$0xf] }
  0x1d   : > { %1598 = vmatmul.msk.f32.vlgmr.msra.gmra.mxu0 %vm543_vm1, %v537_v0  ;;  %1600 = vmatmul.msk.f32.vlgmr.msra.gmra.mxu1 %vm543_vm1, %v537_v0  ;;  %v1618_v40 = vld [vmem:[%s498_s16 + $0x2] ss:$4 sm:$0xf]  ;;  %v1619_v43 = vld [vmem:[%s498_s16 + $0x3] ss:$4 sm:$0xf] }
  0x1e   : > { %s1982_s8 = sshll.u32 %s1912_s13, 6  ;;  %s464_s14 = sand.u32 1, %s1772_s20   ;;  %vm1326_vm10 = vcmask 1046534   ;;  %vm1328_vm11 = vcmask 1047559   ;;  %vm1331_vm12 = vcmask 64512  }
  0x1f   : > { %s525_s29 = scalar_lea.vmem %s2182_s10, %s1982_s8  ;;  %s2055_s17 = scalar_lea.vmem %s2174_s2, %s1982_s8 }
  0x20   : > { %s2066_s13 = scalar_lea.vmem %s2183_s11, %s1982_s8  ;;  %s1288_s8 = sld [smem:[#allocation2]] }
  0x21   : > { %s2131_s15 = sshll.u32 %s464_s14, 3  ;;  %s1645_s16 = sshll.u32 %s1780_s22, 3 }
  0x22   : > { %s1363_s25 = scalar_lea.hbm %s2181_s9, %s1645_s16  ;;  %s466_s22 = scalar_lea.vmem [#allocation3], %s2131_s15 }
  0x23   : > { %s1365_s27 = sshll.u32 %s466_s22, 4  ;;  %s1366_s27 = int_to_ptr.vmem [resolvable:$true] %s1365_s27 }
  0x9a   : > { %v571_v8 = vpop.f32.mrf.mxu0  ;;  %v591_v9 = vpop.f32.mrf.mxu1 }
  0x9b   : > { %v594_v10 = vrot.slane %v571_v8, 4  ;;  %v600_v11 = vperm.slane %v571_v8, %v1925_v5  ;;  %v605_v12 = vrot.slane %v591_v9, 4  ;;  %v610_v13 = vperm.slane %v591_v9, %v1925_v5 }
  0x9d   : > { %v596_v15 = vsel %vm595_vm2, 0.0, %v594_v10  ;;  %v617_v16 = vrot.slane %v600_v11, 4  ;;  %v606_v17 = vsel %vm595_vm2, 0.0, %v605_v12  ;;  %v615_v18 = vrot.slane %v610_v13, 4 }
  0x9e   : > { %v604_v19 = vperm.slane %v596_v15, %v1925_v5  ;;  %v614_v20 = vperm.slane %v606_v17, %v1925_v5 }
  0x9f   : > { %v616_v21 = vsel %vm595_vm2, %v615_v18, %v600_v11  ;;  %v618_v22 = vsel %vm595_vm2, %v610_v13, %v617_v16  ;;  %v1000_v11 = vld [vmem:[%s2178_s6] sm:$0xff] }
  0xa0   : > { %v629_v23 = vrot.slane %v604_v19, 4  ;;  %v627_v24 = vrot.slane %v614_v20, 4  ;;  %v622_v25 = vperm.slane %v616_v21, %v1929_v14  ;;  %v626_v26 = vperm.slane %v618_v22, %v1929_v14 }
  0xa2   : > { %v630_v28 = vsel %vm595_vm2, %v614_v20, %v629_v23  ;;  %1601 = vmatpush.msk.msra.mxu2 %vm547_vm0, %v622_v25  ;;  %1605 = vmatpush.msk.msrb.mxu0 %vm547_vm0, %v626_v26  ;;  %v639_v29 = vrot.slane %v622_v25, 4  ;;  %v641_v30 = vrot.slane %v626_v26, 4  ;;  %v628_v31 = vsel %vm595_vm2, %v627_v24, %v604_v19  ;;  %v1228_v26 = vld [vmem:[%s2179_s7] sm:$0x7] }
  0xa3   : > { %v638_v32 = vperm.slane %v630_v28, %v1929_v14  ;;  %1602 = vmatmul.msk.f32.vlgmr.msra.gmra.mxu2 %vm543_vm1, %v647_v27  ;;  %v634_v33 = vperm.slane %v628_v31, %v1929_v14  ;;  %1606 = vmatmul.msk.f32.vlgmr.msrb.gmra.mxu0 %vm543_vm1, %v647_v27 }
  0xa4   : > { %v640_v34 = vsel %vm595_vm2, 0.0, %v639_v29  ;;  %v642_v35 = vsel %vm595_vm2, 0.0, %v641_v30  ;;  %v1190_v29 = vld [vmem:[%s2055_s17 + $0x10] sm:$0xff]  ;;  %v2069_v30 = vperm.slane %v1228_v26, 0 }
  0xa5   : > { %1603 = vmatpush.msk.msra.mxu3 %vm547_vm0, %v640_v34  ;;  %1607 = vmatpush.msk.msrb.mxu1 %vm547_vm0, %v642_v35  ;;  %v643_v36 = vrot.slane %v634_v33, 4  ;;  %v645_v37 = vrot.slane %v638_v32, 4 }
  0xa6   : > { %1609 = vmatpush.msk.msrb.mxu2 %vm547_vm0, %v634_v33  ;;  %1613 = vmatpush.msk.msra.mxu0 %vm547_vm0, %v638_v32  ;;  %v2073_v32 = vperm.slane %v1228_v26, 2 }
  0xa7   : > { %1604 = vmatmul.msk.f32.vlgmr.msra.gmra.mxu3 %vm543_vm1, %v647_v27  ;;  %v644_v41 = vsel %vm595_vm2, 0.0, %v643_v36  ;;  %v646_v42 = vsel %vm595_vm2, 0.0, %v645_v37  ;;  %1608 = vmatmul.msk.f32.vlgmr.msrb.gmra.mxu1 %vm543_vm1, %v647_v27  ;;  %v1191_v37 = vld [vmem:[%s2055_s17 + $0x18] sm:$0xff] }
  0xa8   : > { %1611 = vmatpush.msk.msrb.mxu3 %vm547_vm0, %v644_v41  ;;  %1615 = vmatpush.msk.msra.mxu1 %vm547_vm0, %v646_v42 }
  0xa9   : > { %1620 = vmatpush.msk.msra.mxu2 %vm851_vm3, %v836_v38  ;;  %1624 = vmatpush.msk.msrb.mxu0 %vm851_vm3, %v1618_v40 }
  0xaa   : > { %1622 = vmatpush.msk.msra.mxu3 %vm851_vm3, %v1617_v39  ;;  %1626 = vmatpush.msk.msrb.mxu1 %vm851_vm3, %v1619_v43 }
  0xab   : > { %1610 = vmatmul.msk.f32.vlgmr.msrb.gmra.mxu2 %vm543_vm1, %v647_v27  ;;  %1614 = vmatmul.msk.f32.vlgmr.msra.gmra.mxu0 %vm543_vm1, %v647_v27 }
  0xaf   : > { %1612 = vmatmul.msk.f32.vlgmr.msrb.gmra.mxu3 %vm543_vm1, %v647_v27  ;;  %1616 = vmatmul.msk.f32.vlgmr.msra.gmra.mxu1 %vm543_vm1, %v647_v27  ;;  %v2060_v27 = vperm.slane %v1228_v26, 1 }
  0xb3   : > { %1621 = vmatmul.msk.f32.vlgmr.msra.gmra.mxu2 %vm847_vm4, %v835_v44  ;;  %1625 = vmatmul.msk.f32.vlgmr.msrb.gmra.mxu0 %vm847_vm4, %v835_v44 }
  0xb7   : > { %1623 = vmatmul.msk.f32.vlgmr.msra.gmra.mxu3 %vm847_vm4, %v835_v44  ;;  %1627 = vmatmul.msk.f32.vlgmr.msrb.gmra.mxu1 %vm847_vm4, %v835_v44 }
 0x120   : > { %v1988_v45 = vpop.f32.mrf.mxu0 }
 0x121   : > { %1214 = vst [vmem:[%s525_s29 + $0x10] sm:$0xff] %v1988_v45  ;;  %v1232_v33 = vmul.f32 %v2069_v30, %v1988_v45 }
 0x124   : > { %v1991_v46 = vpop.f32.mrf.mxu1 }
 0x125   : > { %1215 = vst [vmem:[%s525_s29 + $0x18] sm:$0xff] %v1991_v46 }
 0x126   : > { %v1994_v47 = vpop.f32.mrf.mxu2 }
 0x127   : > { %1212 = vst [vmem:[%s525_s29] sm:$0xff] %v1994_v47 }
 0x128   : > { %v1997_v48 = vpop.f32.mrf.mxu0 }
 0x129   : > { %1218 = vst [vmem:[%s525_s29 + $0x30] sm:$0xff] %v1997_v48 }
 0x12a   : > { %v2000_v49 = vpop.f32.mrf.mxu3 }
 0x12b   : > { %1213 = vst [vmem:[%s525_s29 + $0x8] sm:$0xff] %v2000_v49 }
 0x12c   : > { %v2003_v50 = vpop.f32.mrf.mxu1 }
 0x12d   : > { %1219 = vst [vmem:[%s525_s29 + $0x38] sm:$0xff] %v2003_v50 }
 0x12e   : > { %v2006_v51 = vpop.f32.mrf.mxu2 }
 0x12f   : > { %1216 = vst [vmem:[%s525_s29 + $0x20] sm:$0xff] %v2006_v51 }
 0x130   : > { %v921_v52 = vpop.f32.mrf.mxu0 }
 0x131   : > { %v944_v54 = vrot.slane %v921_v52, 4 }
 0x132   : > { %v2009_v53 = vpop.f32.mrf.mxu3 }
 0x133   : > { %1217 = vst [vmem:[%s525_s29 + $0x28] sm:$0xff] %v2009_v53  ;;  %s1367_s29 = sshll.u32 %s1363_s25, 4  ;;  %s1368_s29 = int_to_ptr.hbm [resolvable:$true] %s1367_s29 }
 0x134   : > { %v941_v55 = vpop.f32.mrf.mxu1 }
 0x135   : > { %v956_v59 = vrot.slane %v941_v55, 4 }
 0x136   : > { %v881_v56 = vpop.f32.mrf.mxu2 }
 0x137   : > { %v945_v57 = vsel %vm595_vm2, %v944_v54, %v881_v56  ;;  %v946_v58 = vrot.slane %v881_v56, 4  ;;  %v1230_v56 = vmul.f32 %v2069_v30, %v1994_v47 }
 0x138   : > { %v951_v60 = vperm.slane %v945_v57, %v1925_v5 }
 0x139   : > { %v947_v61 = vsel %vm595_vm2, %v921_v52, %v946_v58  ;;  %v1233_v52 = vmul.f32 %v2069_v30, %v1991_v46 }
 0x13a   : > { %v955_v62 = vperm.slane %v947_v61, %v1925_v5  ;;  %v970_v63 = vrot.slane %v951_v60, 4  ;;  %v901_v0 = vpop.f32.mrf.mxu3 }
 0x13b   : > { %v957_v1 = vsel %vm595_vm2, %v956_v59, %v901_v0  ;;  %v958_v2 = vrot.slane %v901_v0, 4 }
 0x13c   : > { %v982_v3 = vrot.slane %v955_v62, 4  ;;  %v963_v4 = vperm.slane %v957_v1, %v1925_v5  ;;  %v1189_v1 = vld [vmem:[%s2055_s17 + $0x8] sm:$0xff] }
 0x13d   : > { %v959_v6 = vsel %vm595_vm2, %v941_v55, %v958_v2 }
 0x13e   : > { %v967_v7 = vperm.slane %v959_v6, %v1925_v5  ;;  %v968_v8 = vrot.slane %v963_v4, 4  ;;  %v971_v9 = vsel %vm595_vm2, %v963_v4, %v970_v63  ;;  %v1195_v63 = vld [vmem:[%s2055_s17 + $0x38] sm:$0xff] }
 0x13f   : > { %v979_v10 = vperm.slane %v971_v9, %v1929_v14 }
 0x140   : > { %v969_v12 = vsel %vm595_vm2, %v968_v8, %v951_v60  ;;  %v980_v13 = vrot.slane %v967_v7, 4  ;;  %v983_v15 = vsel %vm595_vm2, %v967_v7, %v982_v3 }
 0x141   : > { %v975_v16 = vperm.slane %v969_v12, %v1929_v14  ;;  %1632 = vmatpush.msk.msra.mxu0 %vm851_vm3, %v979_v10  ;;  %v991_v5 = vperm.slane %v983_v15, %v1929_v14  ;;  %v994_v17 = vrot.slane %v979_v10, 4  ;;  %v1237_v12 = vmul.f32 %v2069_v30, %v2003_v50 }
 0x142   : > { %1633 = vmatmul.msk.f32.vlgmr.msra.gmra.mxu0 %vm847_vm4, %v1000_v11  ;;  %v981_v18 = vsel %vm595_vm2, %v980_v13, %v955_v62  ;;  %v1231_v15 = vmul.f32 %v2069_v30, %v2000_v49 }
 0x143   : > { %1628 = vmatpush.msk.msrb.mxu2 %vm851_vm3, %v975_v16  ;;  %1640 = vmatpush.msk.msrb.mxu0 %vm851_vm3, %v991_v5  ;;  %v995_v19 = vsel %vm595_vm2, 0.0, %v994_v17  ;;  %v987_v20 = vperm.slane %v981_v18, %v1929_v14  ;;  %v992_v21 = vrot.slane %v975_v16, 4  ;;  %v998_v22 = vrot.slane %v991_v5, 4 }
 0x144   : > { %1629 = vmatmul.msk.f32.vlgmr.msrb.gmra.mxu2 %vm847_vm4, %v1000_v11  ;;  %1634 = vmatpush.msk.msra.mxu1 %vm851_vm3, %v995_v19  ;;  %v1234_v16 = vmul.f32 %v2069_v30, %v2006_v51 }
 0x145   : > { %1635 = vmatmul.msk.f32.vlgmr.msra.gmra.mxu1 %vm847_vm4, %v1000_v11  ;;  %1636 = vmatpush.msk.msra.mxu2 %vm851_vm3, %v987_v20  ;;  %v993_v23 = vsel %vm595_vm2, 0.0, %v992_v21  ;;  %v999_v24 = vsel %vm595_vm2, 0.0, %v998_v22  ;;  %v996_v25 = vrot.slane %v987_v20, 4  ;;  %v1193_v21 = vld [vmem:[%s2055_s17 + $0x28] sm:$0xff] }
 0x146   : > { %1630 = vmatpush.msk.msrb.mxu3 %vm851_vm3, %v993_v23  ;;  %1642 = vmatpush.msk.msrb.mxu1 %vm851_vm3, %v999_v24 }
 0x147   : > { %1631 = vmatmul.msk.f32.vlgmr.msrb.gmra.mxu3 %vm847_vm4, %v1000_v11  ;;  %v997_v14 = vsel %vm595_vm2, 0.0, %v996_v25 }
 0x148   : > { %1638 = vmatpush.msk.msra.mxu3 %vm851_vm3, %v997_v14 }
 0x14a   : > { %1641 = vmatmul.msk.f32.vlgmr.msrb.gmra.mxu0 %vm847_vm4, %v1000_v11 }
 0x14c   : > { %1637 = vmatmul.msk.f32.vlgmr.msra.gmra.mxu2 %vm847_vm4, %v1000_v11 }
 0x14d   : > { %1643 = vmatmul.msk.f32.vlgmr.msrb.gmra.mxu1 %vm847_vm4, %v1000_v11 }
 0x14f   : > { %1639 = vmatmul.msk.f32.vlgmr.msra.gmra.mxu3 %vm847_vm4, %v1000_v11  ;;  %v1192_v11 = vld [vmem:[%s2055_s17 + $0x20] sm:$0xff] }
 0x1bf   : > { %v1070_v28 = vpop.f32.mrf.mxu0 }
 0x1c0   : > { %v1198_v31 = vmul.f32 %v1070_v28, %v1988_v45  ;;  %1222 = vst [vmem:[%s2066_s13 + $0x10] sm:$0xff] %v1070_v28  ;;  %v1188_v45 = vld [vmem:[%s2055_s17] sm:$0xff] }
 0x1c2   : > { %v1206_v34 = vmul.f32 %v1198_v31, %v1190_v29  ;;  %v1241_v35 = vmul.f32 %v2060_v27, %v1198_v31  ;;  %v1093_v36 = vpop.f32.mrf.mxu1 }
 0x1c3   : > { %v1199_v38 = vmul.f32 %v1093_v36, %v1991_v46  ;;  %1223 = vst [vmem:[%s2066_s13 + $0x18] sm:$0xff] %v1093_v36  ;;  %v1236_v36 = vmul.f32 %v2069_v30, %v1997_v48 }
 0x1c4   : > { %v1249_v39 = vadd.f32 %v1241_v35, %v1232_v33  ;;  %v1258_v40 = vmul.f32 %v2073_v32, %v1206_v34  ;;  %v1235_v35 = vmul.f32 %v2069_v30, %v2009_v53 }
 0x1c5   : > { %v1207_v41 = vmul.f32 %v1199_v38, %v1191_v37  ;;  %v1242_v42 = vmul.f32 %v2060_v27, %v1199_v38 }
 0x1c6   : > { %v1266_v43 = vadd.f32 %v1258_v40, %v1249_v39 }
 0x1c7   : > { %v1024_v44 = vpop.f32.mrf.mxu2  ;;  %v1162_v55 = vpop.f32.mrf.mxu0  ;;  %v1250_v61 = vadd.f32 %v1242_v42, %v1233_v52  ;;  %v1259_v62 = vmul.f32 %v2073_v32, %v1207_v41 }
 0x1c8   : > { %v1196_v54 = vmul.f32 %v1024_v44, %v1994_v47  ;;  %1220 = vst [vmem:[%s2066_s13] sm:$0xff] %v1024_v44  ;;  %1276 = vadd.xlane.f32.xlu1 %v1266_v43  ;;  %v1306_v44 = vlaneseq }
 0x1c9   : > { %1226 = vst [vmem:[%s2066_s13 + $0x30] sm:$0xff] %v1162_v55  ;;  %v1267_v6 = vadd.f32 %v1259_v62, %v1250_v61 }
 0x1ca   : > { %v1204_v57 = vmul.f32 %v1196_v54, %v1188_v45  ;;  %v1239_v58 = vmul.f32 %v2060_v27, %v1196_v54  ;;  %v1047_v59 = vpop.f32.mrf.mxu3  ;;  %v1185_v60 = vpop.f32.mrf.mxu1  ;;  %v1307_v52 = vand.u32 127, %v1306_v44 }
 0x1cb   : > { %v1197_v46 = vmul.f32 %v1047_v59, %v2000_v49  ;;  %1221 = vst [vmem:[%s2066_s13 + $0x8] sm:$0xff] %v1047_v59  ;;  %v1203_v0 = vmul.f32 %v1185_v60, %v2003_v50  ;;  %v1202_v50 = vmul.f32 %v1162_v55, %v1997_v48  ;;  %v1194_v49 = vld [vmem:[%s2055_s17 + $0x30] sm:$0xff]  ;;  %v1289_v48 = vstv %s1288_s8  ;;  %s1724_s8 = sshra.s32 %s1368_s29, 4  ;;  %s1725_s8 = int_to_ptr.hbm [resolvable:$true] %s1724_s8 }
 0x1cc   : > { %1227 = vst [vmem:[%s2066_s13 + $0x38] sm:$0xff] %v1185_v60  ;;  %v1247_v47 = vadd.f32 %v1239_v58, %v1230_v56  ;;  %v1256_v2 = vmul.f32 %v2073_v32, %v1204_v57  ;;  %s1726_s16 = scalar_lea.hbm %s1725_s8, 8  ;;  %p1731_p1 = scmp.lt.s32.totalorder %s1725_s8, %s2181_s9 }
 0x1cd   : > { %v1211_v3 = vmul.f32 %v1203_v0, %v1195_v63  ;;  %v1246_v4 = vmul.f32 %v2060_v27, %v1203_v0  ;;  %v1205_v8 = vmul.f32 %v1197_v46, %v1189_v1  ;;  %v1240_v9 = vmul.f32 %v2060_v27, %v1197_v46  ;;  %p1727_p12 = scmp.ne.s32.totalorder %s1725_s8, %s1726_s16  ;;  %p1732_p2 = scmp.lt.s32.totalorder %s1730_s18, %s1726_s16 }
 0x1ce   : > { %v1264_v7 = vadd.f32 %v1256_v2, %v1247_v47  ;;  %v1210_v31 = vmul.f32 %v1202_v50, %v1194_v49  ;;  %v1245_v33 = vmul.f32 %v2060_v27, %v1202_v50 }
 0x1cf   : > { %v1116_v10 = vpop.f32.mrf.mxu2  ;;  %v1254_v19 = vadd.f32 %v1246_v4, %v1237_v12  ;;  %v1263_v20 = vmul.f32 %v2073_v32, %v1211_v3  ;;  %v1248_v23 = vadd.f32 %v1240_v9, %v1231_v15  ;;  %v1257_v24 = vmul.f32 %v2073_v32, %v1205_v8  ;;  %p1728_p13 = pnand %p1727_p12, %p1895_p4  ;;  %p1733_p3 = por %p1732_p2, %p1731_p1 }
 0x1d0   : > { %v1200_v13 = vmul.f32 %v1116_v10, %v2006_v51  ;;  %1224 = vst [vmem:[%s2066_s13 + $0x20] sm:$0xff] %v1116_v10  ;;  %1278 = vadd.xlane.f32.xlu1 %v1267_v6  ;;  %1272 = vadd.xlane.f32.xlu0 %v1264_v7  ;;  %v1253_v39 = vadd.f32 %v1245_v33, %v1236_v36 }
 0x1d1   : > { %v1271_v28 = vadd.f32 %v1263_v20, %v1254_v19  ;;  %v1265_v34 = vadd.f32 %v1257_v24, %v1248_v23  ;;  %v1262_v40 = vmul.f32 %v2073_v32, %v1210_v31  ;;  %p1729_p0 = pneg %p1728_p13 }
 0x1d2   : > { %v1208_v5 = vmul.f32 %v1200_v13, %v1192_v11  ;;  %v1243_v17 = vmul.f32 %v2060_v27, %v1200_v13  ;;  %v1139_v18 = vpop.f32.mrf.mxu3 }
 0x1d3   : > { %v1201_v22 = vmul.f32 %v1139_v18, %v2009_v53  ;;  %1225 = vst [vmem:[%s2066_s13 + $0x28] sm:$0xff] %v1139_v18  ;;  %v1270_v42 = vadd.f32 %v1262_v40, %v1253_v39  ;;  %s1334_s13 = scalar_lea.sflag [#allocation4], %s464_s14  ;;  %p1734_p5 = pnand %p1733_p3, %p1729_p0 }
 0x1d4   : > { %v1251_v25 = vadd.f32 %v1243_v17, %v1234_v16  ;;  %v1260_v51 = vmul.f32 %v2073_v32, %v1208_v5 }
 0x1d5   : > { %v1209_v14 = vmul.f32 %v1201_v22, %v1193_v21  ;;  %v1244_v26 = vmul.f32 %v2060_v27, %v1201_v22 }
 0x1d6   : > { %v1268_v29 = vadd.f32 %v1260_v51, %v1251_v25 }
 0x1d7   : > { %v1252_v37 = vadd.f32 %v1244_v26, %v1235_v35  ;;  %v1261_v38 = vmul.f32 %v2073_v32, %v1209_v14 }
 0x1d8   : > { %1286 = vadd.xlane.f32.xlu1 %v1271_v28  ;;  %1280 = vadd.xlane.f32.xlu2 %v1268_v29 }
 0x1d9   : > { %1274 = vadd.xlane.f32.xlu0 %v1265_v34  ;;  %v1269_v41 = vadd.f32 %v1261_v38, %v1252_v37 }
 0x1e0   : > { %1282 = vadd.xlane.f32.xlu2 %v1269_v41 }
 0x1e1   : > { %1284 = vadd.xlane.f32.xlu0 %v1270_v42 }
 0x23b   : > { %v1277_v27 = vpop.xlane.xlu1 %1276 }
 0x23c   : > { %v1292_v54 = vadd.f32 %v1289_v48, %v1277_v27 }
 0x23e   : > { %v1310_v59 = vperm.slane %v1292_v54, %v1307_v52 }
 0x243   : > { %v1273_v53 = vpop.xlane.xlu0 %1272  ;;  %v1279_v43 = vpop.xlane.xlu1 %1278 }
 0x244   : > { %v1290_v30 = vadd.f32 %v1289_v48, %v1273_v53  ;;  %v1293_v32 = vadd.f32 %v1289_v48, %v1279_v43 }
 0x246   : > { %v1308_v57 = vperm.slane %v1290_v30, %v1307_v52  ;;  %v1311_v46 = vperm.slane %v1293_v32, %v1307_v52 }
 0x24b   : > { %v1281_v45 = vpop.xlane.xlu2 %1280  ;;  %v1287_v60 = vpop.xlane.xlu1 %1286 }
 0x24c   : > { %v1275_v55 = vpop.xlane.xlu0 %1274  ;;  %v1294_v61 = vadd.f32 %v1289_v48, %v1281_v45  ;;  %v1297_v1 = vadd.f32 %v1289_v48, %v1287_v60 }
 0x24d   : > { %v1291_v56 = vadd.f32 %v1289_v48, %v1275_v55 }
 0x24e   : > { %v1312_v4 = vperm.slane %v1294_v61, %v1307_v52  ;;  %v1315_v10 = vperm.slane %v1297_v1, %v1307_v52 }
 0x24f   : > { %v1309_v58 = vperm.slane %v1291_v56, %v1307_v52 }
 0x251   : > { %v1317_v62 = vsel %vm1316_vm5, %v1309_v58, %v1308_v57 }
 0x252   : > { %v1319_v63 = vsel %vm1318_vm6, %v1310_v59, %v1317_v62 }
 0x253   : > { %v1283_v0 = vpop.xlane.xlu2 %1282  ;;  %v1321_v2 = vsel %vm1320_vm7, %v1311_v46, %v1319_v63 }
 0x254   : > { %v1285_v47 = vpop.xlane.xlu0 %1284  ;;  %v1295_v3 = vadd.f32 %v1289_v48, %v1283_v0  ;;  %v1323_v9 = vsel %vm1322_vm8, %v1312_v4, %v1321_v2 }
 0x255   : > { %v1296_v6 = vadd.f32 %v1289_v48, %v1285_v47 }
 0x256   : > { %v1313_v7 = vperm.slane %v1295_v3, %v1307_v52 }
 0x257   : > { %v1314_v8 = vperm.slane %v1296_v6, %v1307_v52 }
 0x258   : > { %v1325_v11 = vsel %vm1324_vm9, %v1313_v7, %v1323_v9 }
 0x259   : > { %v1327_v12 = vsel %vm1326_vm10, %v1314_v8, %v1325_v11 }
 0x25a   : > { %v1329_v13 = vsel %vm1328_vm11, %v1315_v10, %v1327_v12 }
 0x25b   : > { %1332 = vst.msk [vmem:[%s466_s22] sm:$0xff] %vm1331_vm12, %v1329_v13 }
 0x25c   : > { %1737 = shalt.err (!%p1734_p5)
}
 0x25d   : > { %1653 = dma.vmem_to_hbm [thread:$0]  (%p1895_p4), %s1366_s27, 128, %s1368_s29, %s1334_s13  }
 0x25e PF: > { %p1659_p6 = scmp.ge.s32.totalorder %s1788_s24, 2  ;;  %s1387_s14 = sand.u32 1, %s1768_s19  }
 0x25f   : > { %s1388_s22 = scalar_lea.sflag [#allocation4], %s1387_s14 }
 0x260   : > { %p1656_p7 = pnand %p1659_p6, %p1902_p8 }
 0x262   : > { %p1657_p9 = pneg %p1656_p7 }
 0x264   : > { %1763 = dma.done.wait (%p1657_p9), %s1388_s22, 128  }
 0x265   : > { %1765 = vsyncadd (%p1657_p9), %s1388_s22, 4294967168  ;;  %s26_s24 = sadd.s32 1, %s1788_s24   ;;  %s2188_s19 = smov %s1772_s20 }
 0x266   : > { %p23_p10 = scmp.ge.s32.totalorder %s26_s24, 4   ;;  %s2189_s20 = smov %s1776_s21 }
 0x267   : > { %s2190_s21 = smov %s1908_s12  ;;  %s2191_s22 = smov %s1784_s23 }
 0x268   : > { %s2192_s23 = smov %s2194_s26  ;;  %25 = sbr.rel (!%p23_p10) target bundleno = 7 (0x7), region = 131 }
 0x26d   :  { %1418 = vsyncpa [#allocation4], 1 }
 0x26e   :  { %1420 = vsyncpa [#allocation4 + $0x1], 1 }

</bundles_post_ra>
